<compile_context>
chip_gen: v7x
topology: tpu7x:2x2x1
jax: 0.10.0
libtpu: 0.0.40
codegen_flags: <defaults>
</compile_context>

<pallas_src>
import functools

import jax
import jax.numpy as jnp
from jax.experimental import pallas as pl
from jax.experimental.pallas import tpu as pltpu


# ----------------------------------------------------------------------------
# Fused kernel: upsample(x1) + pad + concat(x2, x1) + [conv3x3 + BN + ReLU] * 2
# One grid step = one image; channel-major layout; everything stays in VMEM.
# ----------------------------------------------------------------------------
def _up_doubleconv_kernel(
    x1_ref,    # (1, C1, W1, H1) bf16  low-res map, last two axes pre-swapped
    x2_ref,    # (1, C1, H, W)   f32   skip connection (NCHW)
    uyT_ref,   # (H1, H)  bf16   row upsample(+pad/crop) operator, transposed
    uxT_ref,   # (W1, W)  bf16   col upsample(+pad/crop) operator, transposed
    w1_ref,    # (Cout, 9*Ccat) bf16   conv1 weights, (ky, kx, cin)-flattened
    s1_ref,    # (Cout, 1) f32   folded BN scale = gamma / sqrt(var + eps)
    b1_ref,    # (Cout, 1) f32   folded BN bias  = (conv_b - mean)*scale + beta
    w2_ref,    # (Cout, 9*Cout) bf16
    s2_ref,    # (Cout, 1) f32
    b2_ref,    # (Cout, 1) f32
    o_ref,     # (1, Cout, H*W)  f32   lane-dense output (minor dim = H*W)
    pad1,      # VMEM scratch (Ccat, H+2, W+2) f32 : concat + conv1 halo
    pad2,      # VMEM scratch (Cout, H+2, W+2) f32 : intermediate + conv2 halo
):
    C1, W1, H1 = x1_ref.shape[1], x1_ref.shape[2], x1_ref.shape[3]
    H, W = x2_ref.shape[2], x2_ref.shape[3]
    Ccat = pad1.shape[0]
    Cout = o_ref.shape[1]

    # Zero only the 1-px halo borders (they implement conv padding=1); the
    # interiors are fully overwritten below.  Done every step (not only at
    # program_id == 0) so it remains correct when the 'parallel' batch axis is
    # partitioned across two TensorCores (each core has its own scratch).
    def _zero_border(ref, c, h, w):
        ref[:, 0:1, :] = jnp.zeros((c, 1, w + 2), jnp.float32)
        ref[:, h + 1:h + 2, :] = jnp.zeros((c, 1, w + 2), jnp.float32)
        ref[:, :, 0:1] = jnp.zeros((c, h + 2, 1), jnp.float32)
        ref[:, :, w + 1:w + 2] = jnp.zeros((c, h + 2, 1), jnp.float32)

    _zero_border(pad1, Ccat, H, W)
    _zero_border(pad2, Cout, H, W)

    # 1) Separable bilinear upsample (align_corners=True) + pad/crop to x2 size,
    #    folded into the small uyT/uxT operators: two tiny bf16 MXU matmuls
    #    instead of a dense (H*W, H1*W1) operator.
    #    H pass: x1 arrives as (C1, W1, H1), so H1 is already the minor dim.
    v = jnp.dot(x1_ref[0].reshape(C1 * W1, H1), uyT_ref[...],
                preferred_element_type=jnp.float32)              # (C1*W1, H)
    v = jnp.transpose(v.reshape(C1, W1, H), (0, 2, 1))           # (C1, H, W1)
    #    W pass.
    x1u = jnp.dot(v.reshape(C1 * H, W1).astype(jnp.bfloat16), uxT_ref[...],
                  preferred_element_type=jnp.float32)            # (C1*H, W)
    x1u = x1u.reshape(C1, H, W)

    # 2) Channel concat [x2, x1_up] (== torch.cat(dim=1)) written to the halo
    #    interior with a single store.
    cat = jnp.concatenate([x2_ref[0], x1u], axis=0)              # (Ccat, H, W)
    pad1[:, 1:H + 1, 1:W + 1] = cat

    # 3) conv1 (3x3, pad=1) + folded BN + ReLU as ONE im2col matmul: the 9 taps
    #    are folded into the contraction dim -> (Cout, 9*Ccat) x (9*Ccat, H*W).
    patches = jnp.concatenate(
        [pad1[:, dy:dy + H, dx:dx + W].reshape(Ccat, H * W)
         for dy in range(3) for dx in range(3)], axis=0)         # (9*Ccat, H*W)
    y1 = jnp.dot(w1_ref[...], patches.astype(jnp.bfloat16),
                 preferred_element_type=jnp.float32)             # (Cout, H*W)
    y1 = jnp.maximum(y1 * s1_ref[...] + b1_ref[...], 0.0)

    # 4) Stage the intermediate activation into the second halo scratch.
    pad2[:, 1:H + 1, 1:W + 1] = y1.reshape(Cout, H, W)

    # 5) conv2 (3x3, pad=1) + folded BN + ReLU, same im2col form.
    patches2 = jnp.concatenate(
        [pad2[:, dy:dy + H, dx:dx + W].reshape(Cout, H * W)
         for dy in range(3) for dx in range(3)], axis=0)         # (9*Cout, H*W)
    y2 = jnp.dot(w2_ref[...], patches2.astype(jnp.bfloat16),
                 preferred_element_type=jnp.float32)             # (Cout, H*W)
    y2 = jnp.maximum(y2 * s2_ref[...] + b2_ref[...], 0.0)

    # 6) Lane-dense store: minor output dim is H*W (a multiple of 128), not Cout.
    o_ref[0] = y2.astype(o_ref.dtype)


# ----------------------------------------------------------------------------
# Separable upsample(+pad/crop) factors (precomputed, deterministic)
# ----------------------------------------------------------------------------
def _bilinear_matrix(n_in, n_out):
    """Interpolation matrix of nn.Upsample(mode='bilinear', align_corners=True)."""
    if n_in == 1:
        return jnp.ones((n_out, 1), jnp.float32)
    if n_out == 1:
        return jnp.zeros((1, n_in), jnp.float32).at[0, 0].set(1.0)
    src = jnp.arange(n_out, dtype=jnp.float32) * (n_in - 1) / (n_out - 1)
    i0 = jnp.clip(jnp.floor(src).astype(jnp.int32), 0, n_in - 1)
    i1 = jnp.clip(i0 + 1, 0, n_in - 1)
    w = src - i0.astype(jnp.float32)
    return (jax.nn.one_hot(i0, n_in, dtype=jnp.float32) * (1.0 - w)[:, None]
            + jax.nn.one_hot(i1, n_in, dtype=jnp.float32) * w[:, None])


def _pad_or_crop_rows(m, target):
    """F.pad semantics along axis 0: positive pads with zeros, negative crops."""
    d = target - m.shape[0]
    before, after = d // 2, d - d // 2
    if before >= 0:
        m = jnp.pad(m, ((before, 0), (0, 0)))
    else:
        m = m[-before:]
    if after > 0:
        m = jnp.pad(m, ((0, after), (0, 0)))
    elif after < 0:
        m = m[:after]
    return m


def _upsample_pad_factors(h1, w1, h2, w2):
    """Separable 2x bilinear upsample (align_corners=True) + F.pad/crop to
    (h2, w2) from Up.forward.  Returned transposed: (H1, H2), (W1, W2)."""
    uy = _pad_or_crop_rows(_bilinear_matrix(h1, 2 * h1), h2)   # (H2, H1)
    ux = _pad_or_crop_rows(_bilinear_matrix(w1, 2 * w1), w2)   # (W2, W1)
    return uy.T, ux.T


# ----------------------------------------------------------------------------
# Wrapper: one fused pallas_call for the whole Up forward (NCHW in, NCHW out)
# ----------------------------------------------------------------------------
def up_forward_nchw(x1_nchw, x2_nchw, params):
    N, C1, H1, W1 = x1_nchw.shape
    N2, C2, H2, W2 = x2_nchw.shape
    assert N == N2 and C1 == C2
    Cout, K1 = params["w1_2d"].shape
    Ccat = K1 // 9
    assert Ccat == 2 * C1

    uyT, uxT = _upsample_pad_factors(H1, W1, H2, W2)

    # bf16 MXU operands; accumulation stays f32 inside the kernel.
    x1_t = jnp.swapaxes(x1_nchw, 2, 3).astype(jnp.bfloat16)   # (N, C1, W1, H1)
    uyT = uyT.astype(jnp.bfloat16)
    uxT = uxT.astype(jnp.bfloat16)
    w1 = params["w1_2d"].astype(jnp.bfloat16)
    w2 = params["w2_2d"].astype(jnp.bfloat16)
    s1 = params["scale1"].reshape(Cout, 1).astype(jnp.float32)
    b1 = params["bias1"].reshape(Cout, 1).astype(jnp.float32)
    s2 = params["scale2"].reshape(Cout, 1).astype(jnp.float32)
    b2 = params["bias2"].reshape(Cout, 1).astype(jnp.float32)

    out_flat = pl.pallas_call(
        _up_doubleconv_kernel,
        out_shape=jax.ShapeDtypeStruct((N, Cout, H2 * W2), x2_nchw.dtype),
        grid=(N,),
        in_specs=[
            pl.BlockSpec((1, C1, W1, H1), lambda n: (n, 0, 0, 0)),
            pl.BlockSpec((1, C1, H2, W2), lambda n: (n, 0, 0, 0)),
            pl.BlockSpec((H1, H2), lambda n: (0, 0)),
            pl.BlockSpec((W1, W2), lambda n: (0, 0)),
            pl.BlockSpec((Cout, 9 * Ccat), lambda n: (0, 0)),
            pl.BlockSpec((Cout, 1), lambda n: (0, 0)),
            pl.BlockSpec((Cout, 1), lambda n: (0, 0)),
            pl.BlockSpec((Cout, 9 * Cout), lambda n: (0, 0)),
            pl.BlockSpec((Cout, 1), lambda n: (0, 0)),
            pl.BlockSpec((Cout, 1), lambda n: (0, 0)),
        ],
        out_specs=pl.BlockSpec((1, Cout, H2 * W2), lambda n: (n, 0, 0)),
        scratch_shapes=[
            pltpu.VMEM((Ccat, H2 + 2, W2 + 2), jnp.float32),
            pltpu.VMEM((Cout, H2 + 2, W2 + 2), jnp.float32),
        ],
        compiler_params=pltpu.CompilerParams(
            # Batch images are independent -> both TensorCores on v7x.
            dimension_semantics=("parallel",),
        ),
    )(x1_t, x2_nchw, uyT, uxT, w1, s1, b1, w2, s2, b2)

    # Free row-major reshape back to NCHW.
    return out_flat.reshape(N, Cout, H2, W2)


# ----------------------------------------------------------------------------
# Deterministic parameter construction (synthetic, no checkpoint load)
# ----------------------------------------------------------------------------
def make_params(key, in_channels, out_channels):
    """Conv weights (PyTorch OIHW) flattened to (Cout, 9*Cin) in (ky, kx, cin)
    order to match the kernel's im2col patch layout; eval-mode BN (and the conv
    bias) folded into per-channel scale/bias."""
    eps = 1e-5
    ks = jax.random.split(key, 6)

    def conv_w2d(k, cin, cout):
        w_oihw = 0.1 * jax.random.normal(k, (cout, cin, 3, 3), jnp.float32)
        # (O, I, kH, kW) -> (O, kH, kW, I) -> (O, 9*I): column = (ky*3+kx)*I + c.
        return jnp.transpose(w_oihw, (0, 2, 3, 1)).reshape(cout, 9 * cin)

    def bn(k, c):
        k1, k2, k3, k4 = jax.random.split(k, 4)
        gamma = 1.0 + 0.1 * jax.random.normal(k1, (c,), jnp.float32)
        beta = 0.1 * jax.random.normal(k2, (c,), jnp.float32)
        mean = 0.05 * jax.random.normal(k3, (c,), jnp.float32)
        var = 1.0 + 0.1 * jax.nn.softplus(jax.random.normal(k4, (c,), jnp.float32))
        return gamma, beta, mean, var

    w1 = conv_w2d(ks[0], in_channels, out_channels)
    cb1 = 0.05 * jax.random.normal(ks[1], (out_channels,), jnp.float32)
    g1, be1, m1, v1 = bn(ks[2], out_channels)
    scale1 = g1 / jnp.sqrt(v1 + eps)
    bias1 = (cb1 - m1) * scale1 + be1

    w2 = conv_w2d(ks[3], out_channels, out_channels)
    cb2 = 0.05 * jax.random.normal(ks[4], (out_channels,), jnp.float32)
    g2, be2, m2, v2 = bn(ks[5], out_channels)
    scale2 = g2 / jnp.sqrt(v2 + eps)
    bias2 = (cb2 - m2) * scale2 + be2

    return dict(w1_2d=w1, scale1=scale1, bias1=bias1,
                w2_2d=w2, scale2=scale2, bias2=bias2)


# ----------------------------------------------------------------------------
if __name__ == "__main__":
    key = jax.random.PRNGKey(0)
    k_x1, k_x2, k_p = jax.random.split(key, 3)

    # Up(in_channels=8, out_channels=4): x1 and x2 each carry in_channels//2 = 4.
    N, C_half = 2, 4
    H1, W1 = 8, 8            # low-res feature map (to be upsampled 2x)
    H2, W2 = 16, 16          # skip-connection feature map
    in_channels, out_channels = 2 * C_half, 4

    x1 = jax.random.normal(k_x1, (N, C_half, H1, W1), jnp.float32)   # NCHW
    x2 = jax.random.normal(k_x2, (N, C_half, H2, W2), jnp.float32)   # NCHW
    params = make_params(k_p, in_channels, out_channels)

    fwd = jax.jit(functools.partial(up_forward_nchw, params=params))
    out = fwd(x1, x2)                                                # NCHW
    jax.block_until_ready(out)

    assert out.shape == (N, out_channels, H2, W2), out.shape
    print("KERNEL_OK")
</pallas_src>

<mosaic_0001>
module attributes {stable_mosaic.version = 11 : i64} {
  func.func @_up_doubleconv_kernel(%arg0: i32, %arg1: memref<1x4x8x8xbf16, #tpu.memory_space<vmem>>, %arg2: memref<1x4x16x16xf32, #tpu.memory_space<vmem>>, %arg3: memref<8x16xbf16, #tpu.memory_space<vmem>>, %arg4: memref<8x16xbf16, #tpu.memory_space<vmem>>, %arg5: memref<4x72xbf16, #tpu.memory_space<vmem>>, %arg6: memref<4x1xf32, #tpu.memory_space<vmem>>, %arg7: memref<4x1xf32, #tpu.memory_space<vmem>>, %arg8: memref<4x36xbf16, #tpu.memory_space<vmem>>, %arg9: memref<4x1xf32, #tpu.memory_space<vmem>>, %arg10: memref<4x1xf32, #tpu.memory_space<vmem>>, %arg11: memref<1x4x256xf32, #tpu.memory_space<vmem>>, %arg12: memref<8x18x18xf32, #tpu.memory_space<vmem>>, %arg13: memref<4x18x18xf32, #tpu.memory_space<vmem>>) attributes {dimension_semantics = [#tpu.dimension_semantics<parallel>], iteration_bounds = array<i64: 2>, scalar_prefetch = 0 : i64, scratch_operands = 2 : i64, tpu.core_type = #tpu.core_type<tc>, window_params = [{transform_indices = @transform_0, window_bounds = array<i64: 1, 4, 8, 8>}, {transform_indices = @transform_1, window_bounds = array<i64: 1, 4, 16, 16>}, {pipeline_mode = #tpu.pipeline_mode<synchronous>, transform_indices = @transform_2, window_bounds = array<i64: 8, 16>}, {pipeline_mode = #tpu.pipeline_mode<synchronous>, transform_indices = @transform_3, window_bounds = array<i64: 8, 16>}, {pipeline_mode = #tpu.pipeline_mode<synchronous>, transform_indices = @transform_4, window_bounds = array<i64: 4, 72>}, {pipeline_mode = #tpu.pipeline_mode<synchronous>, transform_indices = @transform_5, window_bounds = array<i64: 4, 1>}, {pipeline_mode = #tpu.pipeline_mode<synchronous>, transform_indices = @transform_6, window_bounds = array<i64: 4, 1>}, {pipeline_mode = #tpu.pipeline_mode<synchronous>, transform_indices = @transform_7, window_bounds = array<i64: 4, 36>}, {pipeline_mode = #tpu.pipeline_mode<synchronous>, transform_indices = @transform_8, window_bounds = array<i64: 4, 1>}, {pipeline_mode = #tpu.pipeline_mode<synchronous>, transform_indices = @transform_9, window_bounds = array<i64: 4, 1>}, {transform_indices = @transform_10, window_bounds = array<i64: 1, 4, 256>}]} {
    %cst = arith.constant 0.000000e+00 : f32
    %0 = vector.broadcast %cst : f32 to vector<8x1x18xf32>
    %c0 = arith.constant 0 : index
    %c0_0 = arith.constant 0 : index
    %c0_1 = arith.constant 0 : index
    %1 = vector.load %arg12[%c0, %c0_0, %c0_1] : memref<8x18x18xf32, #tpu.memory_space<vmem>>, vector<8x1x18xf32>
    tpu.vector_store %arg12[%c0, %c0_0, %c0_1], %0 {strides = array<i32>} : memref<8x18x18xf32, #tpu.memory_space<vmem>>, vector<8x1x18xf32>,
    %cst_2 = arith.constant 0.000000e+00 : f32
    %2 = vector.broadcast %cst_2 : f32 to vector<8x1x18xf32>
    %c0_3 = arith.constant 0 : index
    %c17 = arith.constant 17 : index
    %c0_4 = arith.constant 0 : index
    %3 = vector.load %arg12[%c0_3, %c17, %c0_4] : memref<8x18x18xf32, #tpu.memory_space<vmem>>, vector<8x1x18xf32>
    tpu.vector_store %arg12[%c0_3, %c17, %c0_4], %2 {strides = array<i32>} : memref<8x18x18xf32, #tpu.memory_space<vmem>>, vector<8x1x18xf32>,
    %cst_5 = arith.constant 0.000000e+00 : f32
    %4 = vector.broadcast %cst_5 : f32 to vector<8x18x1xf32>
    %c0_6 = arith.constant 0 : index
    %c0_7 = arith.constant 0 : index
    %c0_8 = arith.constant 0 : index
    %5 = vector.load %arg12[%c0_6, %c0_7, %c0_8] : memref<8x18x18xf32, #tpu.memory_space<vmem>>, vector<8x18x1xf32>
    tpu.vector_store %arg12[%c0_6, %c0_7, %c0_8], %4 {strides = array<i32>} : memref<8x18x18xf32, #tpu.memory_space<vmem>>, vector<8x18x1xf32>,
    %cst_9 = arith.constant 0.000000e+00 : f32
    %6 = vector.broadcast %cst_9 : f32 to vector<8x18x1xf32>
    %c0_10 = arith.constant 0 : index
    %c0_11 = arith.constant 0 : index
    %c17_12 = arith.constant 17 : index
    %7 = vector.load %arg12[%c0_10, %c0_11, %c17_12] : memref<8x18x18xf32, #tpu.memory_space<vmem>>, vector<8x18x1xf32>
    tpu.vector_store %arg12[%c0_10, %c0_11, %c17_12], %6 {strides = array<i32>} : memref<8x18x18xf32, #tpu.memory_space<vmem>>, vector<8x18x1xf32>,
    %cst_13 = arith.constant 0.000000e+00 : f32
    %8 = vector.broadcast %cst_13 : f32 to vector<4x1x18xf32>
    %c0_14 = arith.constant 0 : index
    %c0_15 = arith.constant 0 : index
    %c0_16 = arith.constant 0 : index
    %9 = vector.load %arg13[%c0_14, %c0_15, %c0_16] : memref<4x18x18xf32, #tpu.memory_space<vmem>>, vector<4x1x18xf32>
    tpu.vector_store %arg13[%c0_14, %c0_15, %c0_16], %8 {strides = array<i32>} : memref<4x18x18xf32, #tpu.memory_space<vmem>>, vector<4x1x18xf32>,
    %cst_17 = arith.constant 0.000000e+00 : f32
    %10 = vector.broadcast %cst_17 : f32 to vector<4x1x18xf32>
    %c0_18 = arith.constant 0 : index
    %c17_19 = arith.constant 17 : index
    %c0_20 = arith.constant 0 : index
    %11 = vector.load %arg13[%c0_18, %c17_19, %c0_20] : memref<4x18x18xf32, #tpu.memory_space<vmem>>, vector<4x1x18xf32>
    tpu.vector_store %arg13[%c0_18, %c17_19, %c0_20], %10 {strides = array<i32>} : memref<4x18x18xf32, #tpu.memory_space<vmem>>, vector<4x1x18xf32>,
    %cst_21 = arith.constant 0.000000e+00 : f32
    %12 = vector.broadcast %cst_21 : f32 to vector<4x18x1xf32>
    %c0_22 = arith.constant 0 : index
    %c0_23 = arith.constant 0 : index
    %c0_24 = arith.constant 0 : index
    %13 = vector.load %arg13[%c0_22, %c0_23, %c0_24] : memref<4x18x18xf32, #tpu.memory_space<vmem>>, vector<4x18x1xf32>
    tpu.vector_store %arg13[%c0_22, %c0_23, %c0_24], %12 {strides = array<i32>} : memref<4x18x18xf32, #tpu.memory_space<vmem>>, vector<4x18x1xf32>,
    %cst_25 = arith.constant 0.000000e+00 : f32
    %14 = vector.broadcast %cst_25 : f32 to vector<4x18x1xf32>
    %c0_26 = arith.constant 0 : index
    %c0_27 = arith.constant 0 : index
    %c17_28 = arith.constant 17 : index
    %15 = vector.load %arg13[%c0_26, %c0_27, %c17_28] : memref<4x18x18xf32, #tpu.memory_space<vmem>>, vector<4x18x1xf32>
    tpu.vector_store %arg13[%c0_26, %c0_27, %c17_28], %14 {strides = array<i32>} : memref<4x18x18xf32, #tpu.memory_space<vmem>>, vector<4x18x1xf32>,
    %c0_29 = arith.constant 0 : index
    %c0_30 = arith.constant 0 : index
    %c0_31 = arith.constant 0 : index
    %c0_32 = arith.constant 0 : index
    %16 = vector.load %arg1[%c0_29, %c0_30, %c0_31, %c0_32] : memref<1x4x8x8xbf16, #tpu.memory_space<vmem>>, vector<1x4x8x8xbf16>
    %17 = vector.shape_cast %16 : vector<1x4x8x8xbf16> to vector<4x8x8xbf16>
    %18 = vector.shape_cast %17 : vector<4x8x8xbf16> to vector<32x8xbf16>
    %c0_33 = arith.constant 0 : index
    %c0_34 = arith.constant 0 : index
    %19 = vector.load %arg3[%c0_33, %c0_34] : memref<8x16xbf16, #tpu.memory_space<vmem>>, vector<8x16xbf16>
    %cst_35 = arith.constant dense<0.000000e+00> : vector<32x16xf32>
    %20 = tpu.matmul %18, %19, %cst_35 {dimension_numbers = #tpu.dot_dimension_numbers<[1], [0], [0], [1], [0, 0, 1, 1], [], []>} : vector<32x8xbf16>, vector<8x16xbf16>, vector<32x16xf32> -> vector<32x16xf32>
    %21 = vector.shape_cast %20 : vector<32x16xf32> to vector<4x8x16xf32>
    %22 = tpu.transpose %21, [0, 2, 1] : vector<4x8x16xf32> -> vector<4x16x8xf32>
    %23 = vector.shape_cast %22 : vector<4x16x8xf32> to vector<64x8xf32>
    %24 = arith.truncf %23 : vector<64x8xf32> to vector<64x8xbf16>
    %c0_36 = arith.constant 0 : index
    %c0_37 = arith.constant 0 : index
    %25 = vector.load %arg4[%c0_36, %c0_37] : memref<8x16xbf16, #tpu.memory_space<vmem>>, vector<8x16xbf16>
    %cst_38 = arith.constant dense<0.000000e+00> : vector<64x16xf32>
    %26 = tpu.matmul %24, %25, %cst_38 {dimension_numbers = #tpu.dot_dimension_numbers<[1], [0], [0], [1], [0, 0, 1, 1], [], []>} : vector<64x8xbf16>, vector<8x16xbf16>, vector<64x16xf32> -> vector<64x16xf32>
    %27 = vector.shape_cast %26 : vector<64x16xf32> to vector<4x16x16xf32>
    %c0_39 = arith.constant 0 : index
    %c0_40 = arith.constant 0 : index
    %c0_41 = arith.constant 0 : index
    %c0_42 = arith.constant 0 : index
    %28 = vector.load %arg2[%c0_39, %c0_40, %c0_41, %c0_42] : memref<1x4x16x16xf32, #tpu.memory_space<vmem>>, vector<1x4x16x16xf32>
    %29 = vector.shape_cast %28 : vector<1x4x16x16xf32> to vector<4x16x16xf32>
    %30 = tpu.concatenate %29, %27 in 0 : vector<4x16x16xf32>, vector<4x16x16xf32> -> vector<8x16x16xf32>
    %c0_43 = arith.constant 0 : index
    %c1 = arith.constant 1 : index
    %c1_44 = arith.constant 1 : index
    %31 = vector.load %arg12[%c0_43, %c1, %c1_44] : memref<8x18x18xf32, #tpu.memory_space<vmem>>, vector<8x16x16xf32>
    tpu.vector_store %arg12[%c0_43, %c1, %c1_44], %30 {strides = array<i32>} : memref<8x18x18xf32, #tpu.memory_space<vmem>>, vector<8x16x16xf32>,
    %c0_45 = arith.constant 0 : index
    %c0_46 = arith.constant 0 : index
    %c0_47 = arith.constant 0 : index
    %32 = vector.load %arg12[%c0_45, %c0_46, %c0_47] : memref<8x18x18xf32, #tpu.memory_space<vmem>>, vector<8x16x16xf32>
    %33 = vector.shape_cast %32 : vector<8x16x16xf32> to vector<8x256xf32>
    %c0_48 = arith.constant 0 : index
    %c0_49 = arith.constant 0 : index
    %c1_50 = arith.constant 1 : index
    %34 = vector.load %arg12[%c0_48, %c0_49, %c1_50] : memref<8x18x18xf32, #tpu.memory_space<vmem>>, vector<8x16x16xf32>
    %35 = vector.shape_cast %34 : vector<8x16x16xf32> to vector<8x256xf32>
    %c0_51 = arith.constant 0 : index
    %c0_52 = arith.constant 0 : index
    %c2 = arith.constant 2 : index
    %36 = vector.load %arg12[%c0_51, %c0_52, %c2] : memref<8x18x18xf32, #tpu.memory_space<vmem>>, vector<8x16x16xf32>
    %37 = vector.shape_cast %36 : vector<8x16x16xf32> to vector<8x256xf32>
    %c0_53 = arith.constant 0 : index
    %c1_54 = arith.constant 1 : index
    %c0_55 = arith.constant 0 : index
    %38 = vector.load %arg12[%c0_53, %c1_54, %c0_55] : memref<8x18x18xf32, #tpu.memory_space<vmem>>, vector<8x16x16xf32>
    %39 = vector.shape_cast %38 : vector<8x16x16xf32> to vector<8x256xf32>
    %c0_56 = arith.constant 0 : index
    %c1_57 = arith.constant 1 : index
    %c1_58 = arith.constant 1 : index
    %40 = vector.load %arg12[%c0_56, %c1_57, %c1_58] : memref<8x18x18xf32, #tpu.memory_space<vmem>>, vector<8x16x16xf32>
    %41 = vector.shape_cast %40 : vector<8x16x16xf32> to vector<8x256xf32>
    %c0_59 = arith.constant 0 : index
    %c1_60 = arith.constant 1 : index
    %c2_61 = arith.constant 2 : index
    %42 = vector.load %arg12[%c0_59, %c1_60, %c2_61] : memref<8x18x18xf32, #tpu.memory_space<vmem>>, vector<8x16x16xf32>
    %43 = vector.shape_cast %42 : vector<8x16x16xf32> to vector<8x256xf32>
    %c0_62 = arith.constant 0 : index
    %c2_63 = arith.constant 2 : index
    %c0_64 = arith.constant 0 : index
    %44 = vector.load %arg12[%c0_62, %c2_63, %c0_64] : memref<8x18x18xf32, #tpu.memory_space<vmem>>, vector<8x16x16xf32>
    %45 = vector.shape_cast %44 : vector<8x16x16xf32> to vector<8x256xf32>
    %c0_65 = arith.constant 0 : index
    %c2_66 = arith.constant 2 : index
    %c1_67 = arith.constant 1 : index
    %46 = vector.load %arg12[%c0_65, %c2_66, %c1_67] : memref<8x18x18xf32, #tpu.memory_space<vmem>>, vector<8x16x16xf32>
    %47 = vector.shape_cast %46 : vector<8x16x16xf32> to vector<8x256xf32>
    %c0_68 = arith.constant 0 : index
    %c2_69 = arith.constant 2 : index
    %c2_70 = arith.constant 2 : index
    %48 = vector.load %arg12[%c0_68, %c2_69, %c2_70] : memref<8x18x18xf32, #tpu.memory_space<vmem>>, vector<8x16x16xf32>
    %49 = vector.shape_cast %48 : vector<8x16x16xf32> to vector<8x256xf32>
    %50 = tpu.concatenate %33, %35, %37, %39, %41, %43, %45, %47, %49 in 0 : vector<8x256xf32>, vector<8x256xf32>, vector<8x256xf32>, vector<8x256xf32>, vector<8x256xf32>, vector<8x256xf32>, vector<8x256xf32>, vector<8x256xf32>, vector<8x256xf32> -> vector<72x256xf32>
    %c0_71 = arith.constant 0 : index
    %c0_72 = arith.constant 0 : index
    %51 = vector.load %arg5[%c0_71, %c0_72] : memref<4x72xbf16, #tpu.memory_space<vmem>>, vector<4x72xbf16>
    %52 = arith.truncf %50 : vector<72x256xf32> to vector<72x256xbf16>
    %cst_73 = arith.constant dense<0.000000e+00> : vector<4x256xf32>
    %53 = tpu.matmul %51, %52, %cst_73 {dimension_numbers = #tpu.dot_dimension_numbers<[1], [0], [0], [1], [0, 0, 1, 1], [], []>} : vector<4x72xbf16>, vector<72x256xbf16>, vector<4x256xf32> -> vector<4x256xf32>
    %c0_74 = arith.constant 0 : index
    %c0_75 = arith.constant 0 : index
    %54 = vector.load %arg6[%c0_74, %c0_75] : memref<4x1xf32, #tpu.memory_space<vmem>>, vector<4x1xf32>
    %55 = vector.broadcast %54 : vector<4x1xf32> to vector<4x256xf32>
    %56 = arith.mulf %53, %55 : vector<4x256xf32>
    %c0_76 = arith.constant 0 : index
    %c0_77 = arith.constant 0 : index
    %57 = vector.load %arg7[%c0_76, %c0_77] : memref<4x1xf32, #tpu.memory_space<vmem>>, vector<4x1xf32>
    %58 = vector.broadcast %57 : vector<4x1xf32> to vector<4x256xf32>
    %59 = arith.addf %56, %58 : vector<4x256xf32>
    %cst_78 = arith.constant 0.000000e+00 : f32
    %60 = vector.broadcast %cst_78 : f32 to vector<4x256xf32>
    %61 = arith.maximumf %59, %60 : vector<4x256xf32>
    %62 = vector.shape_cast %61 : vector<4x256xf32> to vector<4x16x16xf32>
    %c0_79 = arith.constant 0 : index
    %c1_80 = arith.constant 1 : index
    %c1_81 = arith.constant 1 : index
    %63 = vector.load %arg13[%c0_79, %c1_80, %c1_81] : memref<4x18x18xf32, #tpu.memory_space<vmem>>, vector<4x16x16xf32>
    tpu.vector_store %arg13[%c0_79, %c1_80, %c1_81], %62 {strides = array<i32>} : memref<4x18x18xf32, #tpu.memory_space<vmem>>, vector<4x16x16xf32>,
    %c0_82 = arith.constant 0 : index
    %c0_83 = arith.constant 0 : index
    %c0_84 = arith.constant 0 : index
    %64 = vector.load %arg13[%c0_82, %c0_83, %c0_84] : memref<4x18x18xf32, #tpu.memory_space<vmem>>, vector<4x16x16xf32>
    %65 = vector.shape_cast %64 : vector<4x16x16xf32> to vector<4x256xf32>
    %c0_85 = arith.constant 0 : index
    %c0_86 = arith.constant 0 : index
    %c1_87 = arith.constant 1 : index
    %66 = vector.load %arg13[%c0_85, %c0_86, %c1_87] : memref<4x18x18xf32, #tpu.memory_space<vmem>>, vector<4x16x16xf32>
    %67 = vector.shape_cast %66 : vector<4x16x16xf32> to vector<4x256xf32>
    %c0_88 = arith.constant 0 : index
    %c0_89 = arith.constant 0 : index
    %c2_90 = arith.constant 2 : index
    %68 = vector.load %arg13[%c0_88, %c0_89, %c2_90] : memref<4x18x18xf32, #tpu.memory_space<vmem>>, vector<4x16x16xf32>
    %69 = vector.shape_cast %68 : vector<4x16x16xf32> to vector<4x256xf32>
    %c0_91 = arith.constant 0 : index
    %c1_92 = arith.constant 1 : index
    %c0_93 = arith.constant 0 : index
    %70 = vector.load %arg13[%c0_91, %c1_92, %c0_93] : memref<4x18x18xf32, #tpu.memory_space<vmem>>, vector<4x16x16xf32>
    %71 = vector.shape_cast %70 : vector<4x16x16xf32> to vector<4x256xf32>
    %c0_94 = arith.constant 0 : index
    %c1_95 = arith.constant 1 : index
    %c1_96 = arith.constant 1 : index
    %72 = vector.load %arg13[%c0_94, %c1_95, %c1_96] : memref<4x18x18xf32, #tpu.memory_space<vmem>>, vector<4x16x16xf32>
    %73 = vector.shape_cast %72 : vector<4x16x16xf32> to vector<4x256xf32>
    %c0_97 = arith.constant 0 : index
    %c1_98 = arith.constant 1 : index
    %c2_99 = arith.constant 2 : index
    %74 = vector.load %arg13[%c0_97, %c1_98, %c2_99] : memref<4x18x18xf32, #tpu.memory_space<vmem>>, vector<4x16x16xf32>
    %75 = vector.shape_cast %74 : vector<4x16x16xf32> to vector<4x256xf32>
    %c0_100 = arith.constant 0 : index
    %c2_101 = arith.constant 2 : index
    %c0_102 = arith.constant 0 : index
    %76 = vector.load %arg13[%c0_100, %c2_101, %c0_102] : memref<4x18x18xf32, #tpu.memory_space<vmem>>, vector<4x16x16xf32>
    %77 = vector.shape_cast %76 : vector<4x16x16xf32> to vector<4x256xf32>
    %c0_103 = arith.constant 0 : index
    %c2_104 = arith.constant 2 : index
    %c1_105 = arith.constant 1 : index
    %78 = vector.load %arg13[%c0_103, %c2_104, %c1_105] : memref<4x18x18xf32, #tpu.memory_space<vmem>>, vector<4x16x16xf32>
    %79 = vector.shape_cast %78 : vector<4x16x16xf32> to vector<4x256xf32>
    %c0_106 = arith.constant 0 : index
    %c2_107 = arith.constant 2 : index
    %c2_108 = arith.constant 2 : index
    %80 = vector.load %arg13[%c0_106, %c2_107, %c2_108] : memref<4x18x18xf32, #tpu.memory_space<vmem>>, vector<4x16x16xf32>
    %81 = vector.shape_cast %80 : vector<4x16x16xf32> to vector<4x256xf32>
    %82 = tpu.concatenate %65, %67, %69, %71, %73, %75, %77, %79, %81 in 0 : vector<4x256xf32>, vector<4x256xf32>, vector<4x256xf32>, vector<4x256xf32>, vector<4x256xf32>, vector<4x256xf32>, vector<4x256xf32>, vector<4x256xf32>, vector<4x256xf32> -> vector<36x256xf32>
    %c0_109 = arith.constant 0 : index
    %c0_110 = arith.constant 0 : index
    %83 = vector.load %arg8[%c0_109, %c0_110] : memref<4x36xbf16, #tpu.memory_space<vmem>>, vector<4x36xbf16>
    %84 = arith.truncf %82 : vector<36x256xf32> to vector<36x256xbf16>
    %cst_111 = arith.constant dense<0.000000e+00> : vector<4x256xf32>
    %85 = tpu.matmul %83, %84, %cst_111 {dimension_numbers = #tpu.dot_dimension_numbers<[1], [0], [0], [1], [0, 0, 1, 1], [], []>} : vector<4x36xbf16>, vector<36x256xbf16>, vector<4x256xf32> -> vector<4x256xf32>
    %c0_112 = arith.constant 0 : index
    %c0_113 = arith.constant 0 : index
    %86 = vector.load %arg9[%c0_112, %c0_113] : memref<4x1xf32, #tpu.memory_space<vmem>>, vector<4x1xf32>
    %87 = vector.broadcast %86 : vector<4x1xf32> to vector<4x256xf32>
    %88 = arith.mulf %85, %87 : vector<4x256xf32>
    %c0_114 = arith.constant 0 : index
    %c0_115 = arith.constant 0 : index
    %89 = vector.load %arg10[%c0_114, %c0_115] : memref<4x1xf32, #tpu.memory_space<vmem>>, vector<4x1xf32>
    %90 = vector.broadcast %89 : vector<4x1xf32> to vector<4x256xf32>
    %91 = arith.addf %88, %90 : vector<4x256xf32>
    %cst_116 = arith.constant 0.000000e+00 : f32
    %92 = vector.broadcast %cst_116 : f32 to vector<4x256xf32>
    %93 = arith.maximumf %91, %92 : vector<4x256xf32>
    %c0_117 = arith.constant 0 : index
    %c0_118 = arith.constant 0 : index
    %c0_119 = arith.constant 0 : index
    %94 = vector.load %arg11[%c0_117, %c0_118, %c0_119] : memref<1x4x256xf32, #tpu.memory_space<vmem>>, vector<1x4x256xf32>
    %95 = vector.shape_cast %94 : vector<1x4x256xf32> to vector<4x256xf32>
    %96 = vector.shape_cast %93 : vector<4x256xf32> to vector<1x4x256xf32>
    tpu.vector_store %arg11[%c0_117, %c0_118, %c0_119], %96 {strides = array<i32>} : memref<1x4x256xf32, #tpu.memory_space<vmem>>, vector<1x4x256xf32>,
    return
  }
  func.func @transform_0(%arg0: i32) -> (i32, i32, i32, i32) {
    %c0_i32 = arith.constant 0 : i32
    %c0_i32_0 = arith.constant 0 : i32
    %c0_i32_1 = arith.constant 0 : i32
    %c0_i32_2 = arith.constant 0 : i32
    return %arg0, %c0_i32, %c0_i32_0, %c0_i32_1 : i32, i32, i32, i32
  }
  func.func @transform_1(%arg0: i32) -> (i32, i32, i32, i32) {
    %c0_i32 = arith.constant 0 : i32
    %c0_i32_0 = arith.constant 0 : i32
    %c0_i32_1 = arith.constant 0 : i32
    %c0_i32_2 = arith.constant 0 : i32
    return %arg0, %c0_i32, %c0_i32_0, %c0_i32_1 : i32, i32, i32, i32
  }
  func.func @transform_2(%arg0: i32) -> (i32, i32) {
    %c0_i32 = arith.constant 0 : i32
    %c0_i32_0 = arith.constant 0 : i32
    %c0_i32_1 = arith.constant 0 : i32
    return %c0_i32, %c0_i32_0 : i32, i32
  }
  func.func @transform_3(%arg0: i32) -> (i32, i32) {
    %c0_i32 = arith.constant 0 : i32
    %c0_i32_0 = arith.constant 0 : i32
    %c0_i32_1 = arith.constant 0 : i32
    return %c0_i32, %c0_i32_0 : i32, i32
  }
  func.func @transform_4(%arg0: i32) -> (i32, i32) {
    %c0_i32 = arith.constant 0 : i32
    %c0_i32_0 = arith.constant 0 : i32
    %c0_i32_1 = arith.constant 0 : i32
    return %c0_i32, %c0_i32_0 : i32, i32
  }
  func.func @transform_5(%arg0: i32) -> (i32, i32) {
    %c0_i32 = arith.constant 0 : i32
    %c0_i32_0 = arith.constant 0 : i32
    %c0_i32_1 = arith.constant 0 : i32
    return %c0_i32, %c0_i32_0 : i32, i32
  }
  func.func @transform_6(%arg0: i32) -> (i32, i32) {
    %c0_i32 = arith.constant 0 : i32
    %c0_i32_0 = arith.constant 0 : i32
    %c0_i32_1 = arith.constant 0 : i32
    return %c0_i32, %c0_i32_0 : i32, i32
  }
  func.func @transform_7(%arg0: i32) -> (i32, i32) {
    %c0_i32 = arith.constant 0 : i32
    %c0_i32_0 = arith.constant 0 : i32
    %c0_i32_1 = arith.constant 0 : i32
    return %c0_i32, %c0_i32_0 : i32, i32
  }
  func.func @transform_8(%arg0: i32) -> (i32, i32) {
    %c0_i32 = arith.constant 0 : i32
    %c0_i32_0 = arith.constant 0 : i32
    %c0_i32_1 = arith.constant 0 : i32
    return %c0_i32, %c0_i32_0 : i32, i32
  }
  func.func @transform_9(%arg0: i32) -> (i32, i32) {
    %c0_i32 = arith.constant 0 : i32
    %c0_i32_0 = arith.constant 0 : i32
    %c0_i32_1 = arith.constant 0 : i32
    return %c0_i32, %c0_i32_0 : i32, i32
  }
  func.func @transform_10(%arg0: i32) -> (i32, i32, i32) {
    %c0_i32 = arith.constant 0 : i32
    %c0_i32_0 = arith.constant 0 : i32
    %c0_i32_1 = arith.constant 0 : i32
    return %arg0, %c0_i32, %c0_i32_0 : i32, i32, i32
  }
}

</mosaic_0001>

<bundles_post_ra>
// kernel: up_forward_nchw.1
= control target key start
LH: loop header
LB: loop body
LE: loop exit
PB: predicated region body
PF: predicated region fallthrough
CT: control target
= control target key end

     0   :  { %15 = vsyncpa [#allocation5], 0  ;;  %s7801_s13 = smov 0   ;;  %s11879_s0 = inlined_call_operand.vmem [shape: bf16[2,4,8,8], index: 0, kind: input, shape index: {}]   ;;  %s11880_s1 = inlined_call_operand.vmem [shape: f32[2,4,16,16], index: 1, kind: input, shape index: {}]   ;;  %s11881_s2 = inlined_call_operand.vmem [shape: bf16[8,16], index: 2, kind: input, shape index: {}, may-alias: {2,3}]   ;;  %s11882_s3 = inlined_call_operand.vmem [shape: bf16[8,16], index: 3, kind: input, shape index: {}, may-alias: {2,3}]   ;;  %s11883_s4 = inlined_call_operand.vmem [shape: bf16[4,72], index: 4, kind: input, shape index: {}]   ;;  %s11884_s5 = inlined_call_operand.vmem [shape: f32[4,1], index: 5, kind: input, shape index: {}]   ;;  %s11885_s6 = inlined_call_operand.vmem [shape: f32[4,1], index: 6, kind: input, shape index: {}]   ;;  %s11886_s7 = inlined_call_operand.vmem [shape: bf16[4,36], index: 7, kind: input, shape index: {}]   ;;  %s11887_s8 = inlined_call_operand.vmem [shape: f32[4,1], index: 8, kind: input, shape index: {}]   ;;  %s11888_s9 = inlined_call_operand.hbm [shape: f32[4,1], index: 9, kind: input, shape index: {}]   ;;  %s11889_s10 = inlined_call_operand.vmem [shape: f32[2,4,256], index: 10, kind: output, shape index: {}]  }
   0x1 LB: > { %s7807_s14 = sadd.s32 4294967295, %s7729_s13   ;;  %p6882_p0 = scmp.ge.s32.totalorder %s7729_s13, 1  ;;  %s7729_s13 = sphi %s7801_s13, %s21_s13  }
   0x2   : > { %p272_p1 = scmp.lt.s32.totalorder %s7729_s13, 3  ;;  %p11890_p3 = scmp.eq.s32.totalorder %s7807_s14, 0 }
   0x3   : > { %s7731_s16 = smov [#allocation4]   ;;  %s7691_s21 = scalar_lea.hbm %s11888_s9, 64 }
   0x4   : > { %p7811_p2 = pnand %p6882_p0, %p272_p1  ;;  %s306_s17 = sshll.u32 %s7731_s16, 4  ;;  %s307_s17 = int_to_ptr.vmem [resolvable:$true] %s306_s17 }
   0x5   : > { %p7692_p6 = scmp.ne.s32.totalorder %s11888_s9, %s7691_s21  ;;  %p7698_p10 = scmp.lt.u32.totalorder %s7691_s21, %s11888_s9 }
   0x6   : > { %s12160_s15 = scalar_select %p7811_p2, 1, 0 }
   0x7   : > { %p6940_p4 = pneg %p7811_p2 }
   0x9   : > { %p7820_p5 = pnand %p11890_p3, %p6940_p4 }
   0xb   : > { %p7693_p7 = pneg %p7820_p5 }
   0xd   : > { %p7694_p8 = pnand %p7693_p7, %p7692_p6 }
   0xf   : > { %p7695_p9 = pneg %p7694_p8 }
  0x11   : > { %p7700_p11 = pnand %p7698_p10, %p7695_p9 }
  0x13   : > { %7703 = shalt.err (!%p7700_p11)
}
  0x14   : > { %s7704_s26 = scalar_lea.vmem %s307_s17, 64  ;;  %p7712_p1 = scmp.lt.s32.totalorder %s307_s17, %s307_s17 }
  0x15   : > { %p7705_p12 = scmp.ne.s32.totalorder %s307_s17, %s7704_s26  ;;  %p7713_p4 = scmp.lt.s32.totalorder %s7704_s26, %s7704_s26 }
  0x17   : > { %p7707_p13 = pnand %p7705_p12, %p7693_p7  ;;  %p7714_p3 = por %p7713_p4, %p7712_p1 }
  0x19   : > { %p7708_p0 = pneg %p7707_p13 }
  0x1b   : > { %p7715_p2 = pnand %p7714_p3, %p7708_p0 }
  0x1d   : > { %7718 = shalt.err (!%p7715_p2)
}
  0x1e   : > { %6943 = dma.hbm_to_vmem [thread:$0]  (!%p7820_p5), %s11888_s9, 64, %s307_s17, [#allocation5]  }
  0x1f   : > { %p12162_p6 = scmp.ne.s32.totalorder %s12160_s15, 0 }
  0x21   : > { %335 = sbr.rel (%p12162_p6) target bundleno = 2313 (0x909), region = 60 }
  0x28   : > { %p12163_p8 = scmp.eq.s32.totalorder %s7807_s14, 0 }
  0x2a   : > { %7724 = dma.done.wait (%p12163_p8), [#allocation5], 64   ;;  %p12164_p7 = pmov %p12163_p8 }
  0x2b   : > { %p378_p9 = scmp.lt.s32.totalorder %s7807_s14, 1  ;;  %vm517_vm0 = vcmask 1043456   ;;  %vm510_vm1 = vcmask 64512   ;;  %v499_v0 = vld [vmem:[%s11881_s2] sm:$0xf]  ;;  %s7732_s21 = smov 1  }
  0x2c   : > { %7726 = vsyncadd (%p12164_p7), [#allocation5], 4294967232  ;;  %6934 = vmatprep.subr.msk.bf16.mxu0 %vm517_vm0, %v499_v0  ;;  %v519_v1 = vsel %vm517_vm0, %v499_v0, 0  ;;  %vm394_vm2 = vcmask 139264   ;;  %vm411_vm3 = vcmask 7168   ;;  %vm437_vm4 = vcmask 146568  }
  0x2d   : > { %s12747_s14 = smov (!%p378_p9, %s7807_s14), 1  ;;  %6919 = vmatpush3.bf16.msra.mxu0 %v519_v1  ;;  %vm855_vm5 = vcmask 138248   ;;  %v11892_v18 = vmov 0.0   ;;  %vm414_vm6 = vcmask 1024   ;;  %vm440_vm7 = vcmask 140424   ;;  %s7734_s24 = smov 127  }
  0x2e   : > { %s6907_s29 = sshll.u32 %s12747_s14, 4  ;;  %s6908_s17 = sshll.u32 %s12747_s14, 6  ;;  %395 = vst.msk [vmem:[#allocation2] sm:$0x1] %vm394_vm2, %v11892_v18  ;;  %396 = vst.msk [vmem:[#allocation2 + $0x18] sm:$0x1] %vm394_vm2, %v11892_v18 }
  0x2f   : > { %s382_s12 = scalar_lea.vmem %s11879_s0, %s6907_s29  ;;  %s7865_s20 = scalar_lea.vmem %s11880_s1, %s6908_s17  ;;  %413 = vst.msk [vmem:[#allocation2 + $0x8] sm:$0xff] %vm411_vm3, %v11892_v18  ;;  %417 = vst.msk [vmem:[#allocation2 + $0x20] sm:$0xff] %vm411_vm3, %v11892_v18  ;;  %v702_v20 = vld [vmem:[%s11882_s3] sm:$0xf]  ;;  %v7736_v0 = vmov 1983009808  }
  0x30   : > { %v7625_v2 = vld [vmem:[%s382_s12] sm:$0xff]   ;;  %v7626_v3 = vld [vmem:[%s382_s12 + $0x8] sm:$0xff]   ;;  %v785_v6 = vld [vmem:[%s7865_s20 + $0x10] sm:$0xff]  ;;  %397 = vst.msk [vmem:[#allocation2 + $0x30] sm:$0x1] %vm394_vm2, %v11892_v18  ;;  %6935 = vmatprep.subr.msk.bf16.mxu1 %vm517_vm0, %v702_v20  ;;  %v716_v21 = vsel %vm517_vm0, %v702_v20, 0  ;;  %v891_v1 = vunpack.c.l.s4 %v7736_v0 }
  0x31   : > { %6920 = vmatprep.mubr.msk.bf16.mxu0 %vm510_vm1, %v7625_v2  ;;  %v783_v4 = vld [vmem:[%s7865_s20] sm:$0xff]  ;;  %v784_v5 = vld [vmem:[%s7865_s20 + $0x8] sm:$0xff]  ;;  %v789_v9 = vld [vmem:[%s7865_s20 + $0x30] sm:$0xff]  ;;  %398 = vst.msk [vmem:[#allocation2 + $0x48] sm:$0x1] %vm394_vm2, %v11892_v18  ;;  %6925 = vmatpush3.bf16.msra.mxu1 %v716_v21  ;;  %s7735_s25 = smov 126   ;;  %v893_v2 = vlaneseq }
  0x32   : > { %6921 = vmatmul.mubr.msk.bf16.vlgmr.msra.gmra.mrb[0].mxu0 %vm510_vm1, %v7626_v3  ;;  %807 = vrot.lane.b32.xlu1 %v783_v4, %s7732_s21  ;;  %v787_v7 = vld [vmem:[%s7865_s20 + $0x20] sm:$0xff]  ;;  %v788_v8 = vld [vmem:[%s7865_s20 + $0x28] sm:$0xff]  ;;  %v790_v10 = vld [vmem:[%s7865_s20 + $0x38] sm:$0xff]  ;;  %399 = vst.msk [vmem:[#allocation2 + $0x60] sm:$0x1] %vm394_vm2, %v11892_v18  ;;  %v892_v3 = vunpack.c.0.s8 %v891_v1  ;;  %s7738_s26 = smov 80  }
  0x33   : > { %400 = vst.msk [vmem:[#allocation2 + $0x78] sm:$0x1] %vm394_vm2, %v11892_v18  ;;  %401 = vst.msk [vmem:[#allocation2 + $0x90] sm:$0x1] %vm394_vm2, %v11892_v18  ;;  %v786_v35 = vld [vmem:[%s7865_s20 + $0x18] sm:$0xff]  ;;  %v8173_v4 = vshrl.u32 %v893_v2, 7 }
  0x34   : > { %402 = vst.msk [vmem:[#allocation2 + $0xa8] sm:$0x1] %vm394_vm2, %v11892_v18  ;;  %403 = vst.msk [vmem:[#allocation2 + $0x11] sm:$0x1] %vm394_vm2, %v11892_v18  ;;  %s7739_s27 = smov 16   ;;  %s7740_s28 = smov 32  }
  0x35   : > { %404 = vst.msk [vmem:[#allocation2 + $0x29] sm:$0x1] %vm394_vm2, %v11892_v18  ;;  %405 = vst.msk [vmem:[#allocation2 + $0x41] sm:$0x1] %vm394_vm2, %v11892_v18  ;;  %s7741_s29 = smov 96   ;;  %s7742_s30 = smov 48  }
  0x36   : > { %809 = vrot.lane.b32.xlu1 %v784_v5, %s7732_s21  ;;  %406 = vst.msk [vmem:[#allocation2 + $0x59] sm:$0x1] %vm394_vm2, %v11892_v18  ;;  %407 = vst.msk [vmem:[#allocation2 + $0x71] sm:$0x1] %vm394_vm2, %v11892_v18  ;;  %s7743_s11 = smov 64   ;;  %s7744_s12 = smov 112  }
  0x37   : > { %408 = vst.msk [vmem:[#allocation2 + $0x89] sm:$0x1] %vm394_vm2, %v11892_v18  ;;  %409 = vst.msk [vmem:[#allocation2 + $0xa1] sm:$0x1] %vm394_vm2, %v11892_v18  ;;  %vm1216_vm8 = vcmask 130048   ;;  %vm1218_vm9 = vcmask 261120  }
  0x38   : > { %410 = vst.msk [vmem:[#allocation2 + $0xb9] sm:$0x1] %vm394_vm2, %v11892_v18  ;;  %463 = vst.msk [vmem:[#allocation3] sm:$0x1] %vm394_vm2, %v11892_v18  ;;  %vm1220_vm10 = vcmask 392192   ;;  %vm1222_vm11 = vcmask 523264  }
  0x39   : > { %420 = vst.msk [vmem:[#allocation2 + $0x38] sm:$0xff] %vm411_vm3, %v11892_v18  ;;  %423 = vst.msk [vmem:[#allocation2 + $0x50] sm:$0xff] %vm411_vm3, %v11892_v18  ;;  %vm1224_vm12 = vcmask 654336   ;;  %vm1226_vm13 = vcmask 785408   ;;  %vm1228_vm14 = vcmask 916480   ;;  %vm4352_vm15 = vcmask 588800  }
  0x3a   : > { %811 = vrot.lane.b32.xlu1 %v785_v6, %s7732_s21  ;;  %426 = vst.msk [vmem:[#allocation2 + $0x68] sm:$0xff] %vm411_vm3, %v11892_v18  ;;  %429 = vst.msk [vmem:[#allocation2 + $0x80] sm:$0xff] %vm411_vm3, %v11892_v18  ;;  %v8177_v6 = vsub.s32 %v892_v3, %v8173_v4 }
  0x3b   : > { %432 = vst.msk [vmem:[#allocation2 + $0x98] sm:$0xff] %vm411_vm3, %v11892_v18  ;;  %435 = vst.msk [vmem:[#allocation2 + $0xb0] sm:$0xff] %vm411_vm3, %v11892_v18 }
  0x3c   : > { %464 = vst.msk [vmem:[#allocation3 + $0x18] sm:$0x1] %vm394_vm2, %v11892_v18  ;;  %465 = vst.msk [vmem:[#allocation3 + $0x30] sm:$0x1] %vm394_vm2, %v11892_v18 }
  0x3d   : > { %466 = vst.msk [vmem:[#allocation3 + $0x48] sm:$0x1] %vm394_vm2, %v11892_v18  ;;  %467 = vst.msk [vmem:[#allocation3 + $0x11] sm:$0x1] %vm394_vm2, %v11892_v18 }
  0x3e   : > { %815 = vrot.lane.b32.xlu1 %v787_v7, %s7732_s21  ;;  %468 = vst.msk [vmem:[#allocation3 + $0x29] sm:$0x1] %vm394_vm2, %v11892_v18  ;;  %469 = vst.msk [vmem:[#allocation3 + $0x41] sm:$0x1] %vm394_vm2, %v11892_v18 }
  0x3f   : > { %470 = vst.msk [vmem:[#allocation3 + $0x59] sm:$0x1] %vm394_vm2, %v11892_v18 }
  0x40   : > { %472 = vst.msk [vmem:[#allocation3 + $0x8] sm:$0xff] %vm411_vm3, %v11892_v18  ;;  %475 = vst.msk [vmem:[#allocation3 + $0x20] sm:$0xff] %vm411_vm3, %v11892_v18 }
  0x41   : > { %478 = vst.msk [vmem:[#allocation3 + $0x38] sm:$0xff] %vm411_vm3, %v11892_v18  ;;  %481 = vst.msk [vmem:[#allocation3 + $0x50] sm:$0xff] %vm411_vm3, %v11892_v18 }
  0x42   : > { %817 = vrot.lane.b32.xlu1 %v788_v8, %s7732_s21  ;;  %412 = vst.msk [vmem:[#allocation2] sm:$0xff] %vm411_vm3, %v11892_v18  ;;  %416 = vst.msk [vmem:[#allocation2 + $0x18] sm:$0xff] %vm411_vm3, %v11892_v18 }
  0x43   : > { %439 = vst.msk [vmem:[#allocation2 + $0x8] sm:$0xff] %vm437_vm4, %v11892_v18  ;;  %443 = vst.msk [vmem:[#allocation2 + $0x20] sm:$0xff] %vm437_vm4, %v11892_v18 }
  0x44   : > { %419 = vst.msk [vmem:[#allocation2 + $0x30] sm:$0xff] %vm411_vm3, %v11892_v18  ;;  %422 = vst.msk [vmem:[#allocation2 + $0x48] sm:$0xff] %vm411_vm3, %v11892_v18 }
  0x45   : > { %425 = vst.msk [vmem:[#allocation2 + $0x60] sm:$0xff] %vm411_vm3, %v11892_v18  ;;  %428 = vst.msk [vmem:[#allocation2 + $0x78] sm:$0xff] %vm411_vm3, %v11892_v18 }
  0x46   : > { %819 = vrot.lane.b32.xlu1 %v789_v9, %s7732_s21  ;;  %431 = vst.msk [vmem:[#allocation2 + $0x90] sm:$0xff] %vm411_vm3, %v11892_v18  ;;  %434 = vst.msk [vmem:[#allocation2 + $0xa8] sm:$0xff] %vm411_vm3, %v11892_v18 }
  0x47   : > { %446 = vst.msk [vmem:[#allocation2 + $0x38] sm:$0xff] %vm437_vm4, %v11892_v18  ;;  %449 = vst.msk [vmem:[#allocation2 + $0x50] sm:$0xff] %vm437_vm4, %v11892_v18 }
  0x48   : > { %452 = vst.msk [vmem:[#allocation2 + $0x68] sm:$0xff] %vm437_vm4, %v11892_v18  ;;  %455 = vst.msk [vmem:[#allocation2 + $0x80] sm:$0xff] %vm437_vm4, %v11892_v18 }
  0x49   : > { %458 = vst.msk [vmem:[#allocation2 + $0x98] sm:$0xff] %vm437_vm4, %v11892_v18  ;;  %461 = vst.msk [vmem:[#allocation2 + $0xb0] sm:$0xff] %vm437_vm4, %v11892_v18 }
  0x4a   : > { %821 = vrot.lane.b32.xlu1 %v790_v10, %s7732_s21  ;;  %471 = vst.msk [vmem:[#allocation3] sm:$0xff] %vm411_vm3, %v11892_v18  ;;  %474 = vst.msk [vmem:[#allocation3 + $0x18] sm:$0xff] %vm411_vm3, %v11892_v18 }
  0x4b   : > { %477 = vst.msk [vmem:[#allocation3 + $0x30] sm:$0xff] %vm411_vm3, %v11892_v18  ;;  %480 = vst.msk [vmem:[#allocation3 + $0x48] sm:$0xff] %vm411_vm3, %v11892_v18 }
  0x4c   : > { %484 = vst.msk [vmem:[#allocation3 + $0x8] sm:$0xff] %vm437_vm4, %v11892_v18  ;;  %487 = vst.msk [vmem:[#allocation3 + $0x20] sm:$0xff] %vm437_vm4, %v11892_v18 }
  0x4d   : > { %490 = vst.msk [vmem:[#allocation3 + $0x38] sm:$0xff] %vm437_vm4, %v11892_v18  ;;  %493 = vst.msk [vmem:[#allocation3 + $0x50] sm:$0xff] %vm437_vm4, %v11892_v18 }
  0x4e   : > { %438 = vst.msk [vmem:[#allocation2] sm:$0xff] %vm437_vm4, %v11892_v18  ;;  %442 = vst.msk [vmem:[#allocation2 + $0x18] sm:$0xff] %vm437_vm4, %v11892_v18 }
  0x4f   : > { %445 = vst.msk [vmem:[#allocation2 + $0x30] sm:$0xff] %vm437_vm4, %v11892_v18  ;;  %448 = vst.msk [vmem:[#allocation2 + $0x48] sm:$0xff] %vm437_vm4, %v11892_v18 }
  0x50   : > { %451 = vst.msk [vmem:[#allocation2 + $0x60] sm:$0xff] %vm437_vm4, %v11892_v18  ;;  %454 = vst.msk [vmem:[#allocation2 + $0x78] sm:$0xff] %vm437_vm4, %v11892_v18 }
  0x51   : > { %457 = vst.msk [vmem:[#allocation2 + $0x90] sm:$0xff] %vm437_vm4, %v11892_v18  ;;  %460 = vst.msk [vmem:[#allocation2 + $0xa8] sm:$0xff] %vm437_vm4, %v11892_v18 }
  0x52   : > { %483 = vst.msk [vmem:[#allocation3] sm:$0xff] %vm437_vm4, %v11892_v18  ;;  %486 = vst.msk [vmem:[#allocation3 + $0x18] sm:$0xff] %vm437_vm4, %v11892_v18 }
  0x53   : > { %489 = vst.msk [vmem:[#allocation3 + $0x30] sm:$0xff] %vm437_vm4, %v11892_v18  ;;  %492 = vst.msk [vmem:[#allocation3 + $0x48] sm:$0xff] %vm437_vm4, %v11892_v18 }
  0x54   : > { %415 = vst.msk [vmem:[#allocation2 + $0x10] sm:$0x3] %vm414_vm6, %v11892_v18  ;;  %418 = vst.msk [vmem:[#allocation2 + $0x28] sm:$0x3] %vm414_vm6, %v11892_v18 }
  0x55   : > { %421 = vst.msk [vmem:[#allocation2 + $0x40] sm:$0x3] %vm414_vm6, %v11892_v18  ;;  %424 = vst.msk [vmem:[#allocation2 + $0x58] sm:$0x3] %vm414_vm6, %v11892_v18 }
  0x56   : > { %427 = vst.msk [vmem:[#allocation2 + $0x70] sm:$0x3] %vm414_vm6, %v11892_v18  ;;  %430 = vst.msk [vmem:[#allocation2 + $0x88] sm:$0x3] %vm414_vm6, %v11892_v18 }
  0x57   : > { %433 = vst.msk [vmem:[#allocation2 + $0xa0] sm:$0x3] %vm414_vm6, %v11892_v18  ;;  %436 = vst.msk [vmem:[#allocation2 + $0xb8] sm:$0x3] %vm414_vm6, %v11892_v18 }
  0x58   : > { %473 = vst.msk [vmem:[#allocation3 + $0x10] sm:$0x3] %vm414_vm6, %v11892_v18  ;;  %476 = vst.msk [vmem:[#allocation3 + $0x28] sm:$0x3] %vm414_vm6, %v11892_v18 }
  0x59   : > { %479 = vst.msk [vmem:[#allocation3 + $0x40] sm:$0x3] %vm414_vm6, %v11892_v18  ;;  %482 = vst.msk [vmem:[#allocation3 + $0x58] sm:$0x3] %vm414_vm6, %v11892_v18 }
  0x5a   : > { %441 = vst.msk [vmem:[#allocation2 + $0x10] sm:$0x3] %vm440_vm7, %v11892_v18  ;;  %444 = vst.msk [vmem:[#allocation2 + $0x28] sm:$0x3] %vm440_vm7, %v11892_v18 }
  0x5b   : > { %447 = vst.msk [vmem:[#allocation2 + $0x40] sm:$0x3] %vm440_vm7, %v11892_v18  ;;  %450 = vst.msk [vmem:[#allocation2 + $0x58] sm:$0x3] %vm440_vm7, %v11892_v18 }
  0x5c   : > { %453 = vst.msk [vmem:[#allocation2 + $0x70] sm:$0x3] %vm440_vm7, %v11892_v18  ;;  %456 = vst.msk [vmem:[#allocation2 + $0x88] sm:$0x3] %vm440_vm7, %v11892_v18 }
  0x5d   : > { %459 = vst.msk [vmem:[#allocation2 + $0xa0] sm:$0x3] %vm440_vm7, %v11892_v18  ;;  %462 = vst.msk [vmem:[#allocation2 + $0xb8] sm:$0x3] %vm440_vm7, %v11892_v18 }
  0x5e   : > { %485 = vst.msk [vmem:[#allocation3 + $0x10] sm:$0x3] %vm440_vm7, %v11892_v18  ;;  %488 = vst.msk [vmem:[#allocation3 + $0x28] sm:$0x3] %vm440_vm7, %v11892_v18 }
  0x5f   : > { %491 = vst.msk [vmem:[#allocation3 + $0x40] sm:$0x3] %vm440_vm7, %v11892_v18  ;;  %494 = vst.msk [vmem:[#allocation3 + $0x58] sm:$0x3] %vm440_vm7, %v11892_v18 }
  0xa4   : > { %v7887_v17 = vpop.permute.xlu1 %807 }
  0xa5   : > { %856 = vst.msk [vmem:[#allocation2 + $0x1] sm:$0xff] %vm855_vm5, %v7887_v17 }
  0xa8   : > { %v810_v19 = vpop.permute.xlu1 %809 }
  0xa9   : > { %857 = vst.msk [vmem:[#allocation2 + $0x9] sm:$0xff] %vm855_vm5, %v810_v19 }
  0xac   : > { %v812_v22 = vpop.permute.xlu1 %811  ;;  %v8087_v26 = vld [vmem:[#allocation2] sm:$0xff] }
  0xad   : > { %858 = vst.msk [vmem:[#allocation2 + $0x19] sm:$0xff] %vm855_vm5, %v812_v22  ;;  %v8135_v40 = vld [vmem:[#allocation2 + $0x1] sm:$0xff] }
  0xb0   : > { %v816_v23 = vpop.permute.xlu1 %815  ;;  %v8083_v25 = vld [vmem:[#allocation2 + $0x8] sm:$0xff] }
  0xb1   : > { %860 = vst.msk [vmem:[#allocation2 + $0x31] sm:$0xff] %vm855_vm5, %v816_v23  ;;  %1255 = vrot.lane.b32.xlu1 %v8083_v25, %s7734_s24  ;;  %v8119_v36 = vld [vmem:[#allocation2 + $0x9] sm:$0xff] }
  0xb2   : > { %v8151_v44 = vld [vmem:[#allocation2 + $0xa] sm:$0xff]  ;;  %v8159_v46 = vld [vmem:[#allocation2 + $0x2] sm:$0xff] }
  0xb4   : > { %v818_v24 = vpop.permute.xlu1 %817 }
  0xb5   : > { %861 = vst.msk [vmem:[#allocation2 + $0x39] sm:$0xff] %vm855_vm5, %v818_v24 }
  0xb8   : > { %v8089_v27 = vld [vmem:[#allocation2 + $0x30] sm:$0xff]  ;;  %v820_v28 = vpop.permute.xlu1 %819 }
  0xb9   : > { %862 = vst.msk [vmem:[#allocation2 + $0x49] sm:$0xff] %vm855_vm5, %v820_v28  ;;  %v8139_v41 = vld [vmem:[#allocation2 + $0x31] sm:$0xff] }
  0xbc   : > { %v8096_v31 = vld [vmem:[#allocation2 + $0x38] sm:$0xff]  ;;  %v822_v34 = vpop.permute.xlu1 %821 }
  0xbd   : > { %1263 = vrot.lane.b32.xlu1 %v8096_v31, %s7734_s24  ;;  %v1024_v32 = vcombine.low %v8083_v25, %v8096_v31  ;;  %v1025_v33 = vcombine.high %v8083_v25, %v8096_v31  ;;  %863 = vst.msk [vmem:[#allocation2 + $0x51] sm:$0xff] %vm855_vm5, %v822_v34  ;;  %v8123_v37 = vld [vmem:[#allocation2 + $0x39] sm:$0xff] }
  0xbe   : > { %v2185_v38 = vcombine.low %v8119_v36, %v8123_v37  ;;  %v2186_v39 = vcombine.high %v8119_v36, %v8123_v37  ;;  %v8155_v45 = vld [vmem:[#allocation2 + $0x3a] sm:$0xff]  ;;  %v8163_v47 = vld [vmem:[#allocation2 + $0x32] sm:$0xff] }
  0xbf   : > { %v8183_v9 = vrot.slane %v1024_v32, %v8177_v6  ;;  %v8189_v10 = vrot.slane %v1025_v33, %v8177_v6  ;;  %v8223_v33 = vld [vmem:[#allocation2 + $0x18] sm:$0xff] }
  0xc0   : > { %v8195_v19 = vrot.slane %v2185_v38, %v8177_v6  ;;  %v8198_v20 = vrot.slane %v2186_v39, %v8177_v6  ;;  %v8239_v39 = vld [vmem:[#allocation2 + $0x48] sm:$0xff] }
  0xc1   : > { %1253 = vrot.lane.b32.xlu1 %v8087_v26, %s7734_s24 }
  0xc4   : > { %v879_v7 = vld [vmem:[#allocation2 + $0x50] sm:$0xff] }
  0xc5   : > { %1261 = vrot.lane.b32.xlu1 %v8089_v27, %s7734_s24  ;;  %v2040_v8 = vld [vmem:[#allocation2 + $0x51] sm:$0xff] }
  0xc6   : > { %v8235_v38 = vld [vmem:[#allocation2 + $0x4a] sm:$0xff] }
  0xc9   : > { %1645 = vrot.lane.b32.xlu1 %v8083_v25, %s7735_s25 }
  0xcd   : > { %1653 = vrot.lane.b32.xlu1 %v8096_v31, %s7735_s25 }
  0xd1   : > { %1643 = vrot.lane.b32.xlu1 %v8087_v26, %s7735_s25 }
  0xd5   : > { %1651 = vrot.lane.b32.xlu1 %v8089_v27, %s7735_s25 }
  0xd9   : > { %2409 = vrot.lane.b32.xlu1 %v8119_v36, %s7734_s24 }
  0xdd   : > { %2417 = vrot.lane.b32.xlu1 %v8123_v37, %s7734_s24 }
  0xe1   : > { %2799 = vrot.lane.b32.xlu1 %v8119_v36, %s7735_s25 }
  0xe5   : > { %2807 = vrot.lane.b32.xlu1 %v8123_v37, %s7735_s25 }
  0xe9   : > { %2407 = vrot.lane.b32.xlu1 %v8135_v40, %s7734_s24 }
  0xed   : > { %2415 = vrot.lane.b32.xlu1 %v8139_v41, %s7734_s24 }
  0xf1   : > { %2797 = vrot.lane.b32.xlu1 %v8135_v40, %s7735_s25 }
  0xf5   : > { %2805 = vrot.lane.b32.xlu1 %v8139_v41, %s7735_s25 }
  0xf9   : > { %3563 = vrot.lane.b32.xlu1 %v8151_v44, %s7734_s24 }
  0xfd   : > { %3571 = vrot.lane.b32.xlu1 %v8155_v45, %s7734_s24 }
 0x101   : > { %3561 = vrot.lane.b32.xlu1 %v8159_v46, %s7734_s24 }
 0x105   : > { %v7881_v11 = vpop.f32.mrb[0].mxu0  ;;  %3569 = vrot.lane.b32.xlu1 %v8163_v47, %s7734_s24 }
 0x106   : > { %v555_v12 = vpop.f32.mrb[1].mxu0 }
 0x107   : > { %v7883_v13 = vpop.f32.mrb[2].mxu0 }
 0x108   : > { %v6981_v14 = vpack.i.bf16 %v7883_v13, %v7881_v11  ;;  %v558_v15 = vpop.f32.mrb[3].mxu0 }
 0x109   : > { %v6969_v16 = vpack.i.bf16 %v558_v15, %v555_v12  ;;  %3951 = vrot.lane.b32.xlu1 %v8159_v46, %s7735_s25 }
 0x10b   : > { %6970 = vxpose.xlu0.b32.start.end [1/1] (short) (narrow) %v6969_v16, 16 }
 0x110   : > { %6982 = vxpose.xlu0.b32.start.end [1/1] (short) (narrow) %v6981_v14, 16 }
 0x13d   : > { %813 = vrot.lane.b32.xlu0 %v786_v35, %s7732_s21 }
 0x18b   : > { %v6971_v48 = vpop.trf.xlu0 }
 0x18c   : > { %v6975_v49 = vunpack.i.h.bf16 %v6971_v48  ;;  %v6972_v51 = vunpack.i.l.bf16 %v6971_v48  ;;  %v8255_v48 = vld [vmem:[#allocation2 + $0x19] sm:$0xff] }
 0x18f   : > { %v6976_v50 = vpop.trf.xlu0 }
 0x190   : > { %v6980_v52 = vunpack.i.h.bf16 %v6976_v50  ;;  %v6977_v53 = vunpack.i.l.bf16 %v6976_v50 }
 0x192   : > { %v698_v54 = vpack.c.bf16 %v6977_v53, %v6972_v51  ;;  %v699_v55 = vpack.c.bf16 %v6980_v52, %v6975_v49  ;;  %v8259_v49 = vld [vmem:[#allocation2 + $0x49] sm:$0xff]  ;;  %v8271_v51 = vld [vmem:[#allocation2 + $0x52] sm:$0xff]  ;;  %v8287_v52 = vpop.permute.xlu1 %1255 }
 0x193   : > { %v6983_v56 = vpop.trf.xlu0  ;;  %12165 = vst [vmem:[#allocation7_spill] sm:$0xff] %v8287_v52 }
 0x194   : > { %6926 = vmatprep.mubr.msk.bf16.mxu1 %vm510_vm1, %v698_v54  ;;  %v6987_v57 = vunpack.i.h.bf16 %v6983_v56  ;;  %v6984_v58 = vunpack.i.l.bf16 %v6983_v56 }
 0x195   : > { %6927 = vmatmul.mubr.msk.bf16.vlgmr.msra.gmra.mrb[0].mxu1 %vm510_vm1, %v699_v55 }
 0x196   : > { %v8289_v53 = vpop.permute.xlu1 %1263 }
 0x197   : > { %v6988_v59 = vpop.trf.xlu0  ;;  %12166 = vst [vmem:[#allocation8_spill] sm:$0xff] %v8289_v53 }
 0x198   : > { %v6992_v60 = vunpack.i.h.bf16 %v6988_v59  ;;  %v6989_v61 = vunpack.i.l.bf16 %v6988_v59 }
 0x19a   : > { %v700_v62 = vpack.c.bf16 %v6989_v61, %v6984_v58  ;;  %v701_v63 = vpack.c.bf16 %v6992_v60, %v6987_v57  ;;  %v8293_v55 = vpop.permute.xlu1 %1253 }
 0x19b   : > { %12168 = vst [vmem:[#allocation10_spill] sm:$0xff] %v8293_v55 }
 0x19c   : > { %6930 = vmatprep.mubr.msk.bf16.mxu1 %vm510_vm1, %v700_v62 }
 0x19d   : > { %6931 = vmatmul.mubr.msk.bf16.gmra.mrb[4].mxu1 %vm510_vm1, %v701_v63  ;;  %vm6730_vm1 = vcmask 1041408  }
 0x19e   : > { %v8297_v57 = vpop.permute.xlu1 %1261 }
 0x19f   : > { %12170 = vst [vmem:[#allocation12_spill] sm:$0xff] %v8297_v57 }
 0x1a2   : > { %v8301_v59 = vpop.permute.xlu1 %1645 }
 0x1a3   : > { %12172 = vst [vmem:[#allocation14_spill] sm:$0xff] %v8301_v59 }
 0x1a6   : > { %v8306_v0 = vpop.permute.xlu1 %1653 }
 0x1a7   : > { %12174 = vst [vmem:[#allocation16_spill] sm:$0xff] %v8306_v0 }
 0x1af   : > { %v814_v5 = vpop.permute.xlu0 %813 }
 0x1b0   : > { %859 = vst.msk [vmem:[#allocation2 + $0x21] sm:$0xff] %vm855_vm5, %v814_v5  ;;  %v8311_v5 = vpop.permute.xlu1 %1643 }
 0x1b1   : > { %12176 = vst [vmem:[#allocation18_spill] sm:$0xff] %v8311_v5 }
 0x1b7   : > { %v875_v11 = vld [vmem:[#allocation2 + $0x20] sm:$0xff] }
 0x1b8   : > { %v2036_v12 = vld [vmem:[#allocation2 + $0x21] sm:$0xff]  ;;  %1259 = vrot.lane.b32.xlu0 %v875_v11, %s7734_s24  ;;  %v1040_v14 = vcombine.low %v875_v11, %v879_v7  ;;  %v1041_v15 = vcombine.high %v875_v11, %v879_v7 }
 0x1b9   : > { %v8191_v13 = vld [vmem:[#allocation2 + $0x1a] sm:$0xff]  ;;  %v2201_v16 = vcombine.low %v2036_v12, %v2040_v8  ;;  %v2202_v17 = vcombine.high %v2036_v12, %v2040_v8  ;;  %v8267_v50 = vld [vmem:[#allocation2 + $0x22] sm:$0xff] }
 0x1ba   : > { %3955 = vrot.lane.b32.xlu1 %v8191_v13, %s7735_s25  ;;  %v8203_v21 = vrot.slane %v1040_v14, %v8177_v6  ;;  %v8206_v22 = vrot.slane %v1041_v15, %v8177_v6  ;;  %v8318_v14 = vpop.permute.xlu1 %1651 }
 0x1bb   : > { %v8209_v23 = vrot.slane %v2201_v16, %v8177_v6  ;;  %v8212_v24 = vrot.slane %v2202_v17, %v8177_v6  ;;  %12178 = vst [vmem:[#allocation20_spill] sm:$0xff] %v8318_v14 }
 0x1bc   : > { %1267 = vrot.lane.b32.xlu0 %v879_v7, %s7734_s24 }
 0x1be   : > { %3959 = vrot.lane.b32.xlu1 %v8163_v47, %s7735_s25  ;;  %v8323_v16 = vpop.permute.xlu1 %2409 }
 0x1bf   : > { %12180 = vst [vmem:[#allocation22_spill] sm:$0xff] %v8323_v16 }
 0x1c0   : > { %1257 = vrot.lane.b32.xlu0 %v8223_v33, %s7734_s24 }
 0x1c2   : > { %3963 = vrot.lane.b32.xlu1 %v8235_v38, %s7735_s25 }
 0x1c4   : > { %1265 = vrot.lane.b32.xlu0 %v8239_v39, %s7734_s24 }
 0x1c8   : > { %1649 = vrot.lane.b32.xlu0 %v875_v11, %s7735_s25 }
 0x1cc   : > { %1657 = vrot.lane.b32.xlu0 %v879_v7, %s7735_s25 }
 0x1d0   : > { %1647 = vrot.lane.b32.xlu0 %v8223_v33, %s7735_s25 }
 0x1d4   : > { %1655 = vrot.lane.b32.xlu0 %v8239_v39, %s7735_s25 }
 0x1d8   : > { %2413 = vrot.lane.b32.xlu0 %v2036_v12, %s7734_s24 }
 0x1dc   : > { %2421 = vrot.lane.b32.xlu0 %v2040_v8, %s7734_s24 }
 0x1e0   : > { %2803 = vrot.lane.b32.xlu0 %v2036_v12, %s7735_s25 }
 0x1e4   : > { %2811 = vrot.lane.b32.xlu0 %v2040_v8, %s7735_s25 }
 0x1e8   : > { %2411 = vrot.lane.b32.xlu0 %v8255_v48, %s7734_s24 }
 0x1ec   : > { %2419 = vrot.lane.b32.xlu0 %v8259_v49, %s7734_s24 }
 0x1f0   : > { %2801 = vrot.lane.b32.xlu0 %v8255_v48, %s7735_s25 }
 0x1f4   : > { %2809 = vrot.lane.b32.xlu0 %v8259_v49, %s7735_s25 }
 0x1f8   : > { %3567 = vrot.lane.b32.xlu0 %v8267_v50, %s7734_s24 }
 0x1fc   : > { %3575 = vrot.lane.b32.xlu0 %v8271_v51, %s7734_s24 }
 0x200   : > { %3565 = vrot.lane.b32.xlu0 %v8191_v13, %s7734_s24 }
 0x204   : > { %3573 = vrot.lane.b32.xlu0 %v8235_v38, %s7734_s24 }
 0x208   : > { %3953 = vrot.lane.b32.xlu0 %v8151_v44, %s7735_s25 }
 0x20c   : > { %3957 = vrot.lane.b32.xlu0 %v8267_v50, %s7735_s25 }
 0x210   : > { %3961 = vrot.lane.b32.xlu0 %v8155_v45, %s7735_s25 }
 0x214   : > { %3965 = vrot.lane.b32.xlu0 %v8271_v51, %s7735_s25 }
 0x22a   : > { %v8291_v54 = vpop.permute.xlu0 %1259 }
 0x22b   : > { %12167 = vst [vmem:[#allocation9_spill] sm:$0xff] %v8291_v54 }
 0x22e   : > { %v8295_v56 = vpop.permute.xlu0 %1267 }
 0x22f   : > { %12169 = vst [vmem:[#allocation11_spill] sm:$0xff] %v8295_v56 }
 0x232   : > { %v8299_v58 = vpop.permute.xlu0 %1257 }
 0x233   : > { %12171 = vst [vmem:[#allocation13_spill] sm:$0xff] %v8299_v58 }
 0x236   : > { %v8303_v61 = vpop.permute.xlu0 %1265 }
 0x237   : > { %12173 = vst [vmem:[#allocation15_spill] sm:$0xff] %v8303_v61  ;;  %v12241_v61 = vcombine.low %v8189_v10, %v8206_v22 }
 0x23a   : > { %v8309_v2 = vpop.permute.xlu0 %1649 }
 0x23b   : > { %12175 = vst [vmem:[#allocation17_spill] sm:$0xff] %v8309_v2 }
 0x23e   : > { %v8315_v12 = vpop.permute.xlu0 %1657 }
 0x23f   : > { %12177 = vst [vmem:[#allocation19_spill] sm:$0xff] %v8315_v12 }
 0x242   : > { %v8321_v15 = vpop.permute.xlu0 %1647 }
 0x243   : > { %12179 = vst [vmem:[#allocation21_spill] sm:$0xff] %v8321_v15 }
 0x246   : > { %v8326_v17 = vpop.permute.xlu0 %1655 }
 0x247   : > { %12181 = vst [vmem:[#allocation23_spill] sm:$0xff] %v8326_v17 }
 0x268   : > { %v6928_v60 = vpop.f32.mrb[0].mxu1 }
 0x269   : > { %v752_v62 = vpop.f32.mrb[1].mxu1  ;;  %827 = vrot.lane.b32.xlu1 %v6928_v60, %s7732_s21  ;;  %v8329_v60 = vpop.permute.xlu1 %2417 }
 0x26a   : > { %v6929_v63 = vpop.f32.mrb[2].mxu1  ;;  %12182 = vst [vmem:[#allocation24_spill] sm:$0xff] %v8329_v60  ;;  %v12244_v60 = vcombine.low %v8198_v20, %v8212_v24 }
 0x26b   : > { %v755_v1 = vpop.f32.mrb[3].mxu1 }
 0x26d   : > { %823 = vrot.lane.b32.xlu1 %v752_v62, %s7732_s21  ;;  %v8331_v62 = vpop.permute.xlu0 %2413 }
 0x26e   : > { %12183 = vst [vmem:[#allocation25_spill] sm:$0xff] %v8331_v62 }
 0x270   : > { %v6932_v3 = vpop.f32.mrb[4].mxu1 }
 0x271   : > { %v768_v7 = vpop.f32.mrb[5].mxu1  ;;  %829 = vrot.lane.b32.xlu1 %v6929_v63, %s7732_s21  ;;  %v8333_v63 = vpop.permute.xlu1 %2799 }
 0x272   : > { %v6933_v8 = vpop.f32.mrb[6].mxu1  ;;  %12184 = vst [vmem:[#allocation26_spill] sm:$0xff] %v8333_v63 }
 0x273   : > { %837 = vrot.lane.b32.xlu0 %v6933_v8, %s7732_s21  ;;  %v771_v11 = vpop.f32.mrb[7].mxu1 }
 0x275   : > { %825 = vrot.lane.b32.xlu1 %v755_v1, %s7732_s21  ;;  %v8335_v1 = vpop.permute.xlu0 %2421  ;;  %v8337_v8 = vpop.permute.xlu1 %2807 }
 0x276   : > { %12185 = vst [vmem:[#allocation27_spill] sm:$0xff] %v8335_v1  ;;  %12186 = vst [vmem:[#allocation28_spill] sm:$0xff] %v8337_v8 }
 0x279   : > { %835 = vrot.lane.b32.xlu1 %v6932_v3, %s7732_s21  ;;  %v8339_v3 = vpop.permute.xlu0 %2803  ;;  %v8341_v18 = vpop.permute.xlu1 %2407 }
 0x27a   : > { %12187 = vst [vmem:[#allocation29_spill] sm:$0xff] %v8339_v3  ;;  %12188 = vst [vmem:[#allocation30_spill] sm:$0xff] %v8341_v18 }
 0x27d   : > { %831 = vrot.lane.b32.xlu1 %v768_v7, %s7732_s21  ;;  %v8343_v36 = vpop.permute.xlu0 %2811  ;;  %v8345_v7 = vpop.permute.xlu1 %2415 }
 0x27e   : > { %12189 = vst [vmem:[#allocation31_spill] sm:$0xff] %v8343_v36  ;;  %12190 = vst [vmem:[#allocation32_spill] sm:$0xff] %v8345_v7 }
 0x281   : > { %833 = vrot.lane.b32.xlu1 %v771_v11, %s7732_s21  ;;  %v8347_v31 = vpop.permute.xlu0 %2411  ;;  %v8349_v11 = vpop.permute.xlu1 %2797 }
 0x282   : > { %12191 = vst [vmem:[#allocation33_spill] sm:$0xff] %v8347_v31  ;;  %12192 = vst [vmem:[#allocation34_spill] sm:$0xff] %v8349_v11 }
 0x285   : > { %v8351_v37 = vpop.permute.xlu0 %2419  ;;  %v8353_v28 = vpop.permute.xlu1 %2805 }
 0x286   : > { %12193 = vst [vmem:[#allocation35_spill] sm:$0xff] %v8351_v37  ;;  %12194 = vst [vmem:[#allocation36_spill] sm:$0xff] %v8353_v28  ;;  %v7737_v37 = vmov 1934713408   ;;  %v12234_v28 = vcombine.low %v8183_v9, %v8203_v21 }
 0x289   : > { %v8355_v25 = vpop.permute.xlu0 %2801  ;;  %v8357_v35 = vpop.permute.xlu1 %3563 }
 0x28a   : > { %12195 = vst [vmem:[#allocation37_spill] sm:$0xff] %v8355_v25  ;;  %12196 = vst [vmem:[#allocation38_spill] sm:$0xff] %v8357_v35 }
 0x28d   : > { %v8359_v32 = vpop.permute.xlu0 %2809  ;;  %v8361_v34 = vpop.permute.xlu1 %3571 }
 0x28e   : > { %12197 = vst [vmem:[#allocation39_spill] sm:$0xff] %v8359_v32  ;;  %12198 = vst [vmem:[#allocation40_spill] sm:$0xff] %v8361_v34 }
 0x291   : > { %v8363_v43 = vpop.permute.xlu0 %3567  ;;  %v8365_v42 = vpop.permute.xlu1 %3561 }
 0x292   : > { %12199 = vst [vmem:[#allocation41_spill] sm:$0xff] %v8363_v43  ;;  %12200 = vst [vmem:[#allocation42_spill] sm:$0xff] %v8365_v42 }
 0x295   : > { %v8367_v30 = vpop.permute.xlu0 %3575  ;;  %v8369_v29 = vpop.permute.xlu1 %3569 }
 0x296   : > { %12201 = vst [vmem:[#allocation43_spill] sm:$0xff] %v8367_v30  ;;  %12202 = vst [vmem:[#allocation44_spill] sm:$0xff] %v8369_v29 }
 0x299   : > { %v8371_v3 = vpop.permute.xlu0 %3565  ;;  %v8373_v36 = vpop.permute.xlu1 %3951 }
 0x29a   : > { %12203 = vst [vmem:[#allocation45_spill] sm:$0xff] %v8371_v3  ;;  %12204 = vst [vmem:[#allocation46_spill] sm:$0xff] %v8373_v36 }
 0x29d   : > { %v8375_v62 = vpop.permute.xlu0 %3573  ;;  %v8377_v1 = vpop.permute.xlu1 %3955 }
 0x29e   : > { %12205 = vst [vmem:[#allocation47_spill] sm:$0xff] %v8375_v62  ;;  %12206 = vst [vmem:[#allocation48_spill] sm:$0xff] %v8377_v1  ;;  %v904_v62 = vcombine.low %v8223_v33, %v8239_v39  ;;  %v955_v1 = vunpack.c.l.s4 %v7737_v37  ;;  %v12214_v37 = vcombine.high %v8087_v26, %v8089_v27 }
 0x2a0   : > { %v956_v36 = vunpack.c.0.s8 %v955_v1  ;;  %v3219_v1 = vcombine.low %v8191_v13, %v8235_v38 }
 0x2a1   : > { %v8379_v25 = vpop.permute.xlu0 %3953  ;;  %v8381_v32 = vpop.permute.xlu1 %3959 }
 0x2a2   : > { %12207 = vst [vmem:[#allocation49_spill] sm:$0xff] %v8379_v25  ;;  %12208 = vst [vmem:[#allocation50_spill] sm:$0xff] %v8381_v32  ;;  %v905_v25 = vcombine.high %v8223_v33, %v8239_v39  ;;  %v12213_v33 = vcombine.low %v8087_v26, %v8089_v27  ;;  %v12216_v26 = vcombine.high %v8135_v40, %v8139_v41 }
 0x2a4   : > { %v896_v39 = vrot.slane %v12213_v33, %v8177_v6  ;;  %v2064_v27 = vrot.slane %v12216_v26, %v8177_v6 }
 0x2a5   : > { %v8383_v2 = vpop.permute.xlu0 %3957  ;;  %v8385_v43 = vpop.permute.xlu1 %3963 }
 0x2a6   : > { %12209 = vst [vmem:[#allocation51_spill] sm:$0xff] %v8383_v2  ;;  %12210 = vst [vmem:[#allocation52_spill] sm:$0xff] %v8385_v43  ;;  %v2065_v2 = vcombine.low %v8255_v48, %v8259_v49 }
 0x2a8   : > { %v2073_v17 = vrot.slane %v2065_v2, %v8177_v6  ;;  %v3355_v2 = vcombine.low %v8267_v50, %v8271_v51 }
 0x2a9   : > { %v8387_v12 = vpop.permute.xlu0 %3961 }
 0x2aa   : > { %12211 = vst [vmem:[#allocation53_spill] sm:$0xff] %v8387_v12  ;;  %v2066_v12 = vcombine.high %v8255_v48, %v8259_v49  ;;  %v912_v48 = vrot.slane %v904_v62, %v8177_v6  ;;  %v3339_v62 = vcombine.low %v8151_v44, %v8155_v45  ;;  %v3204_v44 = vcombine.high %v8159_v46, %v8163_v47 }
 0x2ab   : > { %v3220_v45 = vcombine.high %v8191_v13, %v8235_v38  ;;  %v8461_v13 = vrot.slane %v3219_v1, %v8177_v6 }
 0x2ac   : > { %v8450_v26 = vrot.slane %v3339_v62, %v8177_v6 }
 0x2ad   : > { %v8393_v31 = vpop.permute.xlu0 %3965 }
 0x2ae   : > { %12212 = vst [vmem:[#allocation54_spill] sm:$0xff] %v8393_v31  ;;  %v919_v31 = vrot.slane %v905_v25, %v8177_v6  ;;  %v2080_v25 = vrot.slane %v2066_v12, %v8177_v6  ;;  %12217 = vst [vmem:[#allocation55_spill] sm:$0xff] %v8450_v26 }
 0x2b0   : > { %v2129_v32 = vcombine.low %v2064_v27, %v2080_v25  ;;  %v2130_v42 = vcombine.high %v2064_v27, %v2080_v25 }
 0x2db   : > { %v828_v30 = vpop.permute.xlu1 %827 }
 0x2dc   : > { %866 = vst.msk [vmem:[#allocation2 + $0x79] sm:$0xff] %vm855_vm5, %v828_v30 }
 0x2df   : > { %v824_v3 = vpop.permute.xlu1 %823 }
 0x2e0   : > { %864 = vst.msk [vmem:[#allocation2 + $0x61] sm:$0xff] %vm855_vm5, %v824_v3  ;;  %v903_v3 = vrot.slane %v12214_v37, %v8177_v6 }
 0x2e2   : > { %v968_v50 = vcombine.low %v903_v3, %v919_v31  ;;  %v969_v51 = vcombine.high %v903_v3, %v919_v31  ;;  %v8472_v31 = vrot.slane %v3220_v45, %v8177_v6 }
 0x2e3   : > { %v830_v30 = vpop.permute.xlu1 %829  ;;  %v8401_v43 = vld [vmem:[#allocation2 + $0x78] sm:$0xff] }
 0x2e4   : > { %867 = vst.msk [vmem:[#allocation2 + $0x81] sm:$0xff] %vm855_vm5, %v830_v30  ;;  %1273 = vrot.lane.b32.xlu0 %v8401_v43, %s7734_s24  ;;  %v12215_v30 = vcombine.low %v8135_v40, %v8139_v41  ;;  %v952_v40 = vcombine.low %v896_v39, %v912_v48  ;;  %v953_v41 = vcombine.high %v896_v39, %v912_v48  ;;  %v8452_v39 = vld [vmem:[#allocation2 + $0x79] sm:$0xff] }
 0x2e5   : > { %v838_v49 = vpop.permute.xlu0 %837 }
 0x2e6   : > { %v2057_v15 = vrot.slane %v12215_v30, %v8177_v6  ;;  %871 = vst.msk [vmem:[#allocation2 + $0xb1] sm:$0xff] %vm855_vm5, %v838_v49  ;;  %v3203_v30 = vcombine.low %v8159_v46, %v8163_v47  ;;  %v8447_v49 = vsub.s32 %v956_v36, %v8173_v4  ;;  %v8458_v47 = vrot.slane %v3355_v2, %v8177_v6 }
 0x2e7   : > { %v826_v33 = vpop.permute.xlu1 %825  ;;  %v8429_v37 = vld [vmem:[#allocation2 + $0x60] sm:$0xff]  ;;  %v8469_v4 = vrot.slane %v3204_v44, %v8177_v6 }
 0x2e8   : > { %865 = vst.msk [vmem:[#allocation2 + $0x69] sm:$0xff] %vm855_vm5, %v826_v33  ;;  %1663 = vrot.lane.b32.xlu0 %v8401_v43, %s7735_s25  ;;  %1269 = vrot.lane.b32.xlu1 %v8429_v37, %s7734_s24  ;;  %v2113_v12 = vcombine.low %v2057_v15, %v2073_v17  ;;  %v2114_v33 = vcombine.high %v2057_v15, %v2073_v17  ;;  %12218 = vst [vmem:[#allocation56_spill] sm:$0xff] %v8458_v47  ;;  %v8483_v17 = vld [vmem:[#allocation2 + $0x61] sm:$0xff] }
 0x2e9   : > { %v8455_v46 = vrot.slane %v3203_v30, %v8177_v6  ;;  %v8475_v36 = vrot.slane %v968_v50, %v8447_v49  ;;  %v8478_v38 = vrot.slane %v952_v40, %v8447_v49  ;;  %v8490_v27 = vrot.slane %v953_v41, %v8447_v49 }
 0x2ea   : > { %v8493_v62 = vrot.slane %v969_v51, %v8447_v49  ;;  %v8496_v25 = vrot.slane %v2114_v33, %v8447_v49  ;;  %v8499_v30 = vrot.slane %v2129_v32, %v8447_v49  ;;  %v8511_v40 = vrot.slane %v2130_v42, %v8447_v49 }
 0x2eb   : > { %v836_v29 = vpop.permute.xlu1 %835  ;;  %12219 = vst [vmem:[#allocation57_spill] sm:$0xff] %v8478_v38  ;;  %v8517_v44 = vld [vmem:[#allocation2 + $0x81] sm:$0xff]  ;;  %v12227_v50 = vcombine.low %v8195_v19, %v8209_v23  ;;  %v12229_v42 = vcombine.high %v8189_v10, %v8206_v22  ;;  %v8557_v18 = vrot.slane %v12234_v28, %v8447_v49  ;;  %v8591_v63 = vrot.slane %v12241_v61, %v8447_v49 }
 0x2ec   : > { %870 = vst.msk [vmem:[#allocation2 + $0xa9] sm:$0xff] %vm855_vm5, %v836_v29  ;;  %2427 = vrot.lane.b32.xlu0 %v8452_v39, %s7734_s24  ;;  %1659 = vrot.lane.b32.xlu1 %v8429_v37, %s7735_s25  ;;  %v8481_v29 = vrot.slane %v2113_v12, %v8447_v49  ;;  %12223 = vst [vmem:[#allocation61_spill] sm:$0xff] %v8493_v62  ;;  %v8519_v45 = vld [vmem:[#allocation2 + $0x82] sm:$0xff]  ;;  %v8593_v8 = vld [vmem:[#allocation2 + $0x7a] sm:$0xff]  ;;  %v8608_v5 = vrot.slane %v12244_v60, %v8447_v49 }
 0x2ed   : > { %v8485_v3 = vld [vmem:[#allocation2 + $0xb1] sm:$0xff]  ;;  %12224 = vst [vmem:[#allocation62_spill] sm:$0xff] %v8496_v25  ;;  %12225 = vst [vmem:[#allocation63_spill] sm:$0xff] %v8499_v30  ;;  %v8525_v51 = vrot.slane %v12227_v50, %v8447_v49  ;;  %v8531_v12 = vrot.slane %v12229_v42, %v8447_v49  ;;  %v883_v33 = vld [vmem:[#allocation2 + $0x80] sm:$0xff]  ;;  %v12231_v50 = vcombine.high %v8195_v19, %v8209_v23 }
 0x2ee   : > { %12220 = vst [vmem:[#allocation58_spill] sm:$0xff] %v8481_v29  ;;  %12221 = vst [vmem:[#allocation59_spill] sm:$0xff] %v8485_v3  ;;  %v8487_v48 = vld [vmem:[#allocation2 + $0xb2] sm:$0xff]  ;;  %v2234_v2 = vcombine.high %v8517_v44, %v8485_v3  ;;  %v12236_v19 = vcombine.high %v8183_v9, %v8203_v21 }
 0x2ef   : > { %v832_v15 = vpop.permute.xlu1 %831  ;;  %12222 = vst [vmem:[#allocation60_spill] sm:$0xff] %v8487_v48  ;;  %12226 = vst [vmem:[#allocation64_spill] sm:$0xff] %v8511_v40  ;;  %v3387_v41 = vcombine.low %v8519_v45, %v8487_v48  ;;  %v8543_v32 = vrot.slane %v12231_v50, %v8447_v49  ;;  %v3388_v11 = vcombine.high %v8519_v45, %v8487_v48  ;;  %v8685_v48 = vld [vmem:[#allocation2 + $0x6a] sm:$0xff] }
 0x2f0   : > { %868 = vst.msk [vmem:[#allocation2 + $0x91] sm:$0xff] %vm855_vm5, %v832_v15  ;;  %2817 = vrot.lane.b32.xlu0 %v8452_v39, %s7735_s25  ;;  %2423 = vrot.lane.b32.xlu1 %v8483_v17, %s7734_s24  ;;  %12228 = vst [vmem:[#allocation65_spill] sm:$0xff] %v8525_v51  ;;  %v2233_v15 = vcombine.low %v8517_v44, %v8485_v3  ;;  %v8563_v23 = vrot.slane %v12236_v19, %v8447_v49 }
 0x2f1   : > { %12230 = vst [vmem:[#allocation66_spill] sm:$0xff] %v8531_v12  ;;  %12232 = vst [vmem:[#allocation67_spill] sm:$0xff] %v8543_v32  ;;  %v12238_v50 = vcombine.high %v8198_v20, %v8212_v24  ;;  %v8599_v16 = vrot.slane %v2234_v2, %v8177_v6 }
 0x2f2   : > { %12235 = vst [vmem:[#allocation69_spill] sm:$0xff] %v8557_v18  ;;  %12237 = vst [vmem:[#allocation70_spill] sm:$0xff] %v8563_v23 }
 0x2f3   : > { %v834_v1 = vpop.permute.xlu1 %833  ;;  %v8545_v35 = vld [vmem:[#allocation2 + $0xa8] sm:$0xff]  ;;  %v8549_v34 = vld [vmem:[#allocation2 + $0xb0] sm:$0xff]  ;;  %v8569_v7 = vrot.slane %v12238_v50, %v8447_v49  ;;  %12242 = vst [vmem:[#allocation73_spill] sm:$0xff] %v8591_v63  ;;  %12245 = vst [vmem:[#allocation75_spill] sm:$0xff] %v8608_v5 }
 0x2f4   : > { %v8547_v42 = vld [vmem:[#allocation2 + $0xa9] sm:$0xff]  ;;  %12233 = vst [vmem:[#allocation68_spill] sm:$0xff] %v8549_v34  ;;  %869 = vst.msk [vmem:[#allocation2 + $0x99] sm:$0xff] %vm855_vm5, %v834_v1  ;;  %2813 = vrot.lane.b32.xlu1 %v8483_v17, %s7735_s25  ;;  %1275 = vrot.lane.b32.xlu0 %v883_v33, %s7734_s24  ;;  %v936_v28 = vcombine.low %v8401_v43, %v8545_v35  ;;  %v937_v9 = vcombine.high %v8401_v43, %v8545_v35  ;;  %v12312_v63 = vld [vmem:[#allocation14_spill] sm:$0xff] }
 0x2f5   : > { %12239 = vst [vmem:[#allocation71_spill] sm:$0xff] %v8569_v7  ;;  %v2097_v21 = vcombine.low %v8452_v39, %v8547_v42  ;;  %v8581_v19 = vld [vmem:[#allocation2 + $0xaa] sm:$0xff]  ;;  %v2098_v50 = vcombine.high %v8452_v39, %v8547_v42  ;;  %v1072_v1 = vcombine.low %v883_v33, %v8549_v34  ;;  %v1073_v58 = vcombine.high %v883_v33, %v8549_v34 }
 0x2f6   : > { %12240 = vst [vmem:[#allocation72_spill] sm:$0xff] %v8581_v19  ;;  %v8596_v43 = vrot.slane %v2233_v15, %v8177_v6  ;;  %v8602_v39 = vrot.slane %v3387_v41, %v8177_v6  ;;  %v8611_v10 = vrot.slane %v936_v28, %v8177_v6  ;;  %v3251_v2 = vcombine.low %v8593_v8, %v8581_v19  ;;  %v12309_v5 = vld [vmem:[#allocation11_spill] sm:$0xff]  ;;  %v12313_v7 = vld [vmem:[#allocation20_spill] sm:$0xff] }
 0x2f7   : > { %v8613_v22 = vld [vmem:[#allocation2 + $0x90] sm:$0xff]  ;;  %v3252_v41 = vcombine.high %v8593_v8, %v8581_v19  ;;  %v8622_v15 = vrot.slane %v3388_v11, %v8177_v6  ;;  %v8634_v28 = vrot.slane %v937_v9, %v8177_v6  ;;  %v8637_v11 = vrot.slane %v2097_v21, %v8177_v6  ;;  %v881_v9 = vld [vmem:[#allocation2 + $0x68] sm:$0xff] }
 0x2f8   : > { %12243 = vst [vmem:[#allocation74_spill] sm:$0xff] %v8602_v39  ;;  %v8615_v61 = vld [vmem:[#allocation2 + $0x91] sm:$0xff]  ;;  %3971 = vrot.lane.b32.xlu1 %v8593_v8, %s7735_s25  ;;  %1665 = vrot.lane.b32.xlu0 %v883_v33, %s7735_s25  ;;  %v920_v20 = vcombine.low %v8429_v37, %v8613_v22  ;;  %v921_v24 = vcombine.high %v8429_v37, %v8613_v22 }
 0x2f9   : > { %12246 = vst [vmem:[#allocation76_spill] sm:$0xff] %v8615_v61  ;;  %12247 = vst [vmem:[#allocation77_spill] sm:$0xff] %v8622_v15  ;;  %v2081_v60 = vcombine.low %v8483_v17, %v8615_v61  ;;  %v8640_v14 = vrot.slane %v2098_v50, %v8177_v6  ;;  %v2082_v33 = vcombine.high %v8483_v17, %v8615_v61 }
 0x2fa   : > { %v928_v59 = vrot.slane %v920_v20, %v8177_v6  ;;  %v935_v0 = vrot.slane %v921_v24, %v8177_v6  ;;  %v8650_v54 = vrot.slane %v1072_v1, %v8177_v6  ;;  %v8656_v50 = vrot.slane %v1073_v58, %v8177_v6 }
 0x2fb   : > { %v8647_v37 = vrot.slane %v2081_v60, %v8177_v6  ;;  %v8653_v21 = vrot.slane %v2082_v33, %v8177_v6  ;;  %v8659_v56 = vrot.slane %v3251_v2, %v8177_v6  ;;  %v8662_v17 = vrot.slane %v3252_v41, %v8177_v6  ;;  %v8664_v20 = vld [vmem:[#allocation2 + $0x98] sm:$0xff]  ;;  %v2042_v41 = vld [vmem:[#allocation2 + $0x69] sm:$0xff] }
 0x2fc   : > { %12248 = vst [vmem:[#allocation78_spill] sm:$0xff] %v8664_v20  ;;  %v8666_v24 = vld [vmem:[#allocation2 + $0x99] sm:$0xff]  ;;  %2429 = vrot.lane.b32.xlu0 %v8517_v44, %s7734_s24  ;;  %1271 = vrot.lane.b32.xlu1 %v881_v9, %s7734_s24  ;;  %v984_v1 = vcombine.low %v928_v59, %v8611_v10  ;;  %v985_v58 = vcombine.high %v928_v59, %v8611_v10  ;;  %v8687_v59 = vld [vmem:[#allocation2 + $0x62] sm:$0xff] }
 0x2fd   : > { %12249 = vst [vmem:[#allocation79_spill] sm:$0xff] %v8666_v24  ;;  %v1000_v60 = vcombine.low %v935_v0, %v8634_v28  ;;  %v8674_v2 = vld [vmem:[#allocation2 + $0x9a] sm:$0xff]  ;;  %v8676_v33 = vld [vmem:[#allocation2 + $0x92] sm:$0xff]  ;;  %v1001_v55 = vcombine.high %v935_v0, %v8634_v28  ;;  %v2145_v57 = vcombine.low %v8647_v37, %v8637_v11  ;;  %v2146_v52 = vcombine.high %v8647_v37, %v8637_v11 }
 0x2fe   : > { %12250 = vst [vmem:[#allocation80_spill] sm:$0xff] %v8674_v2  ;;  %12251 = vst [vmem:[#allocation81_spill] sm:$0xff] %v8676_v33  ;;  %v2161_v53 = vcombine.low %v8653_v21, %v8640_v14  ;;  %v2162_v10 = vcombine.high %v8653_v21, %v8640_v14  ;;  %v1056_v3 = vcombine.low %v881_v9, %v8664_v20 }
 0x2ff   : > { %v1057_v0 = vcombine.high %v881_v9, %v8664_v20  ;;  %v2217_v28 = vcombine.low %v2042_v41, %v8666_v24  ;;  %v2218_v19 = vcombine.high %v2042_v41, %v8666_v24  ;;  %v3371_v11 = vcombine.low %v8685_v48, %v8674_v2 }
 0x300   : > { %v3372_v37 = vcombine.high %v8685_v48, %v8674_v2  ;;  %v3235_v34 = vcombine.low %v8687_v59, %v8676_v33  ;;  %2819 = vrot.lane.b32.xlu0 %v8517_v44, %s7735_s25  ;;  %1661 = vrot.lane.b32.xlu1 %v881_v9, %s7735_s25  ;;  %v1064_v14 = vrot.slane %v1056_v3, %v8177_v6 }
 0x301   : > { %v8706_v21 = vrot.slane %v1057_v0, %v8177_v6  ;;  %v2225_v24 = vrot.slane %v2217_v28, %v8177_v6  ;;  %v8710_v20 = vrot.slane %v2218_v19, %v8177_v6  ;;  %v8713_v2 = vrot.slane %v3371_v11, %v8177_v6 }
 0x302   : > { %v8716_v61 = vrot.slane %v3372_v37, %v8177_v6  ;;  %v3236_v44 = vcombine.high %v8687_v59, %v8676_v33  ;;  %v1120_v9 = vcombine.low %v1064_v14, %v8650_v54  ;;  %v1121_v3 = vcombine.high %v1064_v14, %v8650_v54 }
 0x303   : > { %12252 = vst [vmem:[#allocation82_spill] sm:$0xff] %v8713_v2  ;;  %v1136_v0 = vcombine.low %v8706_v21, %v8656_v50  ;;  %v1137_v19 = vcombine.high %v8706_v21, %v8656_v50  ;;  %v2281_v28 = vcombine.low %v2225_v24, %v8596_v43  ;;  %v2282_v11 = vcombine.high %v2225_v24, %v8596_v43 }
 0x304   : > { %12253 = vst [vmem:[#allocation83_spill] sm:$0xff] %v8716_v61  ;;  %v2297_v37 = vcombine.low %v8710_v20, %v8599_v16  ;;  %v2298_v33 = vcombine.high %v8710_v20, %v8599_v16  ;;  %3583 = vrot.lane.b32.xlu0 %v8519_v45, %s7734_s24  ;;  %2425 = vrot.lane.b32.xlu1 %v2042_v41, %s7734_s24  ;;  %v12305_v61 = vld [vmem:[#allocation8_spill] sm:$0xff] }
 0x305   : > { %v3243_v14 = vrot.slane %v3235_v34, %v8177_v6  ;;  %v8745_v16 = vrot.slane %v3236_v44, %v8177_v6  ;;  %v8748_v20 = vrot.slane %v1000_v60, %v8447_v49  ;;  %v8751_v21 = vrot.slane %v984_v1, %v8447_v49 }
 0x306   : > { %v8754_v54 = vrot.slane %v2145_v57, %v8447_v49  ;;  %v8757_v50 = vrot.slane %v985_v58, %v8447_v49  ;;  %v8760_v43 = vrot.slane %v1001_v55, %v8447_v49  ;;  %v8794_v58 = vrot.slane %v2162_v10, %v8447_v49 }
 0x307   : > { %12254 = vst [vmem:[#allocation84_spill] sm:$0xff] %v8751_v21  ;;  %v3299_v34 = vcombine.low %v3243_v14, %v8659_v56  ;;  %v3300_v44 = vcombine.high %v3243_v14, %v8659_v56  ;;  %v3315_v60 = vcombine.low %v8745_v16, %v8662_v17  ;;  %v3316_v1 = vcombine.high %v8745_v16, %v8662_v17  ;;  %v12284_v17 = vld [vmem:[#allocation68_spill] sm:$0xff] }
 0x308   : > { %12255 = vst [vmem:[#allocation85_spill] sm:$0xff] %v8754_v54  ;;  %12256 = vst [vmem:[#allocation86_spill] sm:$0xff] %v8760_v43  ;;  %3581 = vrot.lane.b32.xlu0 %v8593_v8, %s7734_s24  ;;  %2815 = vrot.lane.b32.xlu1 %v2042_v41, %s7735_s25  ;;  %v8784_v41 = vrot.slane %v2146_v52, %v8447_v49  ;;  %v8791_v56 = vrot.slane %v2161_v53, %v8447_v49 }
 0x309   : > { %12259 = vst [vmem:[#allocation89_spill] sm:$0xff] %v8794_v58  ;;  %v8801_v52 = vrot.slane %v2281_v28, %v8447_v49  ;;  %v8804_v24 = vrot.slane %v1137_v19, %v8447_v49  ;;  %v8823_v55 = vrot.slane %v2282_v11, %v8447_v49  ;;  %v8828_v10 = vrot.slane %v1120_v9, %v8447_v49 }
 0x30a   : > { %12257 = vst [vmem:[#allocation87_spill] sm:$0xff] %v8784_v41  ;;  %12258 = vst [vmem:[#allocation88_spill] sm:$0xff] %v8791_v56  ;;  %v8831_v8 = vrot.slane %v1121_v3, %v8447_v49  ;;  %v8834_v28 = vrot.slane %v2298_v33, %v8447_v49  ;;  %v8841_v11 = vrot.slane %v1136_v0, %v8447_v49 }
 0x30b   : > { %12260 = vst [vmem:[#allocation90_spill] sm:$0xff] %v8801_v52  ;;  %12261 = vst [vmem:[#allocation91_spill] sm:$0xff] %v8804_v24  ;;  %v8844_v53 = vrot.slane %v2297_v37, %v8447_v49  ;;  %v3284_v33 = vcombine.high %v8469_v4, %v8472_v31  ;;  %v12268_v0 = vcombine.low %v8455_v46, %v8461_v13  ;;  %v12325_v52 = vld [vmem:[#allocation13_spill] sm:$0xff] }
 0x30c   : > { %3973 = vrot.lane.b32.xlu0 %v8519_v45, %s7735_s25  ;;  %3579 = vrot.lane.b32.xlu1 %v8685_v48, %s7734_s24  ;;  %12262 = vst [vmem:[#allocation92_spill] sm:$0xff] %v8823_v55  ;;  %12263 = vst [vmem:[#allocation93_spill] sm:$0xff] %v8828_v10  ;;  %v12271_v45 = vcombine.high %v8455_v46, %v8461_v13  ;;  %v8886_v9 = vrot.slane %v3300_v44, %v8447_v49  ;;  %v12320_v55 = vld [vmem:[#allocation22_spill] sm:$0xff] }
 0x30d   : > { %12264 = vst [vmem:[#allocation94_spill] sm:$0xff] %v8831_v8  ;;  %12265 = vst [vmem:[#allocation95_spill] sm:$0xff] %v8834_v28  ;;  %v8874_v37 = vrot.slane %v12268_v0, %v8447_v49  ;;  %v8889_v3 = vrot.slane %v3315_v60, %v8447_v49  ;;  %v12277_v46 = vcombine.low %v8713_v2, %v8602_v39  ;;  %v12307_v2 = vld [vmem:[#allocation12_spill] sm:$0xff]  ;;  %v12314_v8 = vld [vmem:[#allocation18_spill] sm:$0xff] }
 0x30e   : > { %12266 = vst [vmem:[#allocation96_spill] sm:$0xff] %v8841_v11  ;;  %12267 = vst [vmem:[#allocation97_spill] sm:$0xff] %v8844_v53  ;;  %v8883_v19 = vrot.slane %v12271_v45, %v8447_v49  ;;  %v8930_v60 = vrot.slane %v3316_v1, %v8447_v49  ;;  %v12285_v45 = vld [vmem:[#allocation72_spill] sm:$0xff]  ;;  %v1691_v23 = vcombine.low %v12314_v8, %v12313_v7 }
 0x30f   : > { %12269 = vst [vmem:[#allocation98_spill] sm:$0xff] %v8874_v37  ;;  %12273 = vst [vmem:[#allocation101_spill] sm:$0xff] %v8886_v9  ;;  %v8905_v13 = vrot.slane %v12277_v46, %v8447_v49  ;;  %v8924_v46 = vrot.slane %v3284_v33, %v8447_v49  ;;  %v12311_v11 = vld [vmem:[#allocation16_spill] sm:$0xff]  ;;  %v1692_v10 = vcombine.high %v12314_v8, %v12313_v7 }
 0x310   : > { %3969 = vrot.lane.b32.xlu0 %v8685_v48, %s7735_s25  ;;  %3577 = vrot.lane.b32.xlu1 %v8687_v59, %s7734_s24  ;;  %v8877_v48 = vrot.slane %v3299_v34, %v8447_v49  ;;  %12272 = vst [vmem:[#allocation100_spill] sm:$0xff] %v8883_v19  ;;  %12274 = vst [vmem:[#allocation102_spill] sm:$0xff] %v8889_v3  ;;  %v12275_v34 = vcombine.low %v8469_v4, %v8472_v31 }
 0x311   : > { %12278 = vst [vmem:[#allocation104_spill] sm:$0xff] %v8905_v13  ;;  %v12279_v4 = vcombine.low %v8450_v26, %v8458_v47  ;;  %12281 = vst [vmem:[#allocation106_spill] sm:$0xff] %v8924_v46  ;;  %v12308_v26 = vld [vmem:[#allocation10_spill] sm:$0xff]  ;;  %v1827_v28 = vcombine.low %v12312_v63, %v12311_v11  ;;  %v12321_v63 = vld [vmem:[#allocation28_spill] sm:$0xff] }
 0x312   : > { %12270 = vst [vmem:[#allocation99_spill] sm:$0xff] %v8877_v48  ;;  %v8899_v0 = vrot.slane %v12275_v34, %v8447_v49  ;;  %12282 = vst [vmem:[#allocation107_spill] sm:$0xff] %v8930_v60  ;;  %v12306_v48 = vld [vmem:[#allocation7_spill] sm:$0xff]  ;;  %v1301_v47 = vcombine.low %v12308_v26, %v12307_v2  ;;  %v1302_v53 = vcombine.high %v12308_v26, %v12307_v2  ;;  %v12319_v2 = vld [vmem:[#allocation24_spill] sm:$0xff] }
 0x313   : > { %v8917_v31 = vrot.slane %v12279_v4, %v8447_v49  ;;  %v1437_v37 = vcombine.low %v12306_v48, %v12305_v61  ;;  %v1438_v39 = vcombine.high %v12306_v48, %v12305_v61  ;;  %v2591_v32 = vcombine.low %v12320_v55, %v12319_v2  ;;  %v12322_v11 = vld [vmem:[#allocation26_spill] sm:$0xff] }
 0x314   : > { %3967 = vrot.lane.b32.xlu1 %v8687_v59, %s7735_s25  ;;  %1281 = vrot.lane.b32.xlu0 %v8545_v35, %s7734_s24  ;;  %12276 = vst [vmem:[#allocation103_spill] sm:$0xff] %v8899_v0  ;;  %v2981_v24 = vcombine.low %v12322_v11, %v12321_v63  ;;  %v9067_v12 = vrot.slane %v1301_v47, %v8177_v6  ;;  %v12328_v55 = vld [vmem:[#allocation30_spill] sm:$0xff]  ;;  %v12329_v47 = vld [vmem:[#allocation36_spill] sm:$0xff] }
 0x315   : > { %12280 = vst [vmem:[#allocation105_spill] sm:$0xff] %v8917_v31  ;;  %v12310_v31 = vld [vmem:[#allocation9_spill] sm:$0xff]  ;;  %v9057_v48 = vrot.slane %v1437_v37, %v8177_v6  ;;  %v9060_v26 = vrot.slane %v1438_v39, %v8177_v6  ;;  %v9070_v7 = vrot.slane %v1302_v53, %v8177_v6  ;;  %v12324_v37 = vld [vmem:[#allocation15_spill] sm:$0xff]  ;;  %v9078_v39 = vrot.slane %v1827_v28, %v8177_v6  ;;  %v12330_v63 = vld [vmem:[#allocation34_spill] sm:$0xff] }
 0x316   : > { %v1453_v13 = vcombine.low %v12310_v31, %v12309_v5  ;;  %v1317_v51 = vcombine.low %v12325_v52, %v12324_v37  ;;  %v2845_v58 = vcombine.low %v12330_v63, %v12329_v47  ;;  %v9087_v53 = vrot.slane %v1691_v23, %v8177_v6  ;;  %v12331_v28 = vld [vmem:[#allocation40_spill] sm:$0xff] }
 0x317   : > { %12317 = vst [vmem:[#allocation12_spill] sm:$0xff] %v9057_v48  ;;  %12318 = vst [vmem:[#allocation10_spill] sm:$0xff] %v9060_v26  ;;  %v12327_v26 = vld [vmem:[#allocation32_spill] sm:$0xff]  ;;  %v2846_v40 = vcombine.high %v12330_v63, %v12329_v47  ;;  %v9104_v23 = vrot.slane %v2981_v24, %v8177_v6  ;;  %v1454_v63 = vcombine.high %v12310_v31, %v12309_v5  ;;  %v12340_v5 = vld [vmem:[#allocation23_spill] sm:$0xff] }
 0x318   : > { %1671 = vrot.lane.b32.xlu0 %v8545_v35, %s7735_s25  ;;  %1277 = vrot.lane.b32.xlu1 %v8613_v22, %s7734_s24  ;;  %v12283_v35 = vld [vmem:[#allocation76_spill] sm:$0xff]  ;;  %v9073_v8 = vrot.slane %v1453_v13, %v8177_v6  ;;  %12326 = vst [vmem:[#allocation9_spill] sm:$0xff] %v9078_v39  ;;  %v2455_v2 = vcombine.low %v12328_v55, %v12327_v26  ;;  %v12341_v31 = vld [vmem:[#allocation21_spill] sm:$0xff] }
 0x319   : > { %v2456_v11 = vcombine.high %v12328_v55, %v12327_v26  ;;  %v9090_v13 = vrot.slane %v1692_v10, %v8177_v6  ;;  %v1318_v55 = vcombine.high %v12325_v52, %v12324_v37  ;;  %v9101_v26 = vrot.slane %v2591_v32, %v8177_v6  ;;  %12335 = vst [vmem:[#allocation15_spill] sm:$0xff] %v9104_v23  ;;  %v12336_v10 = vld [vmem:[#allocation44_spill] sm:$0xff] }
 0x31a   : > { %12323 = vst [vmem:[#allocation11_spill] sm:$0xff] %v9073_v8  ;;  %v1501_v47 = vcombine.low %v9057_v48, %v9073_v8  ;;  %v9116_v32 = vrot.slane %v2455_v2, %v8177_v6  ;;  %v9122_v37 = vrot.slane %v2845_v58, %v8177_v6  ;;  %v9128_v48 = vrot.slane %v2846_v40, %v8177_v6  ;;  %v12345_v2 = vld [vmem:[#allocation48_spill] sm:$0xff] }
 0x31b   : > { %12334 = vst [vmem:[#allocation18_spill] sm:$0xff] %v9101_v26  ;;  %v9119_v24 = vrot.slane %v2456_v11, %v8177_v6  ;;  %v9138_v58 = vrot.slane %v1318_v55, %v8177_v6  ;;  %v12350_v55 = vld [vmem:[#allocation35_spill] sm:$0xff] }
 0x31c   : > { %2435 = vrot.lane.b32.xlu0 %v8547_v42, %s7734_s24  ;;  %1667 = vrot.lane.b32.xlu1 %v8613_v22, %s7735_s25  ;;  %v12286_v22 = vld [vmem:[#allocation59_spill] sm:$0xff]  ;;  %12342 = vst [vmem:[#allocation13_spill] sm:$0xff] %v9128_v48 }
 0x320   : > { %2825 = vrot.lane.b32.xlu0 %v8547_v42, %s7735_s25  ;;  %2431 = vrot.lane.b32.xlu1 %v12283_v35, %s7734_s24  ;;  %v12287_v42 = vld [vmem:[#allocation78_spill] sm:$0xff] }
 0x324   : > { %1283 = vrot.lane.b32.xlu0 %v12284_v17, %s7734_s24  ;;  %2821 = vrot.lane.b32.xlu1 %v12283_v35, %s7735_s25  ;;  %v12288_v35 = vld [vmem:[#allocation60_spill] sm:$0xff] }
 0x328   : > { %1673 = vrot.lane.b32.xlu0 %v12284_v17, %s7735_s25  ;;  %3979 = vrot.lane.b32.xlu1 %v12285_v45, %s7735_s25  ;;  %v12289_v17 = vld [vmem:[#allocation79_spill] sm:$0xff] }
 0x32c   : > { %2437 = vrot.lane.b32.xlu0 %v12286_v22, %s7734_s24  ;;  %1279 = vrot.lane.b32.xlu1 %v12287_v42, %s7734_s24 }
 0x330   : > { %2827 = vrot.lane.b32.xlu0 %v12286_v22, %s7735_s25  ;;  %1669 = vrot.lane.b32.xlu1 %v12287_v42, %s7735_s25  ;;  %v12290_v22 = vld [vmem:[#allocation80_spill] sm:$0xff]  ;;  %v12291_v42 = vld [vmem:[#allocation81_spill] sm:$0xff] }
 0x334   : > { %3591 = vrot.lane.b32.xlu0 %v12288_v35, %s7734_s24  ;;  %2433 = vrot.lane.b32.xlu1 %v12289_v17, %s7734_s24 }
 0x338   : > { %3589 = vrot.lane.b32.xlu0 %v12285_v45, %s7734_s24  ;;  %2823 = vrot.lane.b32.xlu1 %v12289_v17, %s7735_s25 }
 0x33c   : > { %3981 = vrot.lane.b32.xlu0 %v12288_v35, %s7735_s25  ;;  %3587 = vrot.lane.b32.xlu1 %v12290_v22, %s7734_s24 }
 0x340   : > { %3977 = vrot.lane.b32.xlu0 %v12290_v22, %s7735_s25  ;;  %3585 = vrot.lane.b32.xlu1 %v12291_v42, %s7734_s24 }
 0x344   : > { %3975 = vrot.lane.b32.xlu1 %v12291_v42, %s7735_s25 }
 0x356   : > { %v8994_v33 = vpop.permute.xlu0 %1273 }
 0x35a   : > { %v8996_v45 = vpop.permute.xlu0 %1663  ;;  %v8998_v17 = vpop.permute.xlu1 %1269 }
 0x35e   : > { %v9000_v4 = vpop.permute.xlu0 %2427  ;;  %v9002_v35 = vpop.permute.xlu1 %1659 }
 0x35f   : > { %12292 = vst [vmem:[#allocation76_spill] sm:$0xff] %v9000_v4 }
 0x362   : > { %v9004_v59 = vpop.permute.xlu0 %2817  ;;  %v9006_v1 = vpop.permute.xlu1 %2423 }
 0x363   : > { %12293 = vst [vmem:[#allocation68_spill] sm:$0xff] %v9004_v59  ;;  %12294 = vst [vmem:[#allocation72_spill] sm:$0xff] %v9006_v1 }
 0x366   : > { %v9008_v22 = vpop.permute.xlu0 %1275  ;;  %v9010_v16 = vpop.permute.xlu1 %2813 }
 0x367   : > { %12295 = vst [vmem:[#allocation59_spill] sm:$0xff] %v9010_v16 }
 0x36a   : > { %v9012_v34 = vpop.permute.xlu0 %1665  ;;  %v9014_v42 = vpop.permute.xlu1 %3971 }
 0x36b   : > { %12296 = vst [vmem:[#allocation78_spill] sm:$0xff] %v9014_v42  ;;  %v12332_v42 = vld [vmem:[#allocation38_spill] sm:$0xff] }
 0x36e   : > { %v9016_v44 = vpop.permute.xlu0 %2429  ;;  %v9018_v14 = vpop.permute.xlu1 %1271 }
 0x36f   : > { %12297 = vst [vmem:[#allocation60_spill] sm:$0xff] %v9016_v44  ;;  %v12363_v44 = vld [vmem:[#allocation27_spill] sm:$0xff] }
 0x372   : > { %v9020_v57 = vpop.permute.xlu0 %2819  ;;  %v9022_v60 = vpop.permute.xlu1 %1661 }
 0x373   : > { %12298 = vst [vmem:[#allocation79_spill] sm:$0xff] %v9020_v57 }
 0x376   : > { %v9024_v46 = vpop.permute.xlu0 %3583  ;;  %v9026_v3 = vpop.permute.xlu1 %2425 }
 0x377   : > { %12299 = vst [vmem:[#allocation80_spill] sm:$0xff] %v9024_v46  ;;  %12300 = vst [vmem:[#allocation81_spill] sm:$0xff] %v9026_v3  ;;  %v9146_v46 = vrot.slane %v1454_v63, %v8177_v6 }
 0x379   : > { %12347 = vst [vmem:[#allocation36_spill] sm:$0xff] %v9146_v46 }
 0x37a   : > { %v9028_v0 = vpop.permute.xlu0 %3581  ;;  %v9030_v9 = vpop.permute.xlu1 %2815 }
 0x37b   : > { %12301 = vst [vmem:[#allocation108_spill] sm:$0xff] %v9028_v0  ;;  %12302 = vst [vmem:[#allocation109_spill] sm:$0xff] %v9030_v9  ;;  %v12351_v9 = vld [vmem:[#allocation33_spill] sm:$0xff] }
 0x37c   : > { %v2471_v57 = vcombine.low %v12351_v9, %v12350_v55 }
 0x37e   : > { %v9032_v19 = vpop.permute.xlu0 %3973  ;;  %v9034_v15 = vpop.permute.xlu1 %3579 }
 0x37f   : > { %12303 = vst [vmem:[#allocation110_spill] sm:$0xff] %v9032_v19  ;;  %12304 = vst [vmem:[#allocation111_spill] sm:$0xff] %v9034_v15  ;;  %v12337_v19 = vld [vmem:[#allocation42_spill] sm:$0xff] }
 0x380   : > { %v3609_v15 = vcombine.low %v12337_v19, %v12336_v10  ;;  %v1707_v10 = vcombine.low %v12341_v31, %v12340_v5 }
 0x382   : > { %v9052_v18 = vpop.permute.xlu0 %3969  ;;  %v9054_v61 = vpop.permute.xlu1 %3577  ;;  %v9141_v56 = vrot.slane %v3609_v15, %v8177_v6 }
 0x383   : > { %12315 = vst [vmem:[#allocation8_spill] sm:$0xff] %v9052_v18  ;;  %12316 = vst [vmem:[#allocation7_spill] sm:$0xff] %v9054_v61  ;;  %v3745_v61 = vcombine.low %v12332_v42, %v12331_v28  ;;  %v1325_v42 = vrot.slane %v1317_v51, %v8177_v6  ;;  %v12338_v28 = vld [vmem:[#allocation50_spill] sm:$0xff] }
 0x384   : > { %12346 = vst [vmem:[#allocation30_spill] sm:$0xff] %v9141_v56 }
 0x385   : > { %v9131_v51 = vrot.slane %v3745_v61, %v8177_v6  ;;  %v9149_v61 = vrot.slane %v1501_v47, %v8447_v49  ;;  %v1366_v63 = vcombine.high %v9067_v12, %v1325_v42  ;;  %v9166_v47 = vrot.slane %v1707_v10, %v8177_v6 }
 0x386   : > { %v1282_v0 = vpop.permute.xlu0 %1281  ;;  %v9096_v18 = vpop.permute.xlu1 %3967  ;;  %v1382_v10 = vcombine.high %v9070_v7, %v9138_v58 }
 0x387   : > { %12333 = vst [vmem:[#allocation20_spill] sm:$0xff] %v9096_v18  ;;  %v12339_v18 = vld [vmem:[#allocation46_spill] sm:$0xff]  ;;  %v1349_v19 = vcombine.low %v8994_v33, %v1282_v0  ;;  %12343 = vst [vmem:[#allocation32_spill] sm:$0xff] %v9131_v51  ;;  %v1350_v15 = vcombine.high %v8994_v33, %v1282_v0  ;;  %v12355_v33 = vld [vmem:[#allocation17_spill] sm:$0xff]  ;;  %v9230_v25 = vrot.slane %v1366_v63, %v8447_v49 }
 0x388   : > { %v3999_v52 = vcombine.low %v12339_v18, %v12338_v28  ;;  %v12344_v18 = vld [vmem:[#allocation52_spill] sm:$0xff]  ;;  %12348 = vst [vmem:[#allocation34_spill] sm:$0xff] %v9149_v61  ;;  %v12364_v51 = vld [vmem:[#allocation25_spill] sm:$0xff] }
 0x389   : > { %v4015_v28 = vcombine.low %v12345_v2, %v12344_v18  ;;  %v1365_v2 = vcombine.low %v9067_v12, %v1325_v42  ;;  %v9159_v56 = vrot.slane %v1349_v19, %v8177_v6  ;;  %v1381_v19 = vcombine.low %v9070_v7, %v9138_v58  ;;  %v12358_v58 = vld [vmem:[#allocation39_spill] sm:$0xff] }
 0x38a   : > { %v9135_v8 = vpop.permute.xlu0 %1671  ;;  %v1278_v11 = vpop.permute.xlu1 %1277  ;;  %v9153_v18 = vrot.slane %v3999_v52, %v8177_v6  ;;  %v1755_v7 = vcombine.low %v9087_v53, %v9166_v47  ;;  %v2607_v43 = vcombine.low %v12364_v51, %v12363_v44 }
 0x38b   : > { %v1333_v30 = vcombine.low %v8998_v17, %v1278_v11  ;;  %v1334_v40 = vcombine.high %v8998_v17, %v1278_v11  ;;  %v9169_v11 = vrot.slane %v4015_v28, %v8177_v6  ;;  %v1739_v52 = vcombine.low %v8996_v45, %v9135_v8 }
 0x38c   : > { %12349 = vst [vmem:[#allocation23_spill] sm:$0xff] %v9153_v18  ;;  %v9187_v28 = vrot.slane %v1365_v2, %v8447_v49 }
 0x38d   : > { %v9162_v17 = vrot.slane %v1333_v30, %v8177_v6  ;;  %12352 = vst [vmem:[#allocation21_spill] sm:$0xff] %v9169_v11  ;;  %v12354_v30 = vld [vmem:[#allocation19_spill] sm:$0xff]  ;;  %v9182_v12 = vrot.slane %v1334_v40, %v8177_v6  ;;  %v1708_v11 = vcombine.high %v12341_v31, %v12340_v5  ;;  %v9199_v40 = vrot.slane %v1350_v15, %v8177_v6  ;;  %v12359_v5 = vld [vmem:[#allocation37_spill] sm:$0xff] }
 0x38e   : > { %v9173_v18 = vpop.permute.xlu0 %2435  ;;  %v9175_v0 = vpop.permute.xlu1 %1667  ;;  %v1843_v46 = vcombine.low %v12355_v33, %v12354_v30  ;;  %12356 = vst [vmem:[#allocation33_spill] sm:$0xff] %v9187_v28  ;;  %v9196_v33 = vrot.slane %v2471_v57, %v8177_v6  ;;  %v2861_v31 = vcombine.low %v12359_v5, %v12358_v58  ;;  %v9211_v48 = vrot.slane %v1739_v52, %v8177_v6 }
 0x38f   : > { %12353 = vst [vmem:[#allocation35_spill] sm:$0xff] %v9173_v18  ;;  %v1397_v42 = vcombine.low %v9162_v17, %v9159_v56  ;;  %v1723_v3 = vcombine.low %v9002_v35, %v9175_v0  ;;  %v2503_v2 = vcombine.low %v9000_v4, %v9173_v18  ;;  %v1413_v4 = vcombine.low %v9182_v12, %v9199_v40 }
 0x390   : > { %v1722_v61 = vrot.slane %v1708_v11, %v8177_v6  ;;  %v2519_v18 = vcombine.low %v9116_v32, %v9196_v33  ;;  %v9252_v11 = vrot.slane %v2861_v31, %v8177_v6 }
 0x391   : > { %v9202_v30 = vrot.slane %v1397_v42, %v8447_v49  ;;  %v9214_v57 = vrot.slane %v1723_v3, %v8177_v6  ;;  %v9221_v42 = vrot.slane %v1843_v46, %v8177_v6  ;;  %v9233_v3 = vrot.slane %v1381_v19, %v8447_v49 }
 0x392   : > { %v9216_v15 = vpop.permute.xlu0 %2825  ;;  %v9218_v41 = vpop.permute.xlu1 %2431  ;;  %v9243_v62 = vrot.slane %v2503_v2, %v8177_v6  ;;  %v9249_v19 = vrot.slane %v1755_v7, %v8447_v49  ;;  %v1756_v7 = vcombine.high %v9087_v53, %v9166_v47  ;;  %v9286_v53 = vrot.slane %v2519_v18, %v8447_v49 }
 0x393   : > { %12357 = vst [vmem:[#allocation112_spill] sm:$0xff] %v9202_v30  ;;  %12360 = vst [vmem:[#allocation39_spill] sm:$0xff] %v9216_v15  ;;  %v2487_v52 = vcombine.low %v9006_v1, %v9218_v41  ;;  %v1787_v46 = vcombine.low %v9214_v57, %v9211_v48  ;;  %v2893_v51 = vcombine.low %v9004_v59, %v9216_v15 }
 0x394   : > { %12361 = vst [vmem:[#allocation37_spill] sm:$0xff] %v9218_v41  ;;  %12362 = vst [vmem:[#allocation113_spill] sm:$0xff] %v9221_v42  ;;  %v1891_v2 = vcombine.low %v9078_v39, %v9221_v42  ;;  %v1398_v59 = vcombine.high %v9162_v17, %v9159_v56  ;;  %v9280_v42 = vrot.slane %v1382_v10, %v8447_v49 }
 0x395   : > { %v9246_v63 = vrot.slane %v2487_v52, %v8177_v6  ;;  %12365 = vst [vmem:[#allocation114_spill] sm:$0xff] %v9249_v19  ;;  %v9255_v1 = vrot.slane %v1787_v46, %v8447_v49  ;;  %v9268_v52 = vrot.slane %v1413_v4, %v8447_v49  ;;  %v1771_v46 = vcombine.low %v9090_v13, %v1722_v61 }
 0x396   : > { %v9259_v44 = vpop.permute.xlu0 %1283  ;;  %v9261_v41 = vpop.permute.xlu1 %2821  ;;  %v9283_v4 = vrot.slane %v2607_v43, %v8177_v6  ;;  %12369 = vst [vmem:[#allocation118_spill] sm:$0xff] %v9286_v53  ;;  %v1772_v56 = vcombine.high %v9090_v13, %v1722_v61  ;;  %v2909_v17 = vcombine.low %v9122_v37, %v9252_v11  ;;  %v9295_v15 = vrot.slane %v2893_v51, %v8177_v6 }
 0x397   : > { %12366 = vst [vmem:[#allocation115_spill] sm:$0xff] %v9255_v1  ;;  %12367 = vst [vmem:[#allocation116_spill] sm:$0xff] %v9261_v41  ;;  %v2551_v31 = vcombine.low %v9246_v63, %v9243_v62  ;;  %v2877_v39 = vcombine.low %v9010_v16, %v9261_v41  ;;  %v9305_v18 = vrot.slane %v1891_v2, %v8447_v49  ;;  %v12374_v41 = vld [vmem:[#allocation29_spill] sm:$0xff] }
 0x398   : > { %12368 = vst [vmem:[#allocation117_spill] sm:$0xff] %v9283_v4  ;;  %v1434_v51 = vcombine.high %v9233_v3, %v9268_v52  ;;  %v9314_v61 = vrot.slane %v1756_v7, %v8447_v49  ;;  %v12375_v53 = vcombine.high %v8475_v36, %v8748_v20  ;;  %v1430_v7 = vcombine.high %v9187_v28, %v9202_v30 }
 0x399   : > { %v9289_v47 = vrot.slane %v2551_v31, %v8447_v49  ;;  %v9298_v10 = vrot.slane %v2877_v39, %v8177_v6  ;;  %v1414_v31 = vcombine.high %v9182_v12, %v9199_v40  ;;  %v9317_v39 = vrot.slane %v1771_v46, %v8447_v49  ;;  %v12373_v40 = vld [vmem:[#allocation31_spill] sm:$0xff] }
 0x39a   : > { %v9300_v16 = vpop.permute.xlu0 %1673  ;;  %v9302_v43 = vpop.permute.xlu1 %3979  ;;  %v2655_v12 = vcombine.low %v9101_v26, %v9283_v4  ;;  %v2997_v13 = vcombine.low %v12374_v41, %v12373_v40  ;;  %v9332_v46 = vrot.slane %v1772_v56, %v8447_v49  ;;  %v1485_v56 = vcombine.low %v9008_v22, %v9259_v44 }
 0x39b   : > { %12370 = vst [vmem:[#allocation119_spill] sm:$0xff] %v9289_v47  ;;  %12371 = vst [vmem:[#allocation120_spill] sm:$0xff] %v9302_v43  ;;  %v1412_v43 = vrot.slane %v1398_v59, %v8447_v49  ;;  %v2941_v2 = vcombine.low %v9298_v10, %v9295_v15  ;;  %v7013_v47 = vpack.i.bf16 %v1434_v51, %v12375_v53  ;;  %v12379_v53 = vld [vmem:[#allocation43_spill] sm:$0xff]  ;;  %v12380_v51 = vld [vmem:[#allocation41_spill] sm:$0xff] }
 0x39c   : > { %12372 = vst [vmem:[#allocation121_spill] sm:$0xff] %v9317_v39  ;;  %v2472_v59 = vcombine.high %v12351_v9, %v12350_v55  ;;  %v9337_v39 = vrot.slane %v2909_v17, %v8447_v49  ;;  %v3761_v4 = vcombine.low %v12380_v51, %v12379_v53  ;;  %v9349_v30 = vrot.slane %v1414_v31, %v8447_v49  ;;  %v12398_v53 = vld [vmem:[#allocation62_spill] sm:$0xff] }
 0x39d   : > { %v9340_v26 = vrot.slane %v2941_v2, %v8447_v49  ;;  %7014 = vrot.lane.b32.xlu1 %v7013_v47, %s7738_s26  ;;  %v12381_v9 = vcombine.high %v8478_v38, %v8751_v21  ;;  %v1788_v17 = vcombine.high %v9214_v57, %v9211_v48  ;;  %v1820_v31 = vcombine.high %v9249_v19, %v9255_v1  ;;  %v12395_v38 = vld [vmem:[#allocation32_spill] sm:$0xff] }
 0x39e   : > { %12376 = vst [vmem:[#allocation122_spill] sm:$0xff] %v9337_v39  ;;  %v9342_v41 = vpop.permute.xlu0 %2437  ;;  %v9344_v40 = vpop.permute.xlu1 %1279  ;;  %v1431_v28 = vcombine.low %v9230_v25, %v1412_v43  ;;  %v9365_v51 = vrot.slane %v2655_v12, %v8447_v49  ;;  %v9368_v47 = vrot.slane %v2997_v13, %v8177_v6  ;;  %v9376_v57 = vrot.slane %v2472_v59, %v8177_v6 }
 0x39f   : > { %12377 = vst [vmem:[#allocation123_spill] sm:$0xff] %v9340_v26  ;;  %12378 = vst [vmem:[#allocation124_spill] sm:$0xff] %v9342_v41  ;;  %v6993_v55 = vpack.i.bf16 %v1430_v7, %v12381_v9  ;;  %v1724_v7 = vcombine.high %v9002_v35, %v9175_v0  ;;  %v1469_v48 = vcombine.low %v9018_v14, %v9344_v40 }
 0x3a0   : > { %12382 = vst [vmem:[#allocation125_spill] sm:$0xff] %v9368_v47  ;;  %v2862_v9 = vcombine.high %v12359_v5, %v12358_v58  ;;  %v1740_v12 = vcombine.high %v8996_v45, %v9135_v8  ;;  %v12383_v13 = vcombine.high %v8481_v29, %v8754_v54  ;;  %v12385_v59 = vcombine.low %v8490_v27, %v8757_v50 }
 0x3a1   : > { %6994 = vrot.lane.b32.xlu0 %v6993_v55, %s7739_s27  ;;  %v9390_v55 = vrot.slane %v1485_v56, %v8177_v6  ;;  %v9396_v58 = vrot.slane %v1469_v48, %v8177_v6  ;;  %v1435_v45 = vcombine.low %v9280_v42, %v9349_v30  ;;  %v9401_v8 = vrot.slane %v3761_v4, %v8177_v6 }
 0x3a2   : > { %v7018_v2 = vpack.i.bf16 %v12383_v13, %v1820_v31  ;;  %v9385_v35 = vpop.permute.xlu0 %2827  ;;  %v9387_v0 = vpop.permute.xlu1 %1669  ;;  %v6998_v1 = vpack.i.bf16 %v1431_v28, %v12385_v59  ;;  %v9404_v5 = vrot.slane %v1788_v17, %v8447_v49  ;;  %v1875_v56 = vcombine.low %v9012_v34, %v9300_v16  ;;  %v12389_v13 = vld [vmem:[#allocation86_spill] sm:$0xff] }
 0x3a3   : > { %12384 = vst [vmem:[#allocation126_spill] sm:$0xff] %v9385_v35  ;;  %12386 = vst [vmem:[#allocation127_spill] sm:$0xff] %v9396_v58  ;;  %v1432_v31 = vcombine.high %v9230_v25, %v1412_v43  ;;  %v3045_v28 = vcombine.low %v9104_v23, %v9368_v47  ;;  %v9413_v48 = vrot.slane %v1724_v7, %v8177_v6  ;;  %v12388_v7 = vld [vmem:[#allocation61_spill] sm:$0xff]  ;;  %v12404_v23 = vld [vmem:[#allocation47_spill] sm:$0xff] }
 0x3a4   : > { %12387 = vst [vmem:[#allocation128_spill] sm:$0xff] %v9401_v8  ;;  %7019 = vrot.lane.b32.xlu1 %v7018_v2, %s7739_s27  ;;  %v1533_v4 = vcombine.low %v9396_v58, %v9390_v55  ;;  %v1859_v17 = vcombine.low %v9022_v60, %v9387_v0  ;;  %v2520_v2 = vcombine.high %v9116_v32, %v9196_v33  ;;  %v12405_v47 = vld [vmem:[#allocation45_spill] sm:$0xff] }
 0x3a5   : > { %6999 = vrot.lane.b32.xlu0 %v6998_v1, %s7740_s28  ;;  %v2535_v25 = vcombine.low %v9119_v24, %v9376_v57  ;;  %v9425_v43 = vrot.slane %v2862_v9, %v8177_v6  ;;  %v12390_v59 = vcombine.low %v12388_v7, %v12389_v13  ;;  %v2910_v29 = vcombine.high %v9122_v37, %v9252_v11 }
 0x3a6   : > { %v9430_v1 = vpop.permute.xlu0 %3591  ;;  %v9432_v54 = vpop.permute.xlu1 %2433  ;;  %v9437_v21 = vrot.slane %v1740_v12, %v8177_v6  ;;  %v9440_v32 = vrot.slane %v1533_v4, %v8447_v49  ;;  %v12394_v33 = vcombine.high %v8490_v27, %v8757_v50  ;;  %v9452_v37 = vrot.slane %v1859_v17, %v8177_v6  ;;  %v12396_v27 = vld [vmem:[#allocation60_spill] sm:$0xff] }
 0x3a7   : > { %v7023_v19 = vpack.i.bf16 %v1435_v45, %v12390_v59  ;;  %12391 = vst [vmem:[#allocation61_spill] sm:$0xff] %v9430_v1  ;;  %12392 = vst [vmem:[#allocation86_spill] sm:$0xff] %v9432_v54  ;;  %v3809_v45 = vcombine.low %v12395_v38, %v9401_v8  ;;  %v9448_v59 = vrot.slane %v1875_v56, %v8177_v6  ;;  %v12399_v38 = vld [vmem:[#allocation87_spill] sm:$0xff] }
 0x3a8   : > { %12393 = vst [vmem:[#allocation129_spill] sm:$0xff] %v9440_v32  ;;  %v7003_v9 = vpack.i.bf16 %v1432_v31, %v12394_v33  ;;  %v1821_v11 = vcombine.low %v9314_v61, %v9404_v5  ;;  %v1803_v12 = vcombine.low %v9413_v48, %v9437_v21  ;;  %v2639_v50 = vcombine.low %v12396_v27, %v9342_v41  ;;  %v12406_v32 = vld [vmem:[#allocation54_spill] sm:$0xff] }
 0x3a9   : > { %7024 = vrot.lane.b32.xlu1 %v7023_v19, %s7741_s29  ;;  %v1433_v19 = vcombine.low %v9233_v3, %v9268_v52  ;;  %v9466_v56 = vrot.slane %v3045_v28, %v8447_v49  ;;  %v9469_v17 = vrot.slane %v2520_v2, %v8447_v49  ;;  %v1923_v33 = vcombine.low %v9452_v37, %v9448_v59  ;;  %v12401_v3 = vld [vmem:[#allocation13_spill] sm:$0xff] }
 0x3aa   : > { %7004 = vrot.lane.b32.xlu0 %v7003_v9, %s7742_s30  ;;  %v12400_v8 = vcombine.low %v12398_v53, %v12399_v38  ;;  %v9477_v4 = vrot.slane %v2535_v25, %v8447_v49  ;;  %v9480_v9 = vrot.slane %v2910_v29, %v8447_v49  ;;  %v12402_v28 = vcombine.low %v8475_v36, %v8748_v20  ;;  %v9487_v41 = vpop.permute.xlu0 %3589  ;;  %v12408_v29 = vld [vmem:[#allocation81_spill] sm:$0xff]  ;;  %v9499_v58 = vpop.permute.xlu1 %2823 }
 0x3ab   : > { %12403 = vst [vmem:[#allocation62_spill] sm:$0xff] %v9487_v41  ;;  %v3625_v31 = vcombine.low %v12405_v47, %v12404_v23  ;;  %v9494_v25 = vrot.slane %v1923_v33, %v8447_v49  ;;  %v2623_v52 = vcombine.low %v12408_v29, %v9432_v54  ;;  %v9502_v36 = vrot.slane %v3809_v45, %v8447_v49  ;;  %v12413_v23 = vld [vmem:[#allocation37_spill] sm:$0xff] }
 0x3ac   : > { %v7028_v27 = vpack.i.bf16 %v12400_v8, %v1821_v11  ;;  %v7008_v2 = vpack.i.bf16 %v1433_v19, %v12402_v28  ;;  %v12407_v8 = vld [vmem:[#allocation51_spill] sm:$0xff]  ;;  %v1811_v20 = vrot.slane %v1803_v12, %v8447_v49  ;;  %v9506_v19 = vrot.slane %v2639_v50, %v8177_v6  ;;  %v12411_v50 = vld [vmem:[#allocation53_spill] sm:$0xff] }
 0x3ad   : > { %v4151_v11 = vcombine.low %v12407_v8, %v12406_v32  ;;  %12409 = vst [vmem:[#allocation87_spill] sm:$0xff] %v9502_v36  ;;  %v1436_v33 = vcombine.high %v9280_v42, %v9349_v30  ;;  %v9516_v45 = vrot.slane %v2623_v52, %v8177_v6  ;;  %v1822_v12 = vcombine.high %v9314_v61, %v9404_v5  ;;  %v12412_v32 = vld [vmem:[#allocation49_spill] sm:$0xff]  ;;  %v12463_v36 = vld [vmem:[#allocation10_spill] sm:$0xff] }
 0x3ae   : > { %7029 = vrot.lane.b32.xlu1 %v7028_v27, %s7740_s28  ;;  %7009 = vrot.lane.b32.xlu0 %v7008_v2, %s7743_s11  ;;  %v12410_v27 = vld [vmem:[#allocation79_spill] sm:$0xff]  ;;  %v4135_v47 = vcombine.low %v12412_v32, %v12411_v50  ;;  %v12414_v2 = vld [vmem:[#allocation72_spill] sm:$0xff]  ;;  %v12415_v30 = vcombine.high %v12388_v7, %v12389_v13  ;;  %v12416_v54 = vld [vmem:[#allocation109_spill] sm:$0xff]  ;;  %v9530_v8 = vrot.slane %v3625_v31, %v8177_v6  ;;  %v9549_v50 = vpop.permute.xlu0 %3981 }
 0x3af   : > { %v3029_v28 = vcombine.low %v12410_v27, %v9385_v35  ;;  %v2488_v29 = vcombine.high %v12414_v2, %v12413_v23  ;;  %v3013_v27 = vcombine.low %v12416_v54, %v9499_v58  ;;  %v9533_v52 = vrot.slane %v4151_v11, %v8177_v6  ;;  %v12420_v2 = vld [vmem:[#allocation35_spill] sm:$0xff]  ;;  %v12421_v32 = vld [vmem:[#allocation76_spill] sm:$0xff]  ;;  %12424 = vst [vmem:[#allocation72_spill] sm:$0xff] %v9549_v50 }
 0x3b0   : > { %v7033_v42 = vpack.i.bf16 %v1436_v33, %v12415_v30  ;;  %12417 = vst [vmem:[#allocation13_spill] sm:$0xff] %v9530_v8  ;;  %v2687_v61 = vcombine.low %v9516_v45, %v9506_v19  ;;  %v12419_v5 = vcombine.high %v12398_v53, %v12399_v38  ;;  %v2504_v7 = vcombine.high %v12421_v32, %v12420_v2  ;;  %v12422_v33 = vld [vmem:[#allocation116_spill] sm:$0xff]  ;;  %v12423_v30 = vld [vmem:[#allocation59_spill] sm:$0xff] }
 0x3b1   : > { %12418 = vst [vmem:[#allocation37_spill] sm:$0xff] %v9533_v52  ;;  %v2552_v13 = vcombine.high %v9246_v63, %v9243_v62  ;;  %v2878_v31 = vcombine.high %v12423_v30, %v12422_v33  ;;  %v2942_v11 = vcombine.high %v9298_v10, %v9295_v15  ;;  %v9552_v38 = vrot.slane %v3029_v28, %v8177_v6  ;;  %v12425_v63 = vld [vmem:[#allocation121_spill] sm:$0xff]  ;;  %v12427_v10 = vld [vmem:[#allocation39_spill] sm:$0xff]  ;;  %v12432_v30 = vld [vmem:[#allocation88_spill] sm:$0xff] }
 0x3b2   : > { %v7038_v23 = vpack.i.bf16 %v12419_v5, %v1822_v12  ;;  %7034 = vrot.lane.b32.xlu1 %v7033_v42, %s7744_s12  ;;  %v9555_v53 = vrot.slane %v2687_v61, %v8447_v49  ;;  %v9559_v62 = vrot.slane %v3013_v27, %v8177_v6  ;;  %v1824_v32 = vcombine.high %v12425_v63, %v1811_v20  ;;  %v12428_v12 = vld [vmem:[#allocation68_spill] sm:$0xff]  ;;  %v9571_v61 = vpop.permute.xlu1 %3587  ;;  %v12431_v33 = vld [vmem:[#allocation63_spill] sm:$0xff] }
 0x3b3   : > { %v9563_v15 = vrot.slane %v4135_v47, %v8177_v6  ;;  %v2894_v42 = vcombine.high %v12428_v12, %v12427_v10  ;;  %v9568_v5 = vrot.slane %v2488_v29, %v8177_v6  ;;  %v1823_v28 = vcombine.low %v12425_v63, %v1811_v20  ;;  %12429 = vst [vmem:[#allocation76_spill] sm:$0xff] %v9571_v61 }
 0x3b4   : > { %7039 = vrot.lane.b32.xlu0 %v7038_v23, %s7742_s30  ;;  %v12430_v23 = vld [vmem:[#allocation80_spill] sm:$0xff]  ;;  %v3077_v47 = vcombine.low %v9559_v62, %v9552_v38  ;;  %v12433_v35 = vcombine.high %v12431_v33, %v12432_v30  ;;  %v9583_v29 = vrot.slane %v2504_v7, %v8177_v6  ;;  %v9586_v20 = vrot.slane %v2552_v13, %v8447_v49  ;;  %v12435_v7 = vld [vmem:[#allocation111_spill] sm:$0xff] }
 0x3b5   : > { %12426 = vst [vmem:[#allocation35_spill] sm:$0xff] %v9563_v15  ;;  %v3793_v2 = vcombine.low %v12430_v23, %v9430_v1  ;;  %v9589_v63 = vrot.slane %v2942_v11, %v8447_v49  ;;  %v12434_v12 = vcombine.low %v12431_v33, %v12432_v30  ;;  %v4199_v23 = vcombine.low %v9563_v15, %v9533_v52 }
 0x3b6   : > { %v7048_v10 = vpack.i.bf16 %v12433_v35, %v1824_v32  ;;  %v9597_v1 = vrot.slane %v2878_v31, %v8177_v6  ;;  %v9600_v35 = vrot.slane %v3077_v47, %v8447_v49  ;;  %v3777_v13 = vcombine.low %v12435_v7, %v9571_v61  ;;  %v9615_v47 = vpop.permute.xlu0 %3977 }
 0x3b7   : > { %v7043_v27 = vpack.i.bf16 %v12434_v12, %v1823_v28  ;;  %v1804_v11 = vcombine.high %v9413_v48, %v9437_v21  ;;  %v9608_v32 = vrot.slane %v2894_v42, %v8177_v6  ;;  %v2567_v28 = vcombine.low %v9568_v5, %v9583_v29  ;;  %12436 = vst [vmem:[#allocation116_spill] sm:$0xff] %v9615_v47  ;;  %v12438_v21 = vld [vmem:[#allocation110_spill] sm:$0xff] }
 0x3b8   : > { %7049 = vrot.lane.b32.xlu1 %v7048_v10, %s7738_s26  ;;  %v1470_v31 = vcombine.high %v9018_v14, %v9344_v40  ;;  %v9618_v33 = vrot.slane %v3793_v2, %v8177_v6  ;;  %v4183_v48 = vcombine.low %v12438_v21, %v9549_v50  ;;  %v9625_v42 = vrot.slane %v3777_v13, %v8177_v6  ;;  %v12440_v10 = vld [vmem:[#allocation119_spill] sm:$0xff]  ;;  %v12441_v12 = vld [vmem:[#allocation118_spill] sm:$0xff]  ;;  %v12444_v21 = vld [vmem:[#allocation108_spill] sm:$0xff] }
 0x3b9   : > { %7044 = vrot.lane.b32.xlu0 %v7043_v27, %s7743_s11  ;;  %v2584_v15 = vcombine.high %v12441_v12, %v12440_v10  ;;  %v2974_v14 = vcombine.high %v9337_v39, %v9340_v26  ;;  %v2586_v40 = vcombine.high %v9469_v17, %v9586_v20  ;;  %v2976_v2 = vcombine.high %v9480_v9, %v9589_v63  ;;  %v9635_v27 = vpop.permute.xlu1 %3585  ;;  %v12443_v12 = vld [vmem:[#allocation8_spill] sm:$0xff] }
 0x3ba   : > { %12437 = vst [vmem:[#allocation59_spill] sm:$0xff] %v9618_v33  ;;  %12439 = vst [vmem:[#allocation121_spill] sm:$0xff] %v9625_v42  ;;  %v1486_v30 = vcombine.high %v9008_v22, %v9259_v44  ;;  %v2957_v13 = vcombine.low %v9597_v1, %v9608_v32  ;;  %v3841_v10 = vcombine.low %v9625_v42, %v9618_v33 }
 0x3bb   : > { %12442 = vst [vmem:[#allocation39_spill] sm:$0xff] %v9635_v27  ;;  %v4167_v26 = vcombine.low %v12443_v12, %v9615_v47  ;;  %v9646_v39 = vrot.slane %v1804_v11, %v8447_v49  ;;  %v3657_v50 = vcombine.low %v12444_v21, %v9487_v41  ;;  %v7053_v52 = vpack.i.bf16 %v2974_v14, %v2584_v15  ;;  %v12455_v14 = vld [vmem:[#allocation120_spill] sm:$0xff]  ;;  %v12456_v47 = vld [vmem:[#allocation78_spill] sm:$0xff]  ;;  %v12459_v21 = vld [vmem:[#allocation89_spill] sm:$0xff] }
 0x3bc   : > { %v7073_v7 = vpack.i.bf16 %v2976_v2, %v2586_v40  ;;  %v9651_v61 = vrot.slane %v1470_v31, %v8177_v6  ;;  %v9654_v44 = vrot.slane %v4183_v48, %v8177_v6  ;;  %v9657_v22 = vrot.slane %v3841_v10, %v8447_v49  ;;  %v12449_v31 = vld [vmem:[#allocation7_spill] sm:$0xff]  ;;  %v12450_v40 = vld [vmem:[#allocation30_spill] sm:$0xff] }
 0x3bd   : > { %v9660_v42 = vrot.slane %v4167_v26, %v8177_v6  ;;  %v12448_v11 = vcombine.low %v12401_v3, %v9425_v43  ;;  %v9669_v15 = vrot.slane %v2567_v28, %v8447_v49  ;;  %7054 = vrot.lane.b32.xlu1 %v7053_v52, %s7739_s27  ;;  %v3641_v48 = vcombine.low %v12449_v31, %v9635_v27  ;;  %v12462_v27 = vld [vmem:[#allocation36_spill] sm:$0xff] }
 0x3be   : > { %12445 = vst [vmem:[#allocation68_spill] sm:$0xff] %v9654_v44  ;;  %12446 = vst [vmem:[#allocation63_spill] sm:$0xff] %v9657_v22  ;;  %7074 = vrot.lane.b32.xlu0 %v7073_v7, %s7742_s30  ;;  %v9676_v10 = vrot.slane %v1486_v30, %v8177_v6  ;;  %v9679_v26 = vrot.slane %v2957_v13, %v8447_v49  ;;  %v3673_v52 = vcombine.low %v12450_v40, %v9530_v8  ;;  %v9695_v13 = vpop.permute.xlu1 %3975 }
 0x3bf   : > { %12447 = vst [vmem:[#allocation88_spill] sm:$0xff] %v9660_v42  ;;  %v9666_v12 = vrot.slane %v12448_v11, %v8447_v49  ;;  %v4231_v28 = vcombine.low %v9660_v42, %v9654_v44  ;;  %v9688_v7 = vrot.slane %v3657_v50, %v8177_v6  ;;  %v9691_v2 = vrot.slane %v3641_v48, %v8177_v6 }
 0x3c0   : > { %v1825_v30 = vcombine.low %v9332_v46, %v9646_v39  ;;  %12453 = vst [vmem:[#allocation132_spill] sm:$0xff] %v9695_v13  ;;  %v9698_v11 = vrot.slane %v4199_v23, %v8447_v49  ;;  %v4047_v42 = vcombine.low %v12456_v47, %v12455_v14  ;;  %v1550_v44 = vcombine.high %v9651_v61, %v9676_v10  ;;  %v12458_v23 = vld [vmem:[#allocation64_spill] sm:$0xff] }
 0x3c1   : > { %12451 = vst [vmem:[#allocation130_spill] sm:$0xff] %v9688_v7  ;;  %12452 = vst [vmem:[#allocation131_spill] sm:$0xff] %v9691_v2  ;;  %v9705_v50 = vrot.slane %v4231_v28, %v8447_v49  ;;  %v3705_v48 = vcombine.low %v9691_v2, %v9688_v7  ;;  %v2587_v40 = vcombine.low %v9477_v4, %v9669_v15  ;;  %v12461_v14 = vld [vmem:[#allocation20_spill] sm:$0xff]  ;;  %v12464_v2 = vld [vmem:[#allocation21_spill] sm:$0xff] }
 0x3c2   : > { %12454 = vst [vmem:[#allocation133_spill] sm:$0xff] %v9698_v11  ;;  %v12460_v41 = vcombine.low %v12458_v23, %v12459_v21  ;;  %v2977_v47 = vcombine.low %v9666_v12, %v9679_v26  ;;  %v4031_v28 = vcombine.low %v12461_v14, %v9695_v13  ;;  %v1518_v22 = vcombine.high %v12463_v36, %v12462_v27  ;;  %v12465_v7 = vld [vmem:[#allocation23_spill] sm:$0xff]  ;;  %v12466_v13 = vld [vmem:[#allocation113_spill] sm:$0xff] }
 0x3c3   : > { %12457 = vst [vmem:[#allocation134_spill] sm:$0xff] %v9705_v50  ;;  %v4063_v33 = vcombine.low %v12465_v7, %v12464_v2  ;;  %v9725_v54 = vrot.slane %v3673_v52, %v8447_v49  ;;  %v9728_v8 = vrot.slane %v3705_v48, %v8447_v49  ;;  %v1924_v14 = vcombine.high %v9452_v37, %v9448_v59 }
 0x3c4   : > { %v7058_v31 = vpack.i.bf16 %v12460_v41, %v1825_v30  ;;  %v9731_v41 = vrot.slane %v4047_v42, %v8177_v6  ;;  %v1564_v30 = vrot.slane %v1550_v44, %v8447_v49  ;;  %v7078_v11 = vpack.i.bf16 %v2977_v47, %v2587_v40  ;;  %v12467_v44 = vld [vmem:[#allocation9_spill] sm:$0xff] }
 0x3c5   : > { %v9736_v50 = vrot.slane %v4031_v28, %v8177_v6  ;;  %v2585_v48 = vcombine.low %v9469_v17, %v9586_v20  ;;  %v2975_v42 = vcombine.low %v9480_v9, %v9589_v63  ;;  %v1892_v7 = vcombine.high %v12467_v44, %v12466_v13 }
 0x3c6   : > { %7059 = vrot.lane.b32.xlu1 %v7058_v31, %s7741_s29  ;;  %7079 = vrot.lane.b32.xlu0 %v7078_v11, %s7743_s11  ;;  %v1956_v59 = vcombine.high %v9305_v18, %v9494_v25  ;;  %v1532_v37 = vrot.slane %v1518_v22, %v8447_v49  ;;  %v2958_v31 = vcombine.high %v9597_v1, %v9608_v32  ;;  %v12468_v1 = vld [vmem:[#allocation65_spill] sm:$0xff]  ;;  %v12469_v32 = vld [vmem:[#allocation90_spill] sm:$0xff] }
 0x3c7   : > { %v4095_v47 = vcombine.low %v9736_v50, %v9731_v41  ;;  %v7063_v17 = vpack.i.bf16 %v2975_v42, %v2585_v48  ;;  %v1826_v9 = vcombine.high %v9332_v46, %v9646_v39  ;;  %v2926_v20 = vcombine.high %v12401_v3, %v9425_v43  ;;  %v12556_v3 = vld [vmem:[#allocation44_spill] sm:$0xff] }
 0x3c8   : > { %v9761_v63 = vrot.slane %v4063_v33, %v8447_v49  ;;  %v2568_v40 = vcombine.high %v9568_v5, %v9583_v29  ;;  %v1938_v22 = vrot.slane %v1924_v14, %v8447_v49  ;;  %v12470_v11 = vcombine.high %v12468_v1, %v12469_v32 }
 0x3c9   : > { %v9766_v13 = vrot.slane %v4095_v47, %v8447_v49  ;;  %v1571_v46 = vcombine.low %v1532_v37, %v1564_v30  ;;  %v1906_v43 = vrot.slane %v1892_v7, %v8447_v49  ;;  %v2536_v5 = vcombine.high %v9119_v24, %v9376_v57  ;;  %v12472_v24 = vld [vmem:[#allocation66_spill] sm:$0xff]  ;;  %v12473_v57 = vld [vmem:[#allocation91_spill] sm:$0xff] }
 0x3ca   : > { %7064 = vrot.lane.b32.xlu1 %v7063_v17, %s7740_s28  ;;  %v7123_v39 = vpack.i.bf16 %v12470_v11, %v1956_v59  ;;  %v2972_v29 = vrot.slane %v2958_v31, %v8447_v49  ;;  %v12471_v33 = vcombine.high %v12458_v23, %v12459_v21  ;;  %v2978_v28 = vcombine.high %v9666_v12, %v9679_v26  ;;  %v12475_v59 = vld [vmem:[#allocation16_spill] sm:$0xff]  ;;  %v12476_v31 = vld [vmem:[#allocation14_spill] sm:$0xff]  ;;  %v12477_v26 = vld [vmem:[#allocation19_spill] sm:$0xff] }
 0x3cb   : > { %v2940_v48 = vrot.slane %v2926_v20, %v8447_v49  ;;  %v2582_v7 = vrot.slane %v2568_v40, %v8447_v49  ;;  %v1860_v42 = vcombine.high %v9022_v60, %v9387_v0  ;;  %v12474_v44 = vcombine.low %v12472_v24, %v12473_v57  ;;  %v12478_v17 = vld [vmem:[#allocation17_spill] sm:$0xff] }
 0x3cc   : > { %7124 = vrot.lane.b32.xlu0 %v7123_v39, %s7739_s27  ;;  %v7068_v14 = vpack.i.bf16 %v12471_v33, %v1826_v9  ;;  %v2588_v21 = vcombine.high %v9477_v4, %v9669_v15  ;;  %v1957_v23 = vcombine.low %v1906_v43, %v1938_v22  ;;  %v1828_v12 = vcombine.high %v12476_v31, %v12475_v59  ;;  %v12479_v4 = vld [vmem:[#allocation67_spill] sm:$0xff]  ;;  %v12480_v15 = vld [vmem:[#allocation92_spill] sm:$0xff] }
 0x3cd   : > { %v7128_v47 = vpack.i.bf16 %v1571_v46, %v12474_v44  ;;  %v1844_v9 = vcombine.high %v12478_v17, %v12477_v26  ;;  %v2550_v20 = vrot.slane %v2536_v5, %v8447_v49  ;;  %v1876_v60 = vcombine.high %v9012_v34, %v9300_v16 }
 0x3ce   : > { %7069 = vrot.lane.b32.xlu1 %v7068_v14, %s7744_s12  ;;  %v7083_v0 = vpack.i.bf16 %v2978_v28, %v2588_v21  ;;  %v2979_v40 = vcombine.low %v2940_v48, %v2972_v29  ;;  %v9804_v11 = vrot.slane %v1860_v42, %v8177_v6  ;;  %v12481_v39 = vcombine.low %v12479_v4, %v12480_v15  ;;  %v12482_v28 = vld [vmem:[#allocation127_spill] sm:$0xff] }
 0x3cf   : > { %v2589_v33 = vcombine.low %v2550_v20, %v2582_v7  ;;  %v1572_v14 = vcombine.high %v1532_v37, %v1564_v30  ;;  %v9811_v5 = vrot.slane %v1828_v12, %v8177_v6  ;;  %v9814_v34 = vrot.slane %v1844_v9, %v8177_v6  ;;  %v12483_v21 = vld [vmem:[#allocation11_spill] sm:$0xff]  ;;  %v12487_v9 = vld [vmem:[#allocation34_spill] sm:$0xff] }
 0x3d0   : > { %7129 = vrot.lane.b32.xlu0 %v7128_v47, %s7741_s29  ;;  %v7133_v46 = vpack.i.bf16 %v12481_v39, %v1957_v23  ;;  %v9817_v16 = vrot.slane %v1876_v60, %v8177_v6  ;;  %v1534_v42 = vcombine.high %v12482_v28, %v9390_v55  ;;  %v2980_v47 = vcombine.high %v2940_v48, %v2972_v29  ;;  %v12484_v23 = vld [vmem:[#allocation12_spill] sm:$0xff]  ;;  %v12486_v48 = vld [vmem:[#allocation129_spill] sm:$0xff]  ;;  %v12490_v39 = vld [vmem:[#allocation15_spill] sm:$0xff] }
 0x3d1   : > { %v7088_v44 = vpack.i.bf16 %v2979_v40, %v2589_v33  ;;  %v1502_v59 = vcombine.high %v12484_v23, %v12483_v21  ;;  %v12485_v37 = vcombine.high %v12472_v24, %v12473_v57  ;;  %v2590_v12 = vcombine.high %v2550_v20, %v2582_v7  ;;  %v12489_v20 = vld [vmem:[#allocation125_spill] sm:$0xff]  ;;  %v12495_v21 = vld [vmem:[#allocation18_spill] sm:$0xff] }
 0x3d2   : > { %7084 = vrot.lane.b32.xlu1 %v7083_v0, %s7738_s26  ;;  %v1940_v30 = vcombine.high %v9804_v11, %v9817_v16  ;;  %v1958_v26 = vcombine.high %v1906_v43, %v1938_v22  ;;  %v1908_v55 = vcombine.high %v9811_v5, %v9814_v34  ;;  %v1548_v17 = vrot.slane %v1534_v42, %v8447_v49 }
 0x3d3   : > { %v7138_v31 = vpack.i.bf16 %v1572_v14, %v12485_v37  ;;  %v7093_v29 = vpack.i.bf16 %v2980_v47, %v2590_v12  ;;  %v1566_v60 = vcombine.high %v12487_v9, %v12486_v48  ;;  %v1516_v0 = vrot.slane %v1502_v59, %v8447_v49  ;;  %v12492_v14 = vld [vmem:[#allocation93_spill] sm:$0xff] }
 0x3d4   : > { %7134 = vrot.lane.b32.xlu0 %v7133_v46, %s7740_s28  ;;  %v9838_v40 = vrot.slane %v1940_v30, %v8447_v49  ;;  %v3078_v7 = vcombine.high %v9559_v62, %v9552_v38  ;;  %v12488_v22 = vcombine.high %v12479_v4, %v12480_v15  ;;  %v3110_v24 = vcombine.high %v9466_v56, %v9600_v35  ;;  %v12491_v62 = vld [vmem:[#allocation69_spill] sm:$0xff] }
 0x3d5   : > { %v1922_v57 = vrot.slane %v1908_v55, %v8447_v49  ;;  %v3046_v46 = vcombine.high %v12490_v39, %v12489_v20  ;;  %v1549_v33 = vcombine.low %v9651_v61, %v9676_v10  ;;  %v2688_v38 = vcombine.high %v9516_v45, %v9506_v19  ;;  %v12494_v47 = vld [vmem:[#allocation117_spill] sm:$0xff]  ;;  %v12503_v39 = vld [vmem:[#allocation28_spill] sm:$0xff] }
 0x3d6   : > { %7089 = vrot.lane.b32.xlu1 %v7088_v44, %s7741_s29  ;;  %v7143_v43 = vpack.i.bf16 %v12488_v22, %v1958_v26  ;;  %v12493_v4 = vcombine.high %v12491_v62, %v12492_v14  ;;  %v2720_v28 = vcombine.high %v9365_v51, %v9555_v53  ;;  %v1567_v42 = vcombine.low %v1516_v0, %v1548_v17  ;;  %v12501_v22 = vld [vmem:[#allocation95_spill] sm:$0xff] }
 0x3d7   : > { %v1517_v44 = vcombine.low %v12463_v36, %v12462_v27  ;;  %v2656_v23 = vcombine.high %v12495_v21, %v12494_v47  ;;  %v9866_v61 = vrot.slane %v3078_v7, %v8447_v49  ;;  %v1961_v45 = vcombine.low %v1922_v57, %v9838_v40  ;;  %v12496_v36 = vld [vmem:[#allocation70_spill] sm:$0xff]  ;;  %v12500_v7 = vld [vmem:[#allocation71_spill] sm:$0xff] }
 0x3d8   : > { %7139 = vrot.lane.b32.xlu0 %v7138_v31, %s7744_s12  ;;  %v7098_v15 = vpack.i.bf16 %v1566_v60, %v12493_v4  ;;  %v7158_v19 = vpack.i.bf16 %v3110_v24, %v2720_v28  ;;  %v3060_v10 = vrot.slane %v3046_v46, %v8447_v49  ;;  %v1557_v59 = vrot.slane %v1549_v33, %v8447_v49  ;;  %v12497_v27 = vld [vmem:[#allocation94_spill] sm:$0xff] }
 0x3d9   : > { %v2702_v30 = vrot.slane %v2688_v38, %v8447_v49  ;;  %v12498_v37 = vcombine.low %v12496_v36, %v12497_v27  ;;  %v1568_v12 = vcombine.high %v1516_v0, %v1548_v17  ;;  %v1525_v26 = vrot.slane %v1517_v44, %v8447_v49  ;;  %v12504_v46 = vld [vmem:[#allocation26_spill] sm:$0xff]  ;;  %v12505_v38 = vld [vmem:[#allocation31_spill] sm:$0xff]  ;;  %v12506_v17 = vld [vmem:[#allocation29_spill] sm:$0xff] }
 0x3da   : > { %7094 = vrot.lane.b32.xlu1 %v7093_v29, %s7744_s12  ;;  %v2670_v55 = vrot.slane %v2656_v23, %v8447_v49  ;;  %v12499_v29 = vld [vmem:[#allocation109_spill] sm:$0xff]  ;;  %v3111_v20 = vcombine.low %v3060_v10, %v9866_v61  ;;  %v2982_v33 = vcombine.high %v12504_v46, %v12503_v39  ;;  %v2998_v0 = vcombine.high %v12506_v17, %v12505_v38  ;;  %v12507_v4 = vld [vmem:[#allocation126_spill] sm:$0xff]  ;;  %v12516_v38 = vld [vmem:[#allocation124_spill] sm:$0xff] }
 0x3db   : > { %v7103_v31 = vpack.i.bf16 %v1567_v42, %v12498_v37  ;;  %v3014_v60 = vcombine.high %v12499_v29, %v9499_v58  ;;  %v12509_v42 = vld [vmem:[#allocation86_spill] sm:$0xff]  ;;  %v12510_v44 = vld [vmem:[#allocation81_spill] sm:$0xff]  ;;  %v1939_v47 = vcombine.low %v9804_v11, %v9817_v16  ;;  %v12511_v21 = vcombine.high %v12496_v36, %v12497_v27  ;;  %v12512_v37 = vld [vmem:[#allocation24_spill] sm:$0xff] }
 0x3dc   : > { %7144 = vrot.lane.b32.xlu0 %v7143_v43, %s7742_s30  ;;  %v12502_v43 = vcombine.low %v12500_v7, %v12501_v22  ;;  %v2624_v58 = vcombine.high %v12510_v44, %v12509_v42  ;;  %v12515_v39 = vld [vmem:[#allocation25_spill] sm:$0xff]  ;;  %v12517_v17 = vld [vmem:[#allocation60_spill] sm:$0xff]  ;;  %v1907_v11 = vcombine.low %v9811_v5, %v9814_v34  ;;  %v1962_v27 = vcombine.high %v1922_v57, %v9838_v40 }
 0x3dd   : > { %v7108_v23 = vpack.i.bf16 %v1568_v12, %v12511_v21  ;;  %v3028_v16 = vrot.slane %v3014_v60, %v8177_v6  ;;  %v2996_v12 = vrot.slane %v2982_v33, %v8177_v6  ;;  %v1947_v44 = vrot.slane %v1939_v47, %v8447_v49  ;;  %v12518_v5 = vld [vmem:[#allocation73_spill] sm:$0xff]  ;;  %v12519_v34 = vld [vmem:[#allocation96_spill] sm:$0xff] }
 0x3de   : > { %7099 = vrot.lane.b32.xlu1 %v7098_v15, %s7739_s27  ;;  %v7163_v24 = vpack.i.bf16 %v12502_v43, %v1961_v45  ;;  %v12508_v15 = vld [vmem:[#allocation79_spill] sm:$0xff]  ;;  %v1569_v45 = vcombine.low %v1525_v26, %v1557_v59  ;;  %v12520_v60 = vcombine.low %v12518_v5, %v12519_v34  ;;  %v1915_v33 = vrot.slane %v1907_v11, %v8447_v49 }
 0x3df   : > { %v3030_v28 = vcombine.high %v12508_v15, %v12507_v4  ;;  %v12514_v43 = vld [vmem:[#allocation27_spill] sm:$0xff]  ;;  %v2640_v4 = vcombine.high %v12517_v17, %v12516_v38  ;;  %v2638_v15 = vrot.slane %v2624_v58, %v8177_v6  ;;  %v3112_v47 = vcombine.high %v3060_v10, %v9866_v61  ;;  %v12524_v10 = vld [vmem:[#allocation121_spill] sm:$0xff] }
 0x3e0   : > { %7159 = vrot.lane.b32.xlu0 %v7158_v19, %s7739_s27  ;;  %v2721_v19 = vcombine.low %v2670_v55, %v2702_v30  ;;  %v2608_v46 = vcombine.high %v12515_v39, %v12514_v43  ;;  %v7113_v21 = vpack.i.bf16 %v1569_v45, %v12520_v60  ;;  %v7687_v43 = vld [vmem:[#allocation2 + $0xa] sm:$0xff]  ;;  %v7688_v39 = vld [vmem:[#allocation2 + $0x3a] sm:$0xff] }
 0x3e1   : > { %v3044_v42 = vrot.slane %v3030_v28, %v8177_v6  ;;  %v2654_v57 = vrot.slane %v2640_v4, %v8177_v6  ;;  %v12521_v28 = vcombine.high %v12500_v7, %v12501_v22  ;;  %v12523_v61 = vld [vmem:[#allocation59_spill] sm:$0xff] }
 0x3e2   : > { %7104 = vrot.lane.b32.xlu1 %v7103_v31, %s7740_s28  ;;  %v12513_v31 = vld [vmem:[#allocation22_spill] sm:$0xff]  ;;  %v7168_v36 = vpack.i.bf16 %v3111_v20, %v2721_v19  ;;  %v2622_v40 = vrot.slane %v2608_v46, %v8177_v6  ;;  %v3340_v46 = vcombine.high %v7687_v43, %v7688_v39  ;;  %v3842_v4 = vcombine.high %v12524_v10, %v12523_v61 }
 0x3e3   : > { %v2592_v29 = vcombine.high %v12513_v31, %v12512_v37  ;;  %v7173_v58 = vpack.i.bf16 %v12521_v28, %v1962_v27  ;;  %v2704_v45 = vcombine.high %v2638_v15, %v2654_v57  ;;  %v2722_v31 = vcombine.high %v2670_v55, %v2702_v30  ;;  %v12537_v43 = vld [vmem:[#allocation38_spill] sm:$0xff] }
 0x3e4   : > { %7164 = vrot.lane.b32.xlu0 %v7163_v24, %s7741_s29  ;;  %v3012_v24 = vrot.slane %v2998_v0, %v8177_v6  ;;  %v3094_v0 = vcombine.high %v3028_v16, %v3044_v42  ;;  %v2703_v7 = vcombine.low %v2638_v15, %v2654_v57  ;;  %v12530_v15 = vld [vmem:[#allocation105_spill] sm:$0xff]  ;;  %v9957_v28 = vrot.slane %v3340_v46, %v8177_v6 }
 0x3e5   : > { %v2606_v20 = vrot.slane %v2592_v29, %v8177_v6  ;;  %v1959_v29 = vcombine.low %v1915_v33, %v1947_v44  ;;  %v7178_v11 = vpack.i.bf16 %v3112_v47, %v2722_v31  ;;  %v9949_v60 = vrot.slane %v2704_v45, %v8447_v49  ;;  %v12532_v57 = vld [vmem:[#allocation97_spill] sm:$0xff]  ;;  %v12535_v47 = vld [vmem:[#allocation55_spill] sm:$0xff] }
 0x3e6   : > { %7109 = vrot.lane.b32.xlu1 %v7108_v23, %s7742_s30  ;;  %v1570_v23 = vcombine.high %v1525_v26, %v1557_v59  ;;  %v3062_v19 = vcombine.high %v2996_v12, %v3012_v24  ;;  %v3093_v59 = vcombine.low %v3028_v16, %v3044_v42  ;;  %v12522_v26 = vcombine.high %v12518_v5, %v12519_v34  ;;  %v12525_v16 = vld [vmem:[#allocation63_spill] sm:$0xff]  ;;  %v12527_v42 = vld [vmem:[#allocation128_spill] sm:$0xff] }
 0x3e7   : > { %v2672_v38 = vcombine.high %v2606_v20, %v2622_v40  ;;  %v3061_v17 = vcombine.low %v2996_v12, %v3012_v24  ;;  %v9934_v22 = vrot.slane %v3094_v0, %v8447_v49  ;;  %v2671_v30 = vcombine.low %v2606_v20, %v2622_v40  ;;  %v12528_v5 = vld [vmem:[#allocation32_spill] sm:$0xff] }
 0x3e8   : > { %7169 = vrot.lane.b32.xlu0 %v7168_v36, %s7740_s28  ;;  %v7118_v37 = vpack.i.bf16 %v1570_v23, %v12522_v26  ;;  %v12526_v36 = vld [vmem:[#allocation87_spill] sm:$0xff]  ;;  %v9942_v55 = vrot.slane %v3062_v19, %v8447_v49  ;;  %v3810_v12 = vcombine.high %v12528_v5, %v12527_v42  ;;  %v12529_v24 = vld [vmem:[#allocation104_spill] sm:$0xff]  ;;  %v1960_v40 = vcombine.high %v1915_v33, %v1947_v44 }
 0x3e9   : > { %v3874_v27 = vcombine.high %v12526_v36, %v12525_v16  ;;  %v3468_v34 = vcombine.high %v12530_v15, %v12529_v24  ;;  %v12531_v23 = vld [vmem:[#allocation75_spill] sm:$0xff]  ;;  %v2686_v26 = vrot.slane %v2672_v38, %v8447_v49  ;;  %v3069_v45 = vrot.slane %v3061_v17, %v8447_v49  ;;  %v12538_v38 = vld [vmem:[#allocation76_spill] sm:$0xff] }
 0x3ea   : > { %7114 = vrot.lane.b32.xlu1 %v7113_v21, %s7743_s11  ;;  %v3101_v21 = vrot.slane %v3093_v59, %v8447_v49  ;;  %v12533_v0 = vcombine.low %v12531_v23, %v12532_v57  ;;  %v9965_v59 = vrot.slane %v3842_v4, %v8447_v49  ;;  %v3115_v44 = vcombine.low %v9942_v55, %v9934_v22  ;;  %v12539_v17 = vld [vmem:[#allocation111_spill] sm:$0xff] }
 0x3eb   : > { %v7193_v31 = vpack.i.bf16 %v3874_v27, %v3468_v34  ;;  %v2679_v33 = vrot.slane %v2671_v30, %v8447_v49  ;;  %v9974_v46 = vrot.slane %v3810_v12, %v8447_v49  ;;  %v12540_v61 = vcombine.high %v12531_v23, %v12532_v57  ;;  %v12541_v27 = vld [vmem:[#allocation82_spill] sm:$0xff]  ;;  %v7690_v12 = vld [vmem:[#allocation2 + $0x52] sm:$0xff]  ;;  %v12548_v57 = vld [vmem:[#allocation39_spill] sm:$0xff] }
 0x3ec   : > { %7174 = vrot.lane.b32.xlu0 %v7173_v58, %s7744_s12  ;;  %v7148_v20 = vpack.i.bf16 %v12533_v0, %v1959_v29  ;;  %v12534_v58 = vld [vmem:[#allocation56_spill] sm:$0xff]  ;;  %v2725_v4 = vcombine.low %v2686_v26, %v9949_v60  ;;  %v12542_v30 = vld [vmem:[#allocation74_spill] sm:$0xff] }
 0x3ed   : > { %v3404_v19 = vcombine.high %v12535_v47, %v12534_v58  ;;  %v12536_v29 = vld [vmem:[#allocation40_spill] sm:$0xff]  ;;  %v7153_v10 = vpack.i.bf16 %v12540_v61, %v1960_v40  ;;  %v12543_v42 = vcombine.high %v12541_v27, %v12542_v30  ;;  %v7689_v34 = vld [vmem:[#allocation2 + $0x22] sm:$0xff]  ;;  %v12545_v58 = vld [vmem:[#allocation41_spill] sm:$0xff]  ;;  %v3875_v27 = vcombine.low %v9974_v46, %v9965_v59 }
 0x3ee   : > { %7119 = vrot.lane.b32.xlu1 %v7118_v37, %s7738_s26  ;;  %v2711_v37 = vrot.slane %v2703_v7, %v8447_v49  ;;  %v3746_v39 = vcombine.high %v12537_v43, %v12536_v29  ;;  %v3778_v7 = vcombine.high %v12539_v17, %v12538_v38  ;;  %v3356_v0 = vcombine.high %v7689_v34, %v7690_v12  ;;  %v12546_v29 = vld [vmem:[#allocation61_spill] sm:$0xff]  ;;  %v12549_v40 = vld [vmem:[#allocation7_spill] sm:$0xff] }
 0x3ef   : > { %v3450_v5 = vrot.slane %v12543_v42, %v8447_v49  ;;  %v3418_v23 = vrot.slane %v3404_v19, %v8447_v49  ;;  %v3642_v38 = vcombine.high %v12549_v40, %v12548_v57  ;;  %v7198_v17 = vpack.i.bf16 %v3115_v44, %v2725_v4  ;;  %v12550_v42 = vld [vmem:[#allocation47_spill] sm:$0xff]  ;;  %v12551_v34 = vld [vmem:[#allocation45_spill] sm:$0xff] }
 0x3f0   : > { %7179 = vrot.lane.b32.xlu0 %v7178_v11, %s7742_s30  ;;  %v3113_v11 = vcombine.low %v3069_v45, %v3101_v21  ;;  %v2723_v61 = vcombine.low %v2679_v33, %v2711_v37  ;;  %v9998_v30 = vrot.slane %v3746_v39, %v8177_v6  ;;  %v3626_v12 = vcombine.high %v12551_v34, %v12550_v42  ;;  %v12555_v57 = vld [vmem:[#allocation131_spill] sm:$0xff]  ;;  %v12557_v39 = vld [vmem:[#allocation42_spill] sm:$0xff]  ;;  %v12558_v42 = vld [vmem:[#allocation13_spill] sm:$0xff] }
 0x3f1   : > { %v10005_v19 = vrot.slane %v3778_v7, %v8177_v6  ;;  %v3469_v4 = vcombine.low %v3418_v23, %v3450_v5  ;;  %v3114_v40 = vcombine.high %v3069_v45, %v3101_v21  ;;  %v3610_v52 = vcombine.high %v12557_v39, %v12556_v3  ;;  %v12559_v34 = vld [vmem:[#allocation30_spill] sm:$0xff] }
 0x3f2   : > { %7149 = vrot.lane.b32.xlu1 %v7148_v20, %s7743_s11  ;;  %v12544_v20 = vld [vmem:[#allocation43_spill] sm:$0xff]  ;;  %v7183_v44 = vpack.i.bf16 %v3113_v11, %v2723_v61  ;;  %v3674_v36 = vcombine.high %v12559_v34, %v12558_v42  ;;  %v10019_v7 = vrot.slane %v3642_v38, %v8177_v6  ;;  %v2724_v11 = vcombine.high %v2679_v33, %v2711_v37  ;;  %v12564_v39 = vld [vmem:[#allocation46_spill] sm:$0xff]  ;;  %v12565_v42 = vld [vmem:[#allocation52_spill] sm:$0xff] }
 0x3f3   : > { %v3762_v47 = vcombine.high %v12545_v58, %v12544_v20  ;;  %v12552_v20 = vld [vmem:[#allocation62_spill] sm:$0xff]  ;;  %v12553_v58 = vld [vmem:[#allocation108_spill] sm:$0xff]  ;;  %v3116_v21 = vcombine.high %v9942_v55, %v9934_v22  ;;  %v3370_v3 = vrot.slane %v3356_v0, %v8177_v6  ;;  %v10026_v45 = vrot.slane %v3626_v12, %v8177_v6 }
 0x3f4   : > { %7194 = vrot.lane.b32.xlu0 %v7193_v31, %s7739_s27  ;;  %v12547_v31 = vld [vmem:[#allocation80_spill] sm:$0xff]  ;;  %v7188_v61 = vpack.i.bf16 %v3114_v40, %v2724_v11  ;;  %v2726_v37 = vcombine.high %v2686_v26, %v9949_v60  ;;  %v3738_v22 = vcombine.high %v9725_v54, %v9728_v8  ;;  %v10039_v55 = vrot.slane %v3610_v52, %v8177_v6  ;;  %v12563_v40 = vld [vmem:[#allocation50_spill] sm:$0xff] }
 0x3f5   : > { %v3794_v43 = vcombine.high %v12547_v31, %v12546_v29  ;;  %v3658_v29 = vcombine.high %v12553_v58, %v12552_v20  ;;  %v12554_v31 = vld [vmem:[#allocation130_spill] sm:$0xff]  ;;  %v3776_v16 = vrot.slane %v3762_v47, %v8177_v6  ;;  %v3688_v0 = vrot.slane %v3674_v36, %v8447_v49  ;;  %v12561_v36 = vld [vmem:[#allocation99_spill] sm:$0xff]  ;;  %v12566_v34 = vld [vmem:[#allocation48_spill] sm:$0xff] }
 0x3f6   : > { %7154 = vrot.lane.b32.xlu1 %v7153_v10, %s7738_s26  ;;  %v3706_v10 = vcombine.high %v12555_v57, %v12554_v31  ;;  %v7213_v12 = vpack.i.bf16 %v3116_v21, %v2726_v37  ;;  %v3876_v58 = vcombine.high %v9974_v46, %v9965_v59  ;;  %v3419_v60 = vcombine.low %v9957_v28, %v3370_v3 }
 0x3f7   : > { %v10016_v20 = vrot.slane %v3794_v43, %v8177_v6  ;;  %v10029_v47 = vrot.slane %v3658_v29, %v8177_v6  ;;  %v3825_v33 = vcombine.low %v9998_v30, %v3776_v16  ;;  %v3689_v26 = vcombine.low %v10039_v55, %v10026_v45  ;;  %v12560_v29 = vld [vmem:[#allocation98_spill] sm:$0xff] }
 0x3f8   : > { %7199 = vrot.lane.b32.xlu0 %v7198_v17, %s7741_s29  ;;  %v7208_v17 = vpack.i.bf16 %v3875_v27, %v3469_v4  ;;  %v3720_v38 = vrot.slane %v3706_v10, %v8447_v49  ;;  %v12562_v31 = vcombine.high %v12560_v29, %v12561_v36  ;;  %v3470_v10 = vcombine.high %v3418_v23, %v3450_v5  ;;  %v12567_v5 = vld [vmem:[#allocation83_spill] sm:$0xff]  ;;  %v12568_v23 = vld [vmem:[#allocation77_spill] sm:$0xff] }
 0x3f9   : > { %v3857_v43 = vcombine.low %v10005_v19, %v10016_v20  ;;  %v3721_v27 = vcombine.low %v10019_v7, %v10029_v47  ;;  %v3420_v4 = vcombine.high %v9957_v28, %v3370_v3  ;;  %v4000_v59 = vcombine.high %v12564_v39, %v12563_v40  ;;  %v12575_v40 = vld [vmem:[#allocation132_spill] sm:$0xff] }
 0x3fa   : > { %7184 = vrot.lane.b32.xlu1 %v7183_v44, %s7743_s11  ;;  %v7203_v57 = vpack.i.bf16 %v3738_v22, %v12562_v31  ;;  %v3739_v44 = vcombine.low %v3688_v0, %v3720_v38  ;;  %v3833_v46 = vrot.slane %v3825_v33, %v8447_v49  ;;  %v7223_v21 = vpack.i.bf16 %v3876_v58, %v3470_v10  ;;  %v12570_v22 = vld [vmem:[#allocation100_spill] sm:$0xff]  ;;  %v12571_v33 = vld [vmem:[#allocation101_spill] sm:$0xff] }
 0x3fb   : > { %v3865_v52 = vrot.slane %v3857_v43, %v8447_v49  ;;  %v10063_v11 = vrot.slane %v3721_v27, %v8447_v49  ;;  %v3740_v43 = vcombine.high %v3688_v0, %v3720_v38  ;;  %v3826_v3 = vcombine.high %v9998_v30, %v3776_v16  ;;  %v12576_v39 = vld [vmem:[#allocation20_spill] sm:$0xff] }
 0x3fc   : > { %7209 = vrot.lane.b32.xlu0 %v7208_v17, %s7740_s28  ;;  %v4016_v17 = vcombine.high %v12566_v34, %v12565_v42  ;;  %v3697_v37 = vrot.slane %v3689_v26, %v8447_v49  ;;  %v3427_v31 = vrot.slane %v3419_v60, %v8447_v49  ;;  %v10078_v38 = vrot.slane %v4000_v59, %v8177_v6  ;;  %v12577_v42 = vld [vmem:[#allocation54_spill] sm:$0xff]  ;;  %v12578_v34 = vld [vmem:[#allocation51_spill] sm:$0xff] }
 0x3fd   : > { %v3858_v0 = vcombine.high %v10005_v19, %v10016_v20  ;;  %v10083_v58 = vrot.slane %v3420_v4, %v8447_v49  ;;  %v12573_v30 = vcombine.high %v12570_v22, %v12571_v33  ;;  %v12574_v19 = vld [vmem:[#allocation23_spill] sm:$0xff]  ;;  %v3690_v4 = vcombine.high %v10039_v55, %v10026_v45  ;;  %v12581_v45 = vld [vmem:[#allocation116_spill] sm:$0xff] }
 0x3fe   : > { %7189 = vrot.lane.b32.xlu1 %v7188_v61, %s7738_s26  ;;  %v12569_v61 = vcombine.low %v12567_v5, %v12568_v23  ;;  %v10086_v16 = vrot.slane %v4016_v17, %v8177_v6  ;;  %v3741_v10 = vcombine.low %v3697_v37, %v10063_v11  ;;  %v4064_v20 = vcombine.high %v12574_v19, %v12464_v2  ;;  %v12582_v55 = vld [vmem:[#allocation8_spill] sm:$0xff] }
 0x3ff   : > { %v7228_v26 = vpack.i.bf16 %v3740_v43, %v12573_v30  ;;  %v4032_v59 = vcombine.high %v12576_v39, %v12575_v40  ;;  %v4152_v17 = vcombine.high %v12578_v34, %v12577_v42  ;;  %v10110_v2 = vrot.slane %v3858_v0, %v8447_v49  ;;  %v12583_v30 = vld [vmem:[#allocation68_spill] sm:$0xff] }
 0x400   : > { %7214 = vrot.lane.b32.xlu0 %v7213_v12, %s7744_s12  ;;  %v3459_v28 = vrot.slane %v12569_v61, %v8447_v49  ;;  %v12572_v12 = vcombine.low %v12570_v22, %v12571_v33  ;;  %v3878_v61 = vcombine.high %v3833_v46, %v3865_v52  ;;  %v12580_v22 = vld [vmem:[#allocation78_spill] sm:$0xff]  ;;  %v12584_v19 = vld [vmem:[#allocation88_spill] sm:$0xff]  ;;  %v4128_v0 = vcombine.high %v9761_v63, %v9766_v13 }
 0x401   : > { %v4232_v40 = vcombine.high %v12584_v19, %v12583_v30  ;;  %v12590_v42 = vld [vmem:[#allocation72_spill] sm:$0xff]  ;;  %v4046_v34 = vrot.slane %v4032_v59, %v8177_v6  ;;  %v4078_v30 = vrot.slane %v4064_v20, %v8447_v49  ;;  %v12595_v19 = vld [vmem:[#allocation53_spill] sm:$0xff] }
 0x402   : > { %7204 = vrot.lane.b32.xlu1 %v7203_v57, %s7739_s27  ;;  %v7218_v27 = vpack.i.bf16 %v3739_v44, %v12572_v12  ;;  %v3877_v57 = vcombine.low %v3833_v46, %v3865_v52  ;;  %v3471_v60 = vcombine.low %v3427_v31, %v3459_v28  ;;  %v10094_v44 = vrot.slane %v3826_v3, %v8447_v49  ;;  %v12579_v3 = vld [vmem:[#allocation120_spill] sm:$0xff]  ;;  %v12586_v52 = vld [vmem:[#allocation102_spill] sm:$0xff] }
 0x403   : > { %v4048_v33 = vcombine.high %v12580_v22, %v12579_v3  ;;  %v4168_v12 = vcombine.high %v12582_v55, %v12581_v45  ;;  %v12593_v3 = vld [vmem:[#allocation134_spill] sm:$0xff]  ;;  %v12594_v22 = vld [vmem:[#allocation133_spill] sm:$0xff]  ;;  %v3742_v55 = vcombine.high %v3697_v37, %v10063_v11  ;;  %v3704_v11 = vrot.slane %v3690_v4, %v8447_v49 }
 0x404   : > { %7224 = vrot.lane.b32.xlu0 %v7223_v21, %s7742_s30  ;;  %v4096_v21 = vcombine.high %v9736_v50, %v9731_v41  ;;  %v7233_v43 = vpack.i.bf16 %v3877_v57, %v3471_v60  ;;  %v3722_v50 = vcombine.high %v10019_v7, %v10029_v47  ;;  %v12585_v41 = vld [vmem:[#allocation103_spill] sm:$0xff]  ;;  %v12592_v7 = vcombine.high %v12567_v5, %v12568_v23 }
 0x405   : > { %v12587_v46 = vcombine.low %v12585_v41, %v12586_v52  ;;  %v12589_v60 = vld [vmem:[#allocation35_spill] sm:$0xff]  ;;  %v4264_v45 = vcombine.high %v12594_v22, %v12593_v3  ;;  %v4182_v5 = vrot.slane %v4168_v12, %v8177_v6  ;;  %v4246_v23 = vrot.slane %v4232_v40, %v8447_v49 }
 0x406   : > { %7219 = vrot.lane.b32.xlu1 %v7218_v27, %s7740_s28  ;;  %v3472_v27 = vcombine.high %v3427_v31, %v3459_v28  ;;  %v12591_v28 = vld [vmem:[#allocation110_spill] sm:$0xff]  ;;  %v3466_v47 = vrot.slane %v12592_v7, %v8447_v49  ;;  %v4166_v37 = vrot.slane %v4152_v17, %v8177_v6  ;;  %v12597_v40 = vcombine.high %v12585_v41, %v12586_v52 }
 0x407   : > { %v7238_v57 = vpack.i.bf16 %v3741_v10, %v12587_v46  ;;  %v4184_v31 = vcombine.high %v12591_v28, %v12590_v42  ;;  %v12596_v46 = vld [vmem:[#allocation49_spill] sm:$0xff]  ;;  %v3880_v52 = vcombine.high %v10094_v44, %v10110_v2 }
 0x408   : > { %7229 = vrot.lane.b32.xlu0 %v7228_v26, %s7742_s30  ;;  %v12588_v26 = vld [vmem:[#allocation37_spill] sm:$0xff]  ;;  %v7243_v10 = vpack.i.bf16 %v3878_v61, %v3472_v27  ;;  %v4136_v59 = vcombine.high %v12596_v46, %v12595_v19  ;;  %v7248_v61 = vpack.i.bf16 %v4264_v45, %v4128_v0  ;;  %v3879_v27 = vcombine.low %v10094_v44, %v10110_v2 }
 0x409   : > { %v4200_v39 = vcombine.high %v12589_v60, %v12588_v26  ;;  %v4062_v26 = vrot.slane %v4048_v33, %v8177_v6  ;;  %v3473_v33 = vcombine.low %v10083_v58, %v3466_v47  ;;  %v4198_v12 = vrot.slane %v4184_v31, %v8177_v6 }
 0x40a   : > { %7234 = vrot.lane.b32.xlu1 %v7233_v43, %s7743_s11  ;;  %v4110_v43 = vrot.slane %v4096_v21, %v8447_v49  ;;  %v3736_v21 = vrot.slane %v3722_v50, %v8447_v49  ;;  %v7253_v50 = vpack.i.bf16 %v3742_v55, %v12597_v40  ;;  %v4079_v60 = vcombine.low %v10078_v38, %v10086_v16 }
 0x40b   : > { %v4214_v20 = vrot.slane %v4200_v39, %v8447_v49  ;;  %v4150_v4 = vrot.slane %v4136_v59, %v8177_v6  ;;  %v4247_v17 = vcombine.low %v4182_v5, %v4198_v12  ;;  %v7258_v39 = vpack.i.bf16 %v3879_v27, %v3473_v33 }
 0x40c   : > { %7239 = vrot.lane.b32.xlu0 %v7238_v57, %s7743_s11  ;;  %v4111_v57 = vcombine.low %v4046_v34, %v4062_v26  ;;  %v4129_v0 = vcombine.low %v4078_v30, %v4110_v43  ;;  %v3743_v28 = vcombine.low %v3704_v11, %v3736_v21  ;;  %v4080_v19 = vcombine.high %v10078_v38, %v10086_v16 }
 0x40d   : > { %v4265_v42 = vcombine.low %v4214_v20, %v4246_v23  ;;  %v4215_v7 = vcombine.low %v4150_v4, %v4166_v37  ;;  %v4087_v46 = vrot.slane %v4079_v60, %v8447_v49  ;;  %v4216_v59 = vcombine.high %v4150_v4, %v4166_v37 }
 0x40e   : > { %7244 = vrot.lane.b32.xlu1 %v7243_v10, %s7738_s26  ;;  %v4112_v10 = vcombine.high %v4046_v34, %v4062_v26  ;;  %v4119_v45 = vrot.slane %v4111_v57, %v8447_v49  ;;  %v4255_v27 = vrot.slane %v4247_v17, %v8447_v49  ;;  %v12598_v34 = vld [vmem:[#allocation106_spill] sm:$0xff]  ;;  %v12599_v26 = vld [vmem:[#allocation107_spill] sm:$0xff]  ;;  %v3474_v40 = vcombine.high %v10083_v58, %v3466_v47 }
 0x40f   : > { %v10161_v31 = vpop.permute.xlu1 %7014  ;;  %v7263_v41 = vpack.i.bf16 %v4265_v42, %v4129_v0  ;;  %v12600_v33 = vcombine.low %v12598_v34, %v12599_v26  ;;  %v4223_v44 = vrot.slane %v4215_v7, %v8447_v49  ;;  %v3744_v37 = vcombine.high %v3704_v11, %v3736_v21 }
 0x410   : > { %7249 = vrot.lane.b32.xlu0 %v7248_v61, %s7739_s27  ;;  %v4248_v61 = vcombine.high %v4182_v5, %v4198_v12  ;;  %v10178_v2 = vrot.slane %v4112_v10, %v8447_v49  ;;  %v7273_v16 = vpack.i.bf16 %v3880_v52, %v3474_v40  ;;  %v4266_v5 = vcombine.high %v4214_v20, %v4246_v23  ;;  %v12605_v40 = vld [vmem:[#allocation57_spill] sm:$0xff] }
 0x411   : > { %v7268_v57 = vpack.i.bf16 %v3743_v28, %v12600_v33  ;;  %v4131_v12 = vcombine.low %v4087_v46, %v4119_v45  ;;  %v4094_v60 = vrot.slane %v4080_v19, %v8447_v49  ;;  %v4132_v58 = vcombine.high %v4087_v46, %v4119_v45 }
 0x412   : > { %7254 = vrot.lane.b32.xlu1 %v7253_v50, %s7738_s26  ;;  %v4130_v50 = vcombine.high %v4078_v30, %v4110_v43  ;;  %v4262_v4 = vrot.slane %v4248_v61, %v8447_v49  ;;  %v4230_v47 = vrot.slane %v4216_v59, %v8447_v49  ;;  %v4267_v30 = vcombine.low %v4223_v44, %v4255_v27 }
 0x413   : > { %v6995_v55 = vpop.permute.xlu0 %6994  ;;  %v4268_v17 = vcombine.high %v4223_v44, %v4255_v27  ;;  %v12601_v20 = vcombine.high %v12598_v34, %v12599_v26  ;;  %v4134_v59 = vcombine.high %v4094_v60, %v10178_v2  ;;  %v12602_v34 = vld [vmem:[#allocation33_spill] sm:$0xff]  ;;  %v12603_v26 = vld [vmem:[#allocation112_spill] sm:$0xff] }
 0x414   : > { %7259 = vrot.lane.b32.xlu0 %v7258_v39, %s7741_s29  ;;  %v7278_v43 = vpack.i.bf16 %v4266_v5, %v4130_v50  ;;  %v4133_v39 = vcombine.low %v4094_v60, %v10178_v2  ;;  %v6997_v21 = vunpack.i.h.bf16 %v6995_v55  ;;  %v6996_v11 = vunpack.i.l.bf16 %v6995_v55  ;;  %v12606_v50 = vld [vmem:[#allocation84_spill] sm:$0xff] }
 0x415   : > { %v7283_v42 = vpack.i.bf16 %v3744_v37, %v12601_v20  ;;  %v7288_v28 = vpack.i.bf16 %v4267_v30, %v4131_v12  ;;  %v4269_v52 = vcombine.low %v4230_v47, %v4262_v4  ;;  %v4270_v27 = vcombine.high %v4230_v47, %v4262_v4 }
 0x416   : > { %7264 = vrot.lane.b32.xlu1 %v7263_v41, %s7740_s28  ;;  %v10180_v38 = vpop.permute.xlu1 %7019  ;;  %v7293_v41 = vpack.i.bf16 %v4268_v17, %v4132_v58  ;;  %v12604_v33 = vcombine.low %v12602_v34, %v12603_v26  ;;  %v12607_v44 = vcombine.low %v12605_v40, %v12606_v50  ;;  %v7745_v2 = vmov 0  }
 0x417   : > { %v7000_v0 = vpop.permute.xlu0 %6999  ;;  %v7298_v61 = vpack.i.bf16 %v4269_v52, %v4133_v39  ;;  %4394 = vmatprep.mubr.bf16.mxu0 %v7745_v2  ;;  %7308 = vset.pattern.permute.xlu0 %v7745_v2  ;;  %v7017_v4 = vunpack.i.h.bf16 %v10161_v31  ;;  %v7016_v58 = vunpack.i.l.bf16 %v10161_v31 }
 0x418   : > { %7269 = vrot.lane.b32.xlu0 %v7268_v57, %s7741_s29  ;;  %v7002_v10 = vunpack.i.h.bf16 %v7000_v0  ;;  %v7001_v45 = vunpack.i.l.bf16 %v7000_v0  ;;  %v1629_v57 = vsel %vm1216_vm8, %v12604_v33, %v6997_v21  ;;  %7309 = vset.pattern.permute.xlu1 %v7745_v2  ;;  %v7022_v33 = vunpack.i.h.bf16 %v10180_v38 }
 0x419   : > { %6769 = vmatprep.mubr.bf16.mxu1 %v7745_v2 }
 0x41a   : > { %7274 = vrot.lane.b32.xlu1 %v7273_v16, %s7744_s12  ;;  %v1217_v16 = vsel %vm1216_vm8, %v12607_v44, %v6996_v11  ;;  %v1630_v12 = vsel %vm1218_vm9, %v1629_v57, %v7002_v10  ;;  %v7303_v11 = vpack.i.bf16 %v4270_v27, %v4134_v59  ;;  %v7021_v57 = vunpack.i.l.bf16 %v10180_v38 }
 0x41b   : > { %v7025_v23 = vpop.permute.xlu1 %7024  ;;  %v1219_v37 = vsel %vm1218_vm9, %v1217_v16, %v7001_v45 }
 0x41c   : > { %7279 = vrot.lane.b32.xlu0 %v7278_v43, %s7742_s30  ;;  %v7005_v7 = vpop.permute.xlu0 %7004  ;;  %v7027_v30 = vunpack.i.h.bf16 %v7025_v23  ;;  %v7026_v17 = vunpack.i.l.bf16 %v7025_v23  ;;  %v4403_v23 = vld [vmem:[%s11884_s5] sm:$0xf] }
 0x41d   : > { %v7007_v19 = vunpack.i.h.bf16 %v7005_v7  ;;  %v7006_v46 = vunpack.i.l.bf16 %v7005_v7 }
 0x41e   : > { %7284 = vrot.lane.b32.xlu1 %v7283_v42, %s7744_s12 }
 0x41f   : > { %v1221_v47 = vsel %vm1220_vm10, %v1219_v37, %v7006_v46  ;;  %v1631_v43 = vsel %vm1220_vm10, %v1630_v12, %v7007_v19  ;;  %v4411_v46 = vld [vmem:[%s11885_s6] sm:$0xf] }
 0x420   : > { %v10194_v55 = vpop.permute.xlu1 %7029  ;;  %7289 = vrot.lane.b32.xlu0 %v7288_v28, %s7743_s11  ;;  %v7010_v5 = vpop.permute.xlu0 %7009 }
 0x421   : > { %v7012_v0 = vunpack.i.h.bf16 %v7010_v5  ;;  %v7011_v60 = vunpack.i.l.bf16 %v7010_v5  ;;  %v7032_v40 = vunpack.i.h.bf16 %v10194_v55  ;;  %v7031_v50 = vunpack.i.l.bf16 %v10194_v55 }
 0x422   : > { %7294 = vrot.lane.b32.xlu1 %v7293_v41, %s7738_s26 }
 0x423   : > { %v1223_v39 = vsel %vm1222_vm11, %v1221_v47, %v7011_v60  ;;  %v1632_v21 = vsel %vm1222_vm11, %v1631_v43, %v7012_v0  ;;  %v12608_v0 = vld [vmem:[#allocation58_spill] sm:$0xff]  ;;  %v12609_v60 = vld [vmem:[#allocation85_spill] sm:$0xff]  ;;  %v12612_v43 = vld [vmem:[#allocation115_spill] sm:$0xff] }
 0x424   : > { %7299 = vrot.lane.b32.xlu0 %v7298_v61, %s7741_s29  ;;  %v1225_v20 = vsel %vm1224_vm12, %v1223_v39, %v7016_v58  ;;  %v1633_v31 = vsel %vm1224_vm12, %v1632_v21, %v7017_v4  ;;  %v7035_v42 = vpop.permute.xlu1 %7034  ;;  %v12610_v4 = vcombine.low %v12608_v0, %v12609_v60  ;;  %v12611_v47 = vld [vmem:[#allocation114_spill] sm:$0xff] }
 0x425   : > { %v7037_v28 = vunpack.i.h.bf16 %v7035_v42  ;;  %v7036_v7 = vunpack.i.l.bf16 %v7035_v42  ;;  %v1227_v10 = vsel %vm1226_vm13, %v1225_v20, %v7026_v17  ;;  %v1634_v45 = vsel %vm1226_vm13, %v1633_v31, %v7027_v30  ;;  %v12614_v60 = vld [vmem:[#allocation122_spill] sm:$0xff] }
 0x426   : > { %7304 = vrot.lane.b32.xlu1 %v7303_v11, %s7744_s12  ;;  %v7040_v19 = vpop.permute.xlu0 %7039  ;;  %v2377_v58 = vsel %vm1216_vm8, %v12610_v4, %v7022_v33  ;;  %v12613_v30 = vcombine.low %v12611_v47, %v12612_v43  ;;  %v12615_v4 = vld [vmem:[#allocation123_spill] sm:$0xff]  ;;  %v12617_v43 = vld [vmem:[#allocation118_spill] sm:$0xff] }
 0x427   : > { %v10224_v41 = vsel %vm1228_vm14, %v1227_v10, %v7036_v7  ;;  %v10227_v52 = vsel %vm1228_vm14, %v1634_v45, %v7037_v28  ;;  %v7042_v16 = vunpack.i.h.bf16 %v7040_v19  ;;  %v7041_v5 = vunpack.i.l.bf16 %v7040_v19 }
 0x428   : > { %v4342_v59 = vpack.c.bf16 %v10227_v52, %v10224_v41  ;;  %4406 = vperm.xlu0 %7308, %v4403_v23   ;;  %v2019_v38 = vsel %vm1216_vm8, %v12613_v30, %v7021_v57  ;;  %v2378_v55 = vsel %vm1218_vm9, %v2377_v58, %v7032_v40  ;;  %v12616_v58 = vcombine.low %v12614_v60, %v12615_v4  ;;  %v12618_v30 = vld [vmem:[#allocation119_spill] sm:$0xff] }
 0x429   : > { %v2020_v17 = vsel %vm1218_vm9, %v2019_v38, %v7031_v50  ;;  %v2379_v39 = vsel %vm1220_vm10, %v2378_v55, %v7042_v16  ;;  %v12619_v38 = vcombine.low %v12617_v43, %v12618_v30  ;;  %v12624_v52 = vcombine.low %v9466_v56, %v9600_v35 }
 0x42a   : > { %4414 = vperm.xlu1 %7309, %v4411_v46   ;;  %v7050_v61 = vpop.permute.xlu1 %7049  ;;  %v2021_v21 = vsel %vm1220_vm10, %v2020_v17, %v7041_v5 }
 0x42b   : > { %v7045_v27 = vpop.permute.xlu0 %7044  ;;  %v7052_v11 = vunpack.i.h.bf16 %v7050_v61  ;;  %v7051_v20 = vunpack.i.l.bf16 %v7050_v61 }
 0x42c   : > { %v7047_v2 = vunpack.i.h.bf16 %v7045_v27  ;;  %v7046_v37 = vunpack.i.l.bf16 %v7045_v27 }
 0x42e   : > { %v2022_v42 = vsel %vm1222_vm11, %v2021_v21, %v7046_v37  ;;  %v2380_v28 = vsel %vm1222_vm11, %v2379_v39, %v7047_v2 }
 0x42f   : > { %v7055_v34 = vpop.permute.xlu1 %7054  ;;  %v2023_v23 = vsel %vm1224_vm12, %v2022_v42, %v7051_v20  ;;  %v2381_v19 = vsel %vm1224_vm12, %v2380_v28, %v7052_v11 }
 0x430   : > { %v7075_v26 = vpop.permute.xlu0 %7074  ;;  %v7057_v27 = vunpack.i.h.bf16 %v7055_v34  ;;  %v7056_v33 = vunpack.i.l.bf16 %v7055_v34 }
 0x431   : > { %v7077_v11 = vunpack.i.h.bf16 %v7075_v26  ;;  %v7076_v20 = vunpack.i.l.bf16 %v7075_v26 }
 0x432   : > { %v3173_v47 = vsel %vm1216_vm8, %v12616_v58, %v7057_v27  ;;  %v2783_v17 = vsel %vm1216_vm8, %v12619_v38, %v7056_v33 }
 0x438   : > { %v7060_v44 = vpop.permute.xlu1 %7059  ;;  %v7080_v12 = vpop.permute.xlu0 %7079 }
 0x439   : > { %v7062_v7 = vunpack.i.h.bf16 %v7060_v44  ;;  %v7061_v10 = vunpack.i.l.bf16 %v7060_v44 }
 0x43b   : > { %v2024_v61 = vsel %vm1226_vm13, %v2023_v23, %v7061_v10  ;;  %v2382_v50 = vsel %vm1226_vm13, %v2381_v19, %v7062_v7  ;;  %v7082_v23 = vunpack.i.h.bf16 %v7080_v12  ;;  %v7081_v19 = vunpack.i.l.bf16 %v7080_v12 }
 0x43c   : > { %v7065_v31 = vpop.permute.xlu1 %7064 }
 0x43d   : > { %v7067_v16 = vunpack.i.h.bf16 %v7065_v31  ;;  %v7066_v5 = vunpack.i.l.bf16 %v7065_v31 }
 0x43e   : > { %v10252_v45 = vpop.permute.xlu0 %7124 }
 0x43f   : > { %v2784_v55 = vsel %vm1218_vm9, %v2783_v17, %v7066_v5  ;;  %v3174_v39 = vsel %vm1218_vm9, %v3173_v47, %v7067_v16 }
 0x440   : > { %v7070_v46 = vpop.permute.xlu1 %7069  ;;  %v2785_v42 = vsel %vm1220_vm10, %v2784_v55, %v7076_v20  ;;  %v3175_v28 = vsel %vm1220_vm10, %v3174_v39, %v7077_v11 }
 0x441   : > { %v7072_v57 = vunpack.i.h.bf16 %v7070_v46  ;;  %v7071_v40 = vunpack.i.l.bf16 %v7070_v46 }
 0x442   : > { %v10258_v2 = vpop.permute.xlu0 %7129 }
 0x443   : > { %v10261_v44 = vsel %vm1228_vm14, %v2024_v61, %v7071_v40  ;;  %v10264_v37 = vsel %vm1228_vm14, %v2382_v50, %v7072_v57  ;;  %v2786_v57 = vsel %vm1222_vm11, %v2785_v42, %v7081_v19  ;;  %v3176_v40 = vsel %vm1222_vm11, %v3175_v28, %v7082_v23 }
 0x444   : > { %v7085_v0 = vpop.permute.xlu1 %7084  ;;  %v4344_v34 = vpack.c.bf16 %v10264_v37, %v10261_v44 }
 0x445   : > { %v7087_v7 = vunpack.i.h.bf16 %v7085_v0  ;;  %v7086_v10 = vunpack.i.l.bf16 %v7085_v0 }
 0x446   : > { %v10278_v21 = vpop.permute.xlu0 %7134 }
 0x447   : > { %v2787_v26 = vsel %vm1224_vm12, %v2786_v57, %v7086_v10  ;;  %v3177_v50 = vsel %vm1224_vm12, %v3176_v40, %v7087_v7  ;;  %v7126_v57 = vunpack.i.l.bf16 %v10252_v45  ;;  %v12620_v40 = vcombine.low %v12487_v9, %v12486_v48 }
 0x448   : > { %v7090_v31 = vpop.permute.xlu1 %7089 }
 0x449   : > { %v7092_v46 = vunpack.i.h.bf16 %v7090_v31  ;;  %v7091_v27 = vunpack.i.l.bf16 %v7090_v31 }
 0x44a   : > { %v10282_v33 = vpop.permute.xlu0 %7139 }
 0x44b   : > { %v2788_v60 = vsel %vm1226_vm13, %v2787_v26, %v7091_v27  ;;  %v3178_v0 = vsel %vm1226_vm13, %v3177_v50, %v7092_v46  ;;  %v7127_v27 = vunpack.i.h.bf16 %v10252_v45  ;;  %v12621_v26 = vcombine.low %v12491_v62, %v12492_v14 }
 0x44c   : > { %v7095_v61 = vpop.permute.xlu1 %7094  ;;  %v7136_v62 = vunpack.i.l.bf16 %v10278_v21 }
 0x44d   : > { %v7097_v16 = vunpack.i.h.bf16 %v7095_v61  ;;  %v7096_v5 = vunpack.i.l.bf16 %v7095_v61 }
 0x44e   : > { %v7145_v12 = vpop.permute.xlu0 %7144 }
 0x44f   : > { %v10291_v4 = vsel %vm1228_vm14, %v2788_v60, %v7096_v5  ;;  %v10294_v58 = vsel %vm1228_vm14, %v3178_v0, %v7097_v16  ;;  %v7132_v16 = vunpack.i.h.bf16 %v10258_v2  ;;  %v7131_v5 = vunpack.i.l.bf16 %v10258_v2 }
 0x450   : > { %v7100_v47 = vpop.permute.xlu1 %7099  ;;  %v4346_v43 = vpack.c.bf16 %v10294_v58, %v10291_v4 }
 0x451   : > { %v7102_v11 = vunpack.i.h.bf16 %v7100_v47  ;;  %v7101_v20 = vunpack.i.l.bf16 %v7100_v47 }
 0x452   : > { %v10298_v30 = vpop.permute.xlu0 %7159 }
 0x453   : > { %v1636_v61 = vsel %vm1216_vm8, %v12620_v40, %v7102_v11  ;;  %v1230_v50 = vsel %vm1216_vm8, %v12621_v26, %v7101_v20  ;;  %v7142_v20 = vunpack.i.h.bf16 %v10282_v33  ;;  %v12623_v26 = vcombine.low %v9305_v18, %v9494_v25 }
 0x454   : > { %v7105_v38 = vpop.permute.xlu1 %7104  ;;  %v7162_v25 = vunpack.i.h.bf16 %v10298_v30 }
 0x455   : > { %v7107_v31 = vunpack.i.h.bf16 %v7105_v38  ;;  %v7106_v42 = vunpack.i.l.bf16 %v7105_v38 }
 0x456   : > { %v10300_v17 = vpop.permute.xlu0 %7164 }
 0x457   : > { %v1231_v60 = vsel %vm1218_vm9, %v1230_v50, %v7106_v42  ;;  %v1637_v0 = vsel %vm1218_vm9, %v1636_v61, %v7107_v31  ;;  %v7141_v31 = vunpack.i.l.bf16 %v10282_v33  ;;  %v2026_v33 = vsel %vm1216_vm8, %v12623_v26, %v7126_v57 }
 0x458   : > { %v7110_v55 = vpop.permute.xlu1 %7109  ;;  %v7161_v57 = vunpack.i.l.bf16 %v10298_v30 }
 0x459   : > { %v7112_v7 = vunpack.i.h.bf16 %v7110_v55  ;;  %v7111_v10 = vunpack.i.l.bf16 %v7110_v55  ;;  %v7137_v55 = vunpack.i.h.bf16 %v10278_v21 }
 0x45a   : > { %v10302_v39 = vpop.permute.xlu0 %7169 }
 0x45b   : > { %v1232_v45 = vsel %vm1220_vm10, %v1231_v60, %v7111_v10  ;;  %v1638_v48 = vsel %vm1220_vm10, %v1637_v0, %v7112_v7  ;;  %v7147_v7 = vunpack.i.h.bf16 %v7145_v12  ;;  %v7146_v10 = vunpack.i.l.bf16 %v7145_v12 }
 0x45c   : > { %v7115_v28 = vpop.permute.xlu1 %7114 }
 0x45d   : > { %v7117_v23 = vunpack.i.h.bf16 %v7115_v28  ;;  %v7116_v19 = vunpack.i.l.bf16 %v7115_v28 }
 0x45e   : > { %v10304_v46 = vpop.permute.xlu0 %7174 }
 0x45f   : > { %v1233_v14 = vsel %vm1222_vm11, %v1232_v45, %v7116_v19  ;;  %v1639_v11 = vsel %vm1222_vm11, %v1638_v48, %v7117_v23  ;;  %v12622_v19 = vcombine.low %v12468_v1, %v12469_v32 }
 0x460   : > { %v7120_v47 = vpop.permute.xlu1 %7119 }
 0x461   : > { %v7122_v9 = vunpack.i.h.bf16 %v7120_v47  ;;  %v7121_v38 = vunpack.i.l.bf16 %v7120_v47  ;;  %v2384_v23 = vsel %vm1216_vm8, %v12622_v19, %v7127_v27 }
 0x462   : > { %v7180_v2 = vpop.permute.xlu0 %7179  ;;  %v2385_v47 = vsel %vm1218_vm9, %v2384_v23, %v7137_v55 }
 0x463   : > { %v1234_v42 = vsel %vm1224_vm12, %v1233_v14, %v7121_v38  ;;  %v1640_v28 = vsel %vm1224_vm12, %v1639_v11, %v7122_v9  ;;  %v2386_v32 = vsel %vm1220_vm10, %v2385_v47, %v7147_v7  ;;  %v7167_v9 = vunpack.i.h.bf16 %v10300_v17 }
 0x464   : > { %v7150_v40 = vpop.permute.xlu1 %7149  ;;  %v1235_v61 = vsel %vm1226_vm13, %v1234_v42, %v7131_v5  ;;  %v1641_v21 = vsel %vm1226_vm13, %v1640_v28, %v7132_v16  ;;  %v2027_v16 = vsel %vm1218_vm9, %v2026_v33, %v7136_v62  ;;  %v7166_v38 = vunpack.i.l.bf16 %v10300_v17 }
 0x465   : > { %v7152_v50 = vunpack.i.h.bf16 %v7150_v40  ;;  %v7151_v60 = vunpack.i.l.bf16 %v7150_v40  ;;  %v1236_v12 = vsel %vm1228_vm14, %v1235_v61, %v7141_v31  ;;  %v1642_v5 = vsel %vm1228_vm14, %v1641_v21, %v7142_v20 }
 0x466   : > { %v10340_v0 = vpop.permute.xlu0 %7194  ;;  %v2028_v1 = vsel %vm1220_vm10, %v2027_v16, %v7146_v10  ;;  %v4343_v18 = vpack.c.bf16 %v1642_v5, %v1236_v12  ;;  %v7177_v11 = vunpack.i.h.bf16 %v10304_v46  ;;  %v7176_v20 = vunpack.i.l.bf16 %v10304_v46 }
 0x467   : > { %v2029_v62 = vsel %vm1222_vm11, %v2028_v1, %v7151_v60  ;;  %v2387_v55 = vsel %vm1222_vm11, %v2386_v32, %v7152_v50  ;;  %v7172_v17 = vunpack.i.h.bf16 %v10302_v39  ;;  %v7171_v42 = vunpack.i.l.bf16 %v10302_v39 }
 0x468   : > { %v7155_v27 = vpop.permute.xlu1 %7154  ;;  %4362 = vmatprep.subr.bf16.mxu0 %v4343_v18  ;;  %v7182_v40 = vunpack.i.h.bf16 %v7180_v2  ;;  %v7181_v61 = vunpack.i.l.bf16 %v7180_v2  ;;  %v12625_v39 = vcombine.low %v9365_v51, %v9555_v53 }
 0x469   : > { %v7157_v45 = vunpack.i.h.bf16 %v7155_v27  ;;  %v7156_v48 = vunpack.i.l.bf16 %v7155_v27  ;;  %4363 = vmatpush1.bf16.msra.mxu0 %v4342_v59  ;;  %v3180_v59 = vsel %vm1216_vm8, %v12624_v52, %v7162_v25  ;;  %v12630_v52 = vcombine.low %v9725_v54, %v9728_v8 }
 0x46a   : > { %v7200_v14 = vpop.permute.xlu0 %7199  ;;  %v2790_v33 = vsel %vm1216_vm8, %v12625_v39, %v7161_v57  ;;  %v3181_v50 = vsel %vm1218_vm9, %v3180_v59, %v7172_v17 }
 0x46b   : > { %v2030_v31 = vsel %vm1224_vm12, %v2029_v62, %v7156_v48  ;;  %v2388_v30 = vsel %vm1224_vm12, %v2387_v55, %v7157_v45  ;;  %v2791_v2 = vsel %vm1218_vm9, %v2790_v33, %v7171_v42  ;;  %v3182_v5 = vsel %vm1220_vm10, %v3181_v50, %v7182_v40 }
 0x46c   : > { %v7185_v28 = vpop.permute.xlu1 %7184  ;;  %v2031_v7 = vsel %vm1226_vm13, %v2030_v31, %v7166_v38  ;;  %v2389_v10 = vsel %vm1226_vm13, %v2388_v30, %v7167_v9  ;;  %v2792_v12 = vsel %vm1220_vm10, %v2791_v2, %v7181_v61  ;;  %v7202_v56 = vunpack.i.h.bf16 %v7200_v14  ;;  %v12627_v61 = vld [vmem:[#allocation87_spill] sm:$0xff] }
 0x46d   : > { %v2032_v46 = vsel %vm1228_vm14, %v2031_v7, %v7176_v20  ;;  %v2390_v21 = vsel %vm1228_vm14, %v2389_v10, %v7177_v11  ;;  %v7187_v19 = vunpack.i.h.bf16 %v7185_v28  ;;  %v7186_v23 = vunpack.i.l.bf16 %v7185_v28 }
 0x46e   : > { %v7210_v26 = vpop.permute.xlu0 %7209  ;;  %v4345_v41 = vpack.c.bf16 %v2390_v21, %v2032_v46  ;;  %v7201_v51 = vunpack.i.l.bf16 %v7200_v14  ;;  %v7196_v11 = vunpack.i.l.bf16 %v10340_v0  ;;  %v7197_v31 = vunpack.i.h.bf16 %v10340_v0  ;;  %v12628_v46 = vld [vmem:[#allocation63_spill] sm:$0xff] }
 0x46f   : > { %v2793_v53 = vsel %vm1222_vm11, %v2792_v12, %v7186_v23  ;;  %v3183_v35 = vsel %vm1222_vm11, %v3182_v5, %v7187_v19  ;;  %v7211_v30 = vunpack.i.l.bf16 %v7210_v26  ;;  %v12626_v40 = vcombine.low %v12530_v15, %v12529_v24 }
 0x470   : > { %v7190_v60 = vpop.permute.xlu1 %7189  ;;  %4364 = vmatprep.subr.bf16.mxu0 %v4345_v41  ;;  %v7212_v58 = vunpack.i.h.bf16 %v7210_v26  ;;  %v12629_v21 = vcombine.low %v12627_v61, %v12628_v46  ;;  %v12631_v24 = vcombine.low %v12560_v29, %v12561_v36 }
 0x471   : > { %v7192_v16 = vunpack.i.h.bf16 %v7190_v60  ;;  %v7191_v47 = vunpack.i.l.bf16 %v7190_v60  ;;  %4365 = vmatpush1.bf16.msra.mxu0 %v4344_v34  ;;  %v3538_v4 = vsel %vm1216_vm8, %v12626_v40, %v7196_v11 }
 0x472   : > { %v7215_v1 = vpop.permute.xlu0 %7214  ;;  %v3944_v19 = vsel %vm1216_vm8, %v12629_v21, %v7197_v31  ;;  %v3539_v0 = vsel %vm1218_vm9, %v3538_v4, %v7211_v30 }
 0x473   : > { %v2794_v32 = vsel %vm1224_vm12, %v2793_v53, %v7191_v47  ;;  %v3184_v27 = vsel %vm1224_vm12, %v3183_v35, %v7192_v16  ;;  %v7217_v18 = vunpack.i.h.bf16 %v7215_v1  ;;  %v7216_v25 = vunpack.i.l.bf16 %v7215_v1 }
 0x474   : > { %v7205_v57 = vpop.permute.xlu1 %7204  ;;  %v2795_v45 = vsel %vm1226_vm13, %v2794_v32, %v7201_v51  ;;  %v3185_v48 = vsel %vm1226_vm13, %v3184_v27, %v7202_v56  ;;  %v3945_v5 = vsel %vm1218_vm9, %v3944_v19, %v7212_v58  ;;  %v12632_v19 = vcombine.low %v12594_v22, %v12593_v3 }
 0x475   : > { %v2796_v44 = vsel %vm1228_vm14, %v2795_v45, %v7216_v25  ;;  %v3186_v37 = vsel %vm1228_vm14, %v3185_v48, %v7217_v18  ;;  %v7207_v17 = vunpack.i.h.bf16 %v7205_v57  ;;  %v7206_v42 = vunpack.i.l.bf16 %v7205_v57 }
 0x476   : > { %v7225_v34 = vpop.permute.xlu0 %7224  ;;  %v4347_v9 = vpack.c.bf16 %v3186_v37, %v2796_v44 }
 0x477   : > { %v7227_v23 = vunpack.i.h.bf16 %v7225_v34  ;;  %v7226_v41 = vunpack.i.l.bf16 %v7225_v34  ;;  %v3937_v59 = vsel %vm1216_vm8, %v12630_v52, %v7207_v17  ;;  %v3531_v15 = vsel %vm1216_vm8, %v12631_v24, %v7206_v42 }
 0x478   : > { %v7220_v38 = vpop.permute.xlu1 %7219  ;;  %4366 = vmatprep.subr.bf16.mxu0 %v4347_v9 }
 0x479   : > { %4367 = vmatpush1.bf16.msra.mxu0 %v4346_v43  ;;  %v7222_v7 = vunpack.i.h.bf16 %v7220_v38  ;;  %v7221_v10 = vunpack.i.l.bf16 %v7220_v38  ;;  %v3540_v56 = vsel %vm1220_vm10, %v3539_v0, %v7226_v41  ;;  %v3946_v29 = vsel %vm1220_vm10, %v3945_v5, %v7227_v23 }
 0x47a   : > { %v7230_v62 = vpop.permute.xlu0 %7229  ;;  %v12633_v23 = vcombine.low %v9761_v63, %v9766_v13 }
 0x47b   : > { %v7232_v26 = vunpack.i.h.bf16 %v7230_v62  ;;  %v7231_v39 = vunpack.i.l.bf16 %v7230_v62  ;;  %v3532_v2 = vsel %vm1218_vm9, %v3531_v15, %v7221_v10  ;;  %v3938_v50 = vsel %vm1218_vm9, %v3937_v59, %v7222_v7 }
 0x47c   : > { %v7235_v55 = vpop.permute.xlu1 %7234 }
 0x47d   : > { %v7237_v60 = vunpack.i.h.bf16 %v7235_v55  ;;  %v7236_v12 = vunpack.i.l.bf16 %v7235_v55  ;;  %v3939_v36 = vsel %vm1220_vm10, %v3938_v50, %v7232_v26  ;;  %v3533_v51 = vsel %vm1220_vm10, %v3532_v2, %v7231_v39 }
 0x47e   : > { %v7240_v14 = vpop.permute.xlu0 %7239 }
 0x47f   : > { %v7241_v16 = vunpack.i.l.bf16 %v7240_v14  ;;  %v3541_v32 = vsel %vm1222_vm11, %v3540_v56, %v7236_v12  ;;  %v3947_v27 = vsel %vm1222_vm11, %v3946_v29, %v7237_v60  ;;  %v7242_v18 = vunpack.i.h.bf16 %v7240_v14 }
 0x480   : > { %v7245_v20 = vpop.permute.xlu1 %7244 }
 0x481   : > { %v7247_v54 = vunpack.i.h.bf16 %v7245_v20  ;;  %v7246_v8 = vunpack.i.l.bf16 %v7245_v20  ;;  %v3534_v57 = vsel %vm1222_vm11, %v3533_v51, %v7241_v16  ;;  %v3940_v30 = vsel %vm1222_vm11, %v3939_v36, %v7242_v18 }
 0x482   : > { %v10395_v28 = vpop.permute.xlu0 %7249 }
 0x483   : > { %v3542_v45 = vsel %vm1224_vm12, %v3541_v32, %v7246_v8  ;;  %v3948_v48 = vsel %vm1224_vm12, %v3947_v27, %v7247_v54  ;;  %v7252_v34 = vunpack.i.h.bf16 %v10395_v28  ;;  %v7251_v9 = vunpack.i.l.bf16 %v10395_v28 }
 0x484   : > { %v7255_v43 = vpop.permute.xlu1 %7254 }
 0x485   : > { %v7256_v25 = vunpack.i.l.bf16 %v7255_v43  ;;  %v7257_v44 = vunpack.i.h.bf16 %v7255_v43  ;;  %v4334_v0 = vsel %vm1216_vm8, %v12632_v19, %v7252_v34  ;;  %v4327_v41 = vsel %vm1216_vm8, %v12633_v23, %v7251_v9 }
 0x486   : > { %v7260_v33 = vpop.permute.xlu0 %7259 }
 0x487   : > { %v7262_v53 = vunpack.i.h.bf16 %v7260_v33  ;;  %v7261_v35 = vunpack.i.l.bf16 %v7260_v33  ;;  %v3535_v17 = vsel %vm1224_vm12, %v3534_v57, %v7256_v25  ;;  %v3941_v10 = vsel %vm1224_vm12, %v3940_v30, %v7257_v44 }
 0x488   : > { %v7265_v47 = vpop.permute.xlu1 %7264 }
 0x489   : > { %v3543_v14 = vsel %vm1226_vm13, %v3542_v45, %v7261_v35  ;;  %v3949_v31 = vsel %vm1226_vm13, %v3948_v48, %v7262_v53  ;;  %v7267_v28 = vunpack.i.h.bf16 %v7265_v47  ;;  %v7266_v40 = vunpack.i.l.bf16 %v7265_v47  ;;  %v4341_v45 = vld [vmem:[%s11883_s4] sm:$0x3] }
 0x48a   : > { %v7270_v1 = vpop.permute.xlu0 %7269 }
 0x48b   : > { %v7272_v55 = vunpack.i.h.bf16 %v7270_v1  ;;  %v7271_v11 = vunpack.i.l.bf16 %v7270_v1  ;;  %v4328_v3 = vsel %vm1218_vm9, %v4327_v41, %v7266_v40  ;;  %v4335_v22 = vsel %vm1218_vm9, %v4334_v0, %v7267_v28 }
 0x48c   : > { %v7275_v37 = vpop.permute.xlu1 %7274 }
 0x48d   : > { %v7277_v38 = vunpack.i.h.bf16 %v7275_v37  ;;  %v7276_v62 = vunpack.i.l.bf16 %v7275_v37  ;;  %v3536_v52 = vsel %vm1226_vm13, %v3535_v17, %v7271_v11  ;;  %v3942_v59 = vsel %vm1226_vm13, %v3941_v10, %v7272_v55 }
 0x48e   : > { %v7280_v20 = vpop.permute.xlu0 %7279 }
 0x48f   : > { %v3544_v42 = vsel %vm1228_vm14, %v3543_v14, %v7276_v62  ;;  %v3950_v7 = vsel %vm1228_vm14, %v3949_v31, %v7277_v38  ;;  %v7282_v43 = vunpack.i.h.bf16 %v7280_v20  ;;  %v7281_v61 = vunpack.i.l.bf16 %v7280_v20 }
 0x490   : > { %v7285_v4 = vpop.permute.xlu1 %7284  ;;  %v4349_v58 = vpack.c.bf16 %v3950_v7, %v3544_v42 }
 0x491   : > { %v7287_v46 = vunpack.i.h.bf16 %v7285_v4  ;;  %v7286_v21 = vunpack.i.l.bf16 %v7285_v4  ;;  %v4329_v13 = vsel %vm1220_vm10, %v4328_v3, %v7281_v61  ;;  %v4336_v50 = vsel %vm1220_vm10, %v4335_v22, %v7282_v43 }
 0x492   : > { %v7290_v24 = vpop.permute.xlu0 %7289  ;;  %4368 = vmatprep.subr.bf16.mxu0 %v4349_v58 }
 0x493   : > { %v3537_v15 = vsel %vm1228_vm14, %v3536_v52, %v7286_v21  ;;  %v3943_v26 = vsel %vm1228_vm14, %v3942_v59, %v7287_v46  ;;  %v7292_v39 = vunpack.i.h.bf16 %v7290_v24  ;;  %v7291_v33 = vunpack.i.l.bf16 %v7290_v24 }
 0x494   : > { %v7295_v2 = vpop.permute.xlu1 %7294  ;;  %v4348_v63 = vpack.c.bf16 %v3943_v26, %v3537_v15 }
 0x495   : > { %v7297_v60 = vunpack.i.h.bf16 %v7295_v2  ;;  %v7296_v12 = vunpack.i.l.bf16 %v7295_v2  ;;  %v4330_v5 = vsel %vm1222_vm11, %v4329_v13, %v7291_v33  ;;  %v4337_v16 = vsel %vm1222_vm11, %v4336_v50, %v7292_v39 }
 0x496   : > { %v7300_v54 = vpop.permute.xlu0 %7299  ;;  %4369 = vmatpush1.bf16.msra.mxu0 %v4348_v63 }
 0x497   : > { %v4331_v8 = vsel %vm1224_vm12, %v4330_v5, %v7296_v12  ;;  %v4338_v47 = vsel %vm1224_vm12, %v4337_v16, %v7297_v60  ;;  %v7302_v56 = vunpack.i.h.bf16 %v7300_v54  ;;  %v7301_v29 = vunpack.i.l.bf16 %v7300_v54 }
 0x498   : > { %v7305_v36 = vpop.permute.xlu1 %7304 }
 0x499   : > { %v7307_v51 = vunpack.i.h.bf16 %v7305_v36  ;;  %v7306_v53 = vunpack.i.l.bf16 %v7305_v36  ;;  %v4339_v35 = vsel %vm1226_vm13, %v4338_v47, %v7302_v56  ;;  %v4332_v1 = vsel %vm1226_vm13, %v4331_v8, %v7301_v29 }
 0x49b   : > { %v4340_v32 = vsel %vm1228_vm14, %v4339_v35, %v7307_v51  ;;  %v4333_v27 = vsel %vm1228_vm14, %v4332_v1, %v7306_v53 }
 0x49c   : > { %v4351_v18 = vpack.c.bf16 %v4340_v32, %v4340_v32  ;;  %v4350_v25 = vpack.c.bf16 %v4333_v27, %v4333_v27 }
 0x49e   : > { %6901 = vmatprep.subr.msk.bf16.mxu0 %vm517_vm0, %v4351_v18  ;;  %v4357_v57 = vsel %vm517_vm0, %v4350_v25, 0 }
 0x49f   : > { %4371 = vmatpush1.bf16.msra.mxu0 %v4357_v57 }
 0x4a2   : > { %6902 = vmatmul.mubr.msk.bf16.vlgmr.msra.gmra.mrb[4].mxu0 %vm4352_vm15, %v4341_v45 }
 0x4a7   : > { %v4407_v48 = vpop.permute.xlu0 %4406 }
 0x4a9   : > { %v4415_v37 = vpop.permute.xlu1 %4414 }
 0x575   : > { %v4396_v44 = vpop.f32.mrb[4].mxu0 }
 0x576   : > { %v4409_v34 = vmul.f32 %v4407_v48, %v4396_v44  ;;  %v4398_v9 = vpop.f32.mrb[5].mxu0 }
 0x577   : > { %v4400_v38 = vpop.f32.mrb[6].mxu0  ;;  %v4410_v20 = vmul.f32 %v4407_v48, %v4398_v9 }
 0x578   : > { %v4417_v62 = vadd.f32 %v4415_v37, %v4409_v34  ;;  %v4401_v55 = vpop.f32.mrb[7].mxu0 }
 0x579   : > { %v4418_v14 = vadd.f32 %v4415_v37, %v4410_v20 }
 0x57a   : > { %v4419_v11 = vmax.f32 %v4417_v62, 0.0 }
 0x57b   : > { %v4420_v31 = vmax.f32 %v4418_v14, 0.0 }
 0x57c   : > { %4425 = vrot.lane.b32.xlu0 %v4419_v11, %s7741_s29  ;;  %4422 = vrot.lane.b32.xlu1 %v4419_v11, %s7744_s12 }
 0x580   : > { %4431 = vrot.lane.b32.xlu0 %v4419_v11, %s7743_s11  ;;  %4428 = vrot.lane.b32.xlu1 %v4419_v11, %s7738_s26 }
 0x584   : > { %4437 = vrot.lane.b32.xlu0 %v4419_v11, %s7740_s28  ;;  %4434 = vrot.lane.b32.xlu1 %v4419_v11, %s7742_s30 }
 0x588   : > { %4440 = vrot.lane.b32.xlu1 %v4419_v11, %s7739_s27  ;;  %4444 = vrot.lane.b32.xlu0 %v4420_v31, %s7744_s12 }
 0x58c   : > { %4447 = vrot.lane.b32.xlu1 %v4420_v31, %s7741_s29  ;;  %4450 = vrot.lane.b32.xlu0 %v4420_v31, %s7738_s26 }
 0x590   : > { %4453 = vrot.lane.b32.xlu1 %v4420_v31, %s7743_s11  ;;  %4456 = vrot.lane.b32.xlu0 %v4420_v31, %s7742_s30 }
 0x594   : > { %4459 = vrot.lane.b32.xlu1 %v4420_v31, %s7740_s28  ;;  %4462 = vrot.lane.b32.xlu0 %v4420_v31, %s7739_s27 }
 0x5ee   : > { %v4426_v30 = vpop.permute.xlu0 %4425  ;;  %v4423_v17 = vpop.permute.xlu1 %4422 }
 0x5ef   : > { %v4465_v4 = vcombine.low %v4419_v11, %v4426_v30 }
 0x5f1   : > { %v4472_v21 = vrot.slane %v4465_v4, %v8177_v6 }
 0x5f2   : > { %v4432_v42 = vpop.permute.xlu0 %4431  ;;  %v4429_v7 = vpop.permute.xlu1 %4428 }
 0x5f3   : > { %v4473_v10 = vcombine.low %v4423_v17, %v4429_v7 }
 0x5f5   : > { %v4480_v58 = vrot.slane %v4473_v10, %v8177_v6 }
 0x5f6   : > { %v4438_v28 = vpop.permute.xlu0 %4437  ;;  %v4435_v40 = vpop.permute.xlu1 %4434 }
 0x5f7   : > { %v4481_v43 = vcombine.low %v4432_v42, %v4438_v28  ;;  %v4497_v0 = vcombine.low %v4472_v21, %v4480_v58  ;;  %v4498_v13 = vcombine.high %v4472_v21, %v4480_v58 }
 0x5f9   : > { %v4488_v23 = vrot.slane %v4481_v43, %v8177_v6  ;;  %v4505_v15 = vrot.slane %v4497_v0, %v8447_v49  ;;  %v4512_v56 = vrot.slane %v4498_v13, %v8447_v49 }
 0x5fa   : > { %v4441_v61 = vpop.permute.xlu1 %4440  ;;  %v4445_v46 = vpop.permute.xlu0 %4444 }
 0x5fb   : > { %v4489_v19 = vcombine.low %v4435_v40, %v4441_v61 }
 0x5fd   : > { %v4496_v41 = vrot.slane %v4489_v19, %v8177_v6 }
 0x5fe   : > { %v4448_v52 = vpop.permute.xlu1 %4447  ;;  %v4451_v59 = vpop.permute.xlu0 %4450 }
 0x5ff   : > { %v4513_v24 = vcombine.low %v4488_v23, %v4496_v41  ;;  %v4533_v39 = vcombine.low %v4420_v31, %v4448_v52  ;;  %v4541_v33 = vcombine.low %v4445_v46, %v4451_v59  ;;  %v4514_v2 = vcombine.high %v4488_v23, %v4496_v41 }
 0x601   : > { %v4521_v26 = vrot.slane %v4513_v24, %v8447_v49  ;;  %v4540_v50 = vrot.slane %v4533_v39, %v8177_v6  ;;  %v4548_v60 = vrot.slane %v4541_v33, %v8177_v6  ;;  %v4528_v16 = vrot.slane %v4514_v2, %v8447_v49 }
 0x602   : > { %v4454_v3 = vpop.permute.xlu1 %4453  ;;  %v4457_v22 = vpop.permute.xlu0 %4456 }
 0x603   : > { %v4529_v63 = vcombine.low %v4505_v15, %v4521_v26  ;;  %v4530_v47 = vcombine.high %v4505_v15, %v4521_v26  ;;  %v4565_v29 = vcombine.low %v4540_v50, %v4548_v60  ;;  %v4531_v35 = vcombine.low %v4512_v56, %v4528_v16 }
 0x604   : > { %v4532_v18 = vcombine.high %v4512_v56, %v4528_v16  ;;  %v4566_v57 = vcombine.high %v4540_v50, %v4548_v60 }
 0x605   : > { %4609 = vrot.lane.b32.xlu1 %v4529_v63, %s7732_s21  ;;  %v4573_v1 = vrot.slane %v4565_v29, %v8447_v49 }
 0x606   : > { %v4460_v12 = vpop.permute.xlu1 %4459  ;;  %v4463_v5 = vpop.permute.xlu0 %4462  ;;  %v4580_v44 = vrot.slane %v4566_v57, %v8447_v49 }
 0x607   : > { %v4549_v54 = vcombine.low %v4454_v3, %v4460_v12  ;;  %v4557_v8 = vcombine.low %v4457_v22, %v4463_v5 }
 0x609   : > { %v4556_v36 = vrot.slane %v4549_v54, %v8177_v6  ;;  %v4564_v51 = vrot.slane %v4557_v8, %v8177_v6  ;;  %4613 = vrot.lane.b32.xlu1 %v4530_v47, %s7732_s21 }
 0x60b   : > { %v4581_v53 = vcombine.low %v4556_v36, %v4564_v51  ;;  %v4582_v27 = vcombine.high %v4556_v36, %v4564_v51 }
 0x60d   : > { %v4589_v32 = vrot.slane %v4581_v53, %v8447_v49  ;;  %4617 = vrot.lane.b32.xlu1 %v4531_v35, %s7732_s21  ;;  %v4596_v45 = vrot.slane %v4582_v27, %v8447_v49 }
 0x60f   : > { %v4597_v25 = vcombine.low %v4573_v1, %v4589_v32  ;;  %v4598_v48 = vcombine.high %v4573_v1, %v4589_v32  ;;  %v4599_v37 = vcombine.low %v4580_v44, %v4596_v45  ;;  %v4600_v34 = vcombine.high %v4580_v44, %v4596_v45 }
 0x611   : > { %4621 = vrot.lane.b32.xlu1 %v4532_v18, %s7732_s21  ;;  %4611 = vrot.lane.b32.xlu0 %v4597_v25, %s7732_s21 }
 0x615   : > { %4615 = vrot.lane.b32.xlu0 %v4598_v48, %s7732_s21 }
 0x619   : > { %4619 = vrot.lane.b32.xlu0 %v4599_v37, %s7732_s21 }
 0x61d   : > { %4623 = vrot.lane.b32.xlu0 %v4600_v34, %s7732_s21 }
 0x677   : > { %v4610_v9 = vpop.permute.xlu1 %4609 }
 0x678   : > { %4633 = vst.msk [vmem:[#allocation3 + $0x1] sm:$0xff] %vm855_vm5, %v4610_v9 }
 0x67b   : > { %v4614_v38 = vpop.permute.xlu1 %4613 }
 0x67c   : > { %4635 = vst.msk [vmem:[#allocation3 + $0x19] sm:$0xff] %vm855_vm5, %v4614_v38 }
 0x67f   : > { %v4618_v62 = vpop.permute.xlu1 %4617  ;;  %v4641_v55 = vld [vmem:[#allocation3] sm:$0xff] }
 0x680   : > { %4637 = vst.msk [vmem:[#allocation3 + $0x31] sm:$0xff] %vm855_vm5, %v4618_v62  ;;  %4863 = vrot.lane.b32.xlu1 %v4641_v55, %s7734_s24  ;;  %v10509_v17 = vld [vmem:[#allocation3 + $0x1] sm:$0xff] }
 0x683   : > { %v4622_v11 = vpop.permute.xlu1 %4621  ;;  %v4612_v20 = vpop.permute.xlu0 %4611  ;;  %v4643_v14 = vld [vmem:[#allocation3 + $0x18] sm:$0xff] }
 0x684   : > { %4639 = vst.msk [vmem:[#allocation3 + $0x49] sm:$0xff] %vm855_vm5, %v4622_v11  ;;  %4634 = vst.msk [vmem:[#allocation3 + $0x9] sm:$0xff] %vm855_vm5, %v4612_v20  ;;  %4867 = vrot.lane.b32.xlu0 %v4643_v14, %s7734_s24  ;;  %v10519_v43 = vld [vmem:[#allocation3 + $0x19] sm:$0xff] }
 0x687   : > { %v4616_v31 = vpop.permute.xlu0 %4615  ;;  %v4645_v30 = vld [vmem:[#allocation3 + $0x30] sm:$0xff] }
 0x688   : > { %v10511_v42 = vld [vmem:[#allocation3 + $0x31] sm:$0xff]  ;;  %4636 = vst.msk [vmem:[#allocation3 + $0x21] sm:$0xff] %vm855_vm5, %v4616_v31  ;;  %4871 = vrot.lane.b32.xlu1 %v4645_v30, %s7734_s24  ;;  %v4649_v7 = vcombine.low %v4641_v55, %v4645_v30  ;;  %v4650_v10 = vcombine.high %v4641_v55, %v4645_v30 }
 0x689   : > { %v5331_v28 = vcombine.low %v10509_v17, %v10511_v42  ;;  %v5332_v40 = vcombine.high %v10509_v17, %v10511_v42 }
 0x68a   : > { %v10529_v0 = vrot.slane %v4649_v7, %v8177_v6  ;;  %v10546_v15 = vrot.slane %v4650_v10, %v8177_v6 }
 0x68b   : > { %v4620_v4 = vpop.permute.xlu0 %4619  ;;  %v4647_v58 = vld [vmem:[#allocation3 + $0x48] sm:$0xff]  ;;  %v10540_v59 = vrot.slane %v5331_v28, %v8177_v6  ;;  %v10549_v39 = vrot.slane %v5332_v40, %v8177_v6 }
 0x68c   : > { %v10521_v61 = vld [vmem:[#allocation3 + $0x49] sm:$0xff]  ;;  %4638 = vst.msk [vmem:[#allocation3 + $0x39] sm:$0xff] %vm855_vm5, %v4620_v4  ;;  %5093 = vrot.lane.b32.xlu1 %v4641_v55, %s7735_s25  ;;  %v4665_v46 = vcombine.low %v4643_v14, %v4647_v58  ;;  %v4666_v21 = vcombine.high %v4643_v14, %v4647_v58  ;;  %4875 = vrot.lane.b32.xlu0 %v4647_v58, %s7734_s24 }
 0x68d   : > { %v5347_v19 = vcombine.low %v10519_v43, %v10521_v61  ;;  %v5348_v23 = vcombine.high %v10519_v43, %v10521_v61  ;;  %v10571_v12 = vld [vmem:[#allocation3 + $0x8] sm:$0xff] }
 0x68e   : > { %v10534_v41 = vrot.slane %v4665_v46, %v8177_v6  ;;  %v10537_v52 = vrot.slane %v4666_v21, %v8177_v6  ;;  %v10573_v5 = vld [vmem:[#allocation3 + $0x9] sm:$0xff] }
 0x68f   : > { %v10543_v24 = vrot.slane %v5347_v19, %v8177_v6  ;;  %v4624_v26 = vpop.permute.xlu0 %4623  ;;  %v10552_v33 = vrot.slane %v5348_v23, %v8177_v6  ;;  %v10592_v51 = vld [vmem:[#allocation3 + $0xa] sm:$0xff]  ;;  %v10600_v32 = vld [vmem:[#allocation3 + $0x2] sm:$0xff]  ;;  %v6007_v10 = vld [vmem:[#allocation3 + $0x1a] sm:$0xff] }
 0x690   : > { %4640 = vst.msk [vmem:[#allocation3 + $0x51] sm:$0xff] %vm855_vm5, %v4624_v26  ;;  %5101 = vrot.lane.b32.xlu1 %v4645_v30, %s7735_s25  ;;  %5097 = vrot.lane.b32.xlu0 %v4643_v14, %s7735_s25  ;;  %v4697_v63 = vcombine.low %v10546_v15, %v10537_v52  ;;  %v4682_v13 = vcombine.high %v10529_v0, %v10534_v41  ;;  %v4644_v27 = vld [vmem:[#allocation3 + $0x20] sm:$0xff] }
 0x691   : > { %v5364_v2 = vcombine.high %v10540_v59, %v10543_v24  ;;  %v5380_v50 = vcombine.high %v10549_v39, %v10552_v33  ;;  %v5379_v60 = vcombine.low %v10549_v39, %v10552_v33  ;;  %v4698_v16 = vcombine.high %v10546_v15, %v10537_v52  ;;  %v10602_v18 = vld [vmem:[#allocation3 + $0x21] sm:$0xff] }
 0x692   : > { %v10627_v11 = vld [vmem:[#allocation3 + $0x22] sm:$0xff] }
 0x693   : > { %v10577_v54 = vld [vmem:[#allocation3 + $0x38] sm:$0xff]  ;;  %v10875_v39 = vrot.slane %v4698_v16, %v8447_v49 }
 0x694   : > { %v10579_v8 = vld [vmem:[#allocation3 + $0x39] sm:$0xff]  ;;  %5775 = vrot.lane.b32.xlu1 %v10509_v17, %s7735_s25  ;;  %5105 = vrot.lane.b32.xlu0 %v4647_v58, %s7735_s25  ;;  %v4717_v56 = vcombine.low %v10571_v12, %v10577_v54  ;;  %v4718_v29 = vcombine.high %v10571_v12, %v10577_v54 }
 0x695   : > { %v10581_v47 = vld [vmem:[#allocation3 + $0x3a] sm:$0xff]  ;;  %v5399_v36 = vcombine.low %v10573_v5, %v10579_v8  ;;  %v10594_v53 = vld [vmem:[#allocation3 + $0x32] sm:$0xff]  ;;  %v5400_v35 = vcombine.high %v10573_v5, %v10579_v8  ;;  %12643 = vst [vmem:[#allocation66_spill] sm:$0xff] %v10875_v39 }
 0x696   : > { %v6081_v1 = vcombine.low %v10592_v51, %v10581_v47  ;;  %v6013_v25 = vcombine.low %v10600_v32, %v10594_v53  ;;  %v10607_v57 = vrot.slane %v4717_v56, %v8177_v6  ;;  %v10610_v45 = vrot.slane %v4718_v29, %v8177_v6 }
 0x697   : > { %v4648_v48 = vld [vmem:[#allocation3 + $0x50] sm:$0xff]  ;;  %v10613_v44 = vrot.slane %v5399_v36, %v8177_v6  ;;  %v6014_v9 = vcombine.high %v10600_v32, %v10594_v53  ;;  %v10632_v14 = vrot.slane %v5400_v35, %v8177_v6 }
 0x698   : > { %v10615_v37 = vld [vmem:[#allocation3 + $0x51] sm:$0xff]  ;;  %5783 = vrot.lane.b32.xlu1 %v10511_v42, %s7735_s25  ;;  %5779 = vrot.lane.b32.xlu0 %v10519_v43, %s7735_s25  ;;  %v4733_v38 = vcombine.low %v4644_v27, %v4648_v48  ;;  %v4734_v62 = vcombine.high %v4644_v27, %v4648_v48  ;;  %v10637_v30 = vrot.slane %v6081_v1, %v8177_v6 }
 0x699   : > { %12634 = vst [vmem:[#allocation64_spill] sm:$0xff] %v10613_v44  ;;  %v10617_v34 = vld [vmem:[#allocation3 + $0x52] sm:$0xff]  ;;  %v5415_v55 = vcombine.low %v10602_v18, %v10615_v37  ;;  %v10629_v20 = vld [vmem:[#allocation3 + $0x4a] sm:$0xff]  ;;  %v5416_v31 = vcombine.high %v10602_v18, %v10615_v37  ;;  %v10658_v19 = vrot.slane %v6013_v25, %v8177_v6  ;;  %v10675_v35 = vrot.slane %v6014_v9, %v8177_v6 }
 0x69a   : > { %12635 = vst [vmem:[#allocation89_spill] sm:$0xff] %v10637_v30  ;;  %v6097_v7 = vcombine.low %v10627_v11, %v10617_v34  ;;  %v10642_v28 = vrot.slane %v4733_v38, %v8177_v6  ;;  %v10645_v40 = vrot.slane %v4734_v62, %v8177_v6  ;;  %v6029_v58 = vcombine.low %v6007_v10, %v10629_v20 }
 0x69b   : > { %v10648_v4 = vrot.slane %v5415_v55, %v8177_v6  ;;  %v10652_v46 = vrot.slane %v5416_v31, %v8177_v6  ;;  %v6030_v23 = vcombine.high %v6007_v10, %v10629_v20 }
 0x69c   : > { %12636 = vst [vmem:[#allocation36_spill] sm:$0xff] %v10642_v28  ;;  %v10655_v21 = vrot.slane %v6097_v7, %v8177_v6  ;;  %5545 = vrot.lane.b32.xlu1 %v10509_v17, %s7734_s24  ;;  %5787 = vrot.lane.b32.xlu0 %v10521_v61, %s7735_s25  ;;  %v10670_v29 = vrot.slane %v6029_v58, %v8177_v6 }
 0x69d   : > { %12637 = vst [vmem:[#allocation10_spill] sm:$0xff] %v10648_v4  ;;  %v10678_v17 = vrot.slane %v6030_v23, %v8177_v6  ;;  %v10844_v7 = vrot.slane %v5380_v50, %v8447_v49 }
 0x69e   : > { %12638 = vst [vmem:[#allocation21_spill] sm:$0xff] %v10655_v21  ;;  %v6046_v38 = vcombine.high %v10658_v19, %v10670_v29 }
 0x69f   : > { %v6061_v9 = vcombine.low %v10675_v35, %v10678_v17  ;;  %12639 = vst [vmem:[#allocation113_spill] sm:$0xff] %v10844_v7 }
 0x6a0   : > { %5553 = vrot.lane.b32.xlu1 %v10511_v42, %s7734_s24  ;;  %5549 = vrot.lane.b32.xlu0 %v10519_v43, %s7734_s24 }
 0x6a4   : > { %5557 = vrot.lane.b32.xlu0 %v10521_v61, %s7734_s24  ;;  %4865 = vrot.lane.b32.xlu1 %v10571_v12, %s7734_s24 }
 0x6a8   : > { %4869 = vrot.lane.b32.xlu0 %v4644_v27, %s7734_s24  ;;  %4873 = vrot.lane.b32.xlu1 %v10577_v54, %s7734_s24 }
 0x6ac   : > { %5095 = vrot.lane.b32.xlu1 %v10571_v12, %s7735_s25  ;;  %4877 = vrot.lane.b32.xlu0 %v4648_v48, %s7734_s24 }
 0x6b0   : > { %5103 = vrot.lane.b32.xlu1 %v10577_v54, %s7735_s25  ;;  %5099 = vrot.lane.b32.xlu0 %v4644_v27, %s7735_s25 }
 0x6b4   : > { %5777 = vrot.lane.b32.xlu1 %v10573_v5, %s7735_s25  ;;  %5107 = vrot.lane.b32.xlu0 %v4648_v48, %s7735_s25 }
 0x6b8   : > { %5785 = vrot.lane.b32.xlu1 %v10579_v8, %s7735_s25  ;;  %5781 = vrot.lane.b32.xlu0 %v10602_v18, %s7735_s25 }
 0x6bc   : > { %6229 = vrot.lane.b32.xlu1 %v10592_v51, %s7734_s24  ;;  %5789 = vrot.lane.b32.xlu0 %v10615_v37, %s7735_s25 }
 0x6c0   : > { %6237 = vrot.lane.b32.xlu1 %v10581_v47, %s7734_s24  ;;  %6233 = vrot.lane.b32.xlu0 %v10627_v11, %s7734_s24 }
 0x6c4   : > { %6227 = vrot.lane.b32.xlu1 %v10600_v32, %s7734_s24  ;;  %6241 = vrot.lane.b32.xlu0 %v10617_v34, %s7734_s24 }
 0x6c8   : > { %6235 = vrot.lane.b32.xlu1 %v10594_v53, %s7734_s24  ;;  %6231 = vrot.lane.b32.xlu0 %v6007_v10, %s7734_s24 }
 0x6cc   : > { %5547 = vrot.lane.b32.xlu1 %v10573_v5, %s7734_s24  ;;  %6239 = vrot.lane.b32.xlu0 %v10629_v20, %s7734_s24 }
 0x6d0   : > { %5555 = vrot.lane.b32.xlu1 %v10579_v8, %s7734_s24  ;;  %5551 = vrot.lane.b32.xlu0 %v10602_v18, %s7734_s24 }
 0x6d4   : > { %6457 = vrot.lane.b32.xlu1 %v10600_v32, %s7735_s25  ;;  %5559 = vrot.lane.b32.xlu0 %v10615_v37, %s7734_s24 }
 0x6d8   : > { %6461 = vrot.lane.b32.xlu1 %v6007_v10, %s7735_s25  ;;  %6459 = vrot.lane.b32.xlu0 %v10592_v51, %s7735_s25 }
 0x6dc   : > { %6465 = vrot.lane.b32.xlu1 %v10594_v53, %s7735_s25  ;;  %6463 = vrot.lane.b32.xlu0 %v10627_v11, %s7735_s25 }
 0x6e0   : > { %6469 = vrot.lane.b32.xlu1 %v10629_v20, %s7735_s25  ;;  %6467 = vrot.lane.b32.xlu0 %v10581_v47, %s7735_s25 }
 0x6e4   : > { %6471 = vrot.lane.b32.xlu0 %v10617_v34, %s7735_s25  ;;  %s6909_s25 = sshll.u32 %s12747_s14, 3 }
 0x6f2   : > { %v4864_v42 = vpop.permute.xlu1 %4863 }
 0x6f6   : > { %v4868_v43 = vpop.permute.xlu0 %4867 }
 0x6fa   : > { %v4872_v61 = vpop.permute.xlu1 %4871 }
 0x6fb   : > { %v4887_v12 = vcombine.low %v4864_v42, %v4872_v61  ;;  %v4888_v10 = vcombine.high %v4864_v42, %v4872_v61 }
 0x6fd   : > { %v10765_v53 = vrot.slane %v4887_v12, %v8177_v6  ;;  %v10781_v12 = vrot.slane %v5364_v2, %v8447_v49  ;;  %v4902_v61 = vrot.slane %v4888_v10, %v8177_v6 }
 0x6fe   : > { %v5094_v5 = vpop.permute.xlu1 %5093  ;;  %v4876_v54 = vpop.permute.xlu0 %4875 }
 0x6ff   : > { %v4903_v8 = vcombine.low %v4868_v43, %v4876_v54  ;;  %v4904_v27 = vcombine.high %v4868_v43, %v4876_v54 }
 0x701   : > { %v10768_v32 = vrot.slane %v4903_v8, %v8177_v6  ;;  %v4918_v43 = vrot.slane %v4904_v27, %v8177_v6 }
 0x702   : > { %v5102_v18 = vpop.permute.xlu1 %5101  ;;  %v5098_v48 = vpop.permute.xlu0 %5097 }
 0x703   : > { %v4920_v20 = vcombine.high %v10765_v53, %v10768_v32  ;;  %v5117_v36 = vcombine.low %v5094_v5, %v5102_v18  ;;  %v5118_v56 = vcombine.high %v5094_v5, %v5102_v18  ;;  %v4936_v22 = vcombine.high %v4902_v61, %v4918_v43 }
 0x705   : > { %v10775_v26 = vrot.slane %v4920_v20, %v8447_v49  ;;  %v10790_v5 = vrot.slane %v5117_v36, %v8177_v6  ;;  %v5132_v18 = vrot.slane %v5118_v56, %v8177_v6  ;;  %v4935_v20 = vcombine.low %v4902_v61, %v4918_v43 }
 0x706   : > { %v10784_v54 = vpop.permute.xlu1 %5775  ;;  %v5106_v8 = vpop.permute.xlu0 %5105 }
 0x707   : > { %v5133_v25 = vcombine.low %v5098_v48, %v5106_v8  ;;  %v5134_v3 = vcombine.high %v5098_v48, %v5106_v8  ;;  %v7310_v42 = vpack.i.bf16 %v10781_v12, %v10775_v26  ;;  %v10832_v23 = vrot.slane %v4935_v20, %v8447_v49 }
 0x709   : > { %v10794_v2 = vrot.slane %v5133_v25, %v8177_v6  ;;  %v5148_v27 = vrot.slane %v5134_v3, %v8177_v6  ;;  %7311 = vrot.lane.b32.xlu1 %v7310_v42, %s7740_s28  ;;  %v10810_v3 = vrot.slane %v4697_v63, %v8447_v49  ;;  %v10821_v42 = vrot.slane %v4682_v13, %v8447_v49 }
 0x70a   : > { %v10798_v48 = vpop.permute.xlu1 %5783  ;;  %v10800_v8 = vpop.permute.xlu0 %5779  ;;  %v10829_v63 = vrot.slane %v4936_v22, %v8447_v49 }
 0x70b   : > { %v5150_v36 = vcombine.high %v10790_v5, %v10794_v2  ;;  %v5165_v56 = vcombine.low %v5132_v18, %v5148_v27  ;;  %v5799_v25 = vcombine.low %v10784_v54, %v10798_v48 }
 0x70d   : > { %v10815_v43 = vrot.slane %v5165_v56, %v8447_v49  ;;  %v10824_v61 = vrot.slane %v5150_v36, %v8447_v49  ;;  %v5166_v56 = vcombine.high %v5132_v18, %v5148_v27  ;;  %v10847_v22 = vrot.slane %v5799_v25, %v8177_v6 }
 0x70e   : > { %v5546_v10 = vpop.permute.xlu1 %5545  ;;  %v10826_v37 = vpop.permute.xlu0 %5787  ;;  %v10858_v27 = vrot.slane %v5379_v60, %v8447_v49  ;;  %v7330_v25 = vpack.i.bf16 %v10844_v7, %v10829_v63 }
 0x70f   : > { %v5815_v58 = vcombine.low %v10800_v8, %v10826_v37  ;;  %v7325_v13 = vpack.i.bf16 %v10815_v43, %v10810_v3  ;;  %v7315_v36 = vpack.i.bf16 %v10824_v61, %v10821_v42  ;;  %12640 = vst [vmem:[#allocation9_spill] sm:$0xff] %v10847_v22 }
 0x711   : > { %v10850_v18 = vrot.slane %v5815_v58, %v8177_v6  ;;  %7326 = vrot.lane.b32.xlu0 %v7325_v13, %s7743_s11  ;;  %7316 = vrot.lane.b32.xlu1 %v7315_v36, %s7740_s28  ;;  %v7320_v58 = vpack.i.bf16 %v10858_v27, %v10832_v23  ;;  %v10867_v13 = vrot.slane %v5166_v56, %v8447_v49 }
 0x712   : > { %v5554_v20 = vpop.permute.xlu1 %5553  ;;  %v5550_v55 = vpop.permute.xlu0 %5549 }
 0x713   : > { %12641 = vst [vmem:[#allocation65_spill] sm:$0xff] %v10850_v18  ;;  %12642 = vst [vmem:[#allocation90_spill] sm:$0xff] %v10867_v13  ;;  %v5569_v36 = vcombine.low %v5546_v10, %v5554_v20  ;;  %v5570_v62 = vcombine.high %v5546_v10, %v5554_v20  ;;  %v7335_v56 = vpack.i.bf16 %v10867_v13, %v10875_v39 }
 0x715   : > { %7331 = vrot.lane.b32.xlu0 %v7330_v25, %s7741_s29  ;;  %7321 = vrot.lane.b32.xlu1 %v7320_v58, %s7743_s11  ;;  %v10880_v31 = vrot.slane %v5569_v36, %v8177_v6  ;;  %v5584_v10 = vrot.slane %v5570_v62, %v8177_v6  ;;  %v10896_v62 = vrot.slane %v6046_v38, %v8447_v49 }
 0x716   : > { %v4866_v33 = vpop.permute.xlu1 %4865  ;;  %v5558_v60 = vpop.permute.xlu0 %5557 }
 0x717   : > { %v5585_v50 = vcombine.low %v5550_v55, %v5558_v60  ;;  %v5586_v1 = vcombine.high %v5550_v55, %v5558_v60  ;;  %12644 = vst [vmem:[#allocation91_spill] sm:$0xff] %v10896_v62 }
 0x719   : > { %v10884_v20 = vrot.slane %v5585_v50, %v8177_v6  ;;  %v5600_v25 = vrot.slane %v5586_v1, %v8177_v6  ;;  %7336 = vrot.lane.b32.xlu0 %v7335_v56, %s7741_s29  ;;  %v10908_v56 = vrot.slane %v6061_v9, %v8447_v49  ;;  %v12649_v9 = vcombine.high %v10675_v35, %v10678_v17 }
 0x71a   : > { %v4874_v52 = vpop.permute.xlu1 %4873  ;;  %v4870_v15 = vpop.permute.xlu0 %4869  ;;  %v12652_v17 = vcombine.high %v10613_v44, %v10648_v4 }
 0x71b   : > { %v5602_v55 = vcombine.high %v10880_v31, %v10884_v20  ;;  %v5617_v58 = vcombine.low %v5584_v10, %v5600_v25  ;;  %v5618_v36 = vcombine.high %v5584_v10, %v5600_v25  ;;  %v4955_v60 = vcombine.low %v4866_v33, %v4874_v52  ;;  %12647 = vst [vmem:[#allocation19_spill] sm:$0xff] %v10908_v56 }
 0x71d   : > { %v10899_v1 = vrot.slane %v5602_v55, %v8447_v49  ;;  %v10902_v50 = vrot.slane %v5617_v58, %v8447_v49  ;;  %v10911_v16 = vrot.slane %v5618_v36, %v8447_v49  ;;  %v10918_v39 = vrot.slane %v4955_v60, %v8177_v6 }
 0x71e   : > { %v5096_v10 = vpop.permute.xlu1 %5095  ;;  %v4878_v25 = vpop.permute.xlu0 %4877  ;;  %v10929_v36 = vrot.slane %v12649_v9, %v8447_v49 }
 0x71f   : > { %12645 = vst [vmem:[#allocation16_spill] sm:$0xff] %v10899_v1  ;;  %12646 = vst [vmem:[#allocation14_spill] sm:$0xff] %v10902_v50  ;;  %v4971_v38 = vcombine.low %v4870_v15, %v4878_v25  ;;  %v7345_v55 = vpack.i.bf16 %v10908_v56, %v10902_v50  ;;  %v7340_v58 = vpack.i.bf16 %v10896_v62, %v10899_v1 }
 0x720   : > { %12650 = vst [vmem:[#allocation67_spill] sm:$0xff] %v10929_v36  ;;  %v4972_v7 = vcombine.high %v4870_v15, %v4878_v25  ;;  %v4956_v62 = vcombine.high %v4866_v33, %v4874_v52  ;;  %v10945_v15 = vrot.slane %v12652_v17, %v8447_v49 }
 0x721   : > { %v10921_v13 = vrot.slane %v4971_v38, %v8177_v6  ;;  %7346 = vrot.lane.b32.xlu1 %v7345_v55, %s7743_s11  ;;  %7341 = vrot.lane.b32.xlu0 %v7340_v58, %s7740_s28  ;;  %v7350_v55 = vpack.i.bf16 %v10929_v36, %v10911_v16 }
 0x722   : > { %v5104_v56 = vpop.permute.xlu1 %5103  ;;  %v5100_v50 = vpop.permute.xlu0 %5099  ;;  %12653 = vst [vmem:[#allocation127_spill] sm:$0xff] %v10945_v15  ;;  %v4986_v60 = vrot.slane %v4972_v7, %v8177_v6  ;;  %v4970_v52 = vrot.slane %v4956_v62, %v8177_v6 }
 0x723   : > { %12648 = vst [vmem:[#allocation17_spill] sm:$0xff] %v10921_v13  ;;  %v4988_v38 = vcombine.high %v10918_v39, %v10921_v13  ;;  %v5185_v1 = vcombine.low %v5096_v10, %v5104_v56  ;;  %v5186_v35 = vcombine.high %v5096_v10, %v5104_v56 }
 0x725   : > { %v10938_v58 = vrot.slane %v4988_v38, %v8447_v49  ;;  %7351 = vrot.lane.b32.xlu1 %v7350_v55, %s7741_s29  ;;  %v10952_v56 = vrot.slane %v5185_v1, %v8177_v6  ;;  %v5200_v10 = vrot.slane %v5186_v35, %v8177_v6 }
 0x726   : > { %v5778_v25 = vpop.permute.xlu1 %5777  ;;  %v5108_v9 = vpop.permute.xlu0 %5107 }
 0x727   : > { %12651 = vst [vmem:[#allocation92_spill] sm:$0xff] %v10938_v58  ;;  %v5201_v13 = vcombine.low %v5100_v50, %v5108_v9  ;;  %v5202_v36 = vcombine.high %v5100_v50, %v5108_v9  ;;  %v7355_v33 = vpack.i.bf16 %v10945_v15, %v10938_v58  ;;  %12654 = vst [vmem:[#allocation11_spill] sm:$0xff] %v10952_v56 }
 0x728   : > { %v5004_v50 = vcombine.high %v4970_v52, %v4986_v60  ;;  %v5003_v15 = vcombine.low %v4970_v52, %v4986_v60  ;;  %v12660_v9 = vcombine.high %v10607_v57, %v10642_v28 }
 0x729   : > { %v10956_v38 = vrot.slane %v5201_v13, %v8177_v6  ;;  %v5216_v55 = vrot.slane %v5202_v36, %v8177_v6  ;;  %7356 = vrot.lane.b32.xlu1 %v7355_v33, %s7740_s28  ;;  %v12656_v13 = vcombine.low %v10610_v45, %v10645_v40 }
 0x72a   : > { %v5786_v7 = vpop.permute.xlu1 %5785  ;;  %v5782_v17 = vpop.permute.xlu0 %5781  ;;  %v10980_v4 = vrot.slane %v12660_v9, %v8447_v49  ;;  %v10983_v44 = vrot.slane %v5004_v50, %v8447_v49  ;;  %v12665_v50 = vcombine.high %v10632_v14, %v10652_v46 }
 0x72b   : > { %12655 = vst [vmem:[#allocation12_spill] sm:$0xff] %v10956_v38  ;;  %v5218_v62 = vcombine.high %v10952_v56, %v10956_v38  ;;  %v5233_v1 = vcombine.low %v5200_v10, %v5216_v55  ;;  %v10968_v35 = vrot.slane %v12656_v13, %v8447_v49  ;;  %v5867_v58 = vcombine.low %v5778_v25, %v5786_v7 }
 0x72c   : > { %12661 = vst [vmem:[#allocation15_spill] sm:$0xff] %v10980_v4  ;;  %12662 = vst [vmem:[#allocation69_spill] sm:$0xff] %v10983_v44  ;;  %v10990_v38 = vrot.slane %v5003_v15, %v8447_v49  ;;  %v5234_v56 = vcombine.high %v5200_v10, %v5216_v55 }
 0x72d   : > { %12657 = vst [vmem:[#allocation129_spill] sm:$0xff] %v10968_v35  ;;  %v10971_v36 = vrot.slane %v5218_v62, %v8447_v49  ;;  %v10974_v33 = vrot.slane %v5233_v1, %v8447_v49  ;;  %v10993_v28 = vrot.slane %v5867_v58, %v8177_v6  ;;  %v12667_v58 = vcombine.low %v10632_v14, %v10652_v46 }
 0x72e   : > { %v6230_v60 = vpop.permute.xlu1 %6229  ;;  %v5790_v52 = vpop.permute.xlu0 %5789  ;;  %12663 = vst [vmem:[#allocation93_spill] sm:$0xff] %v10990_v38  ;;  %v5816_v14 = vcombine.high %v10800_v8, %v10826_v37 }
 0x72f   : > { %12658 = vst [vmem:[#allocation34_spill] sm:$0xff] %v10971_v36  ;;  %12659 = vst [vmem:[#allocation125_spill] sm:$0xff] %v10974_v33  ;;  %v5883_v13 = vcombine.low %v5782_v17, %v5790_v52  ;;  %v7370_v62 = vpack.i.bf16 %v10974_v33, %v10968_v35  ;;  %v7360_v1 = vpack.i.bf16 %v10971_v36, %v10980_v4 }
 0x730   : > { %v11004_v35 = vrot.slane %v12665_v50, %v8447_v49  ;;  %v5884_v4 = vcombine.high %v5782_v17, %v5790_v52  ;;  %v11010_v10 = vrot.slane %v12667_v58, %v8447_v49 }
 0x731   : > { %v10996_v9 = vrot.slane %v5883_v13, %v8177_v6  ;;  %7371 = vrot.lane.b32.xlu1 %v7370_v62, %s7743_s11  ;;  %7361 = vrot.lane.b32.xlu0 %v7360_v1, %s7740_s28  ;;  %v11017_v62 = vrot.slane %v5234_v56, %v8447_v49  ;;  %v5868_v1 = vcombine.high %v5778_v25, %v5786_v7 }
 0x732   : > { %12666 = vst [vmem:[#allocation18_spill] sm:$0xff] %v11004_v35  ;;  %v6238_v15 = vpop.permute.xlu1 %6237  ;;  %v6234_v33 = vpop.permute.xlu0 %6233  ;;  %12668 = vst [vmem:[#allocation70_spill] sm:$0xff] %v11010_v10  ;;  %v7375_v13 = vpack.i.bf16 %v11004_v35, %v10983_v44  ;;  %v7365_v17 = vpack.i.bf16 %v11010_v10, %v10990_v38  ;;  %v11025_v46 = vrot.slane %v5884_v4, %v8177_v6 }
 0x733   : > { %12664 = vst [vmem:[#allocation117_spill] sm:$0xff] %v10996_v9  ;;  %12669 = vst [vmem:[#allocation94_spill] sm:$0xff] %v11017_v62  ;;  %v6319_v52 = vcombine.low %v6230_v60, %v6238_v15  ;;  %v6320_v50 = vcombine.high %v6230_v60, %v6238_v15  ;;  %v12670_v25 = vcombine.high %v10610_v45, %v10645_v40 }
 0x734   : > { %v5800_v15 = vcombine.high %v10784_v54, %v10798_v48  ;;  %v11037_v37 = vrot.slane %v5868_v1, %v8177_v6  ;;  %v5900_v4 = vcombine.high %v10993_v28, %v10996_v9  ;;  %v6082_v48 = vcombine.high %v10592_v51, %v10581_v47 }
 0x735   : > { %7376 = vrot.lane.b32.xlu1 %v7375_v13, %s7741_s29  ;;  %7366 = vrot.lane.b32.xlu0 %v7365_v17, %s7743_s11  ;;  %v11032_v56 = vrot.slane %v12670_v25, %v8447_v49  ;;  %v11044_v13 = vrot.slane %v6319_v52, %v8177_v6  ;;  %v11047_v45 = vrot.slane %v6320_v50, %v8177_v6 }
 0x736   : > { %v6228_v58 = vpop.permute.xlu1 %6227  ;;  %v6242_v55 = vpop.permute.xlu0 %6241  ;;  %v6098_v52 = vcombine.high %v10627_v11, %v10617_v34  ;;  %v5814_v51 = vrot.slane %v5800_v15, %v8177_v6  ;;  %v11076_v11 = vrot.slane %v6082_v48, %v8177_v6  ;;  %v5832_v50 = vcombine.high %v10847_v22, %v10850_v18 }
 0x737   : > { %12671 = vst [vmem:[#allocation109_spill] sm:$0xff] %v11032_v56  ;;  %v6335_v7 = vcombine.low %v6234_v33, %v6242_v55  ;;  %v6336_v60 = vcombine.high %v6234_v33, %v6242_v55  ;;  %v7390_v8 = vpack.i.bf16 %v11017_v62, %v11032_v56  ;;  %v5830_v33 = vrot.slane %v5816_v14, %v8177_v6 }
 0x738   : > { %v5916_v55 = vcombine.high %v11037_v37, %v11025_v46  ;;  %v5914_v14 = vrot.slane %v5900_v4, %v8447_v49  ;;  %v11084_v4 = vrot.slane %v6098_v52, %v8177_v6  ;;  %v12672_v48 = vmov 0.0  }
 0x739   : > { %v11050_v40 = vrot.slane %v6335_v7, %v8177_v6  ;;  %v11053_v54 = vrot.slane %v6336_v60, %v8177_v6  ;;  %7391 = vrot.lane.b32.xlu0 %v7390_v8, %s7741_s29  ;;  %v5847_v56 = vcombine.low %v5814_v51, %v5830_v33  ;;  %v5848_v44 = vcombine.high %v5814_v51, %v5830_v33 }
 0x73a   : > { %v6236_v1 = vpop.permute.xlu1 %6235  ;;  %v6232_v17 = vpop.permute.xlu0 %6231  ;;  %v11081_v62 = vrot.slane %v5916_v55, %v8447_v49 }
 0x73b   : > { %v6352_v25 = vcombine.high %v11044_v13, %v11050_v40  ;;  %v6368_v47 = vcombine.high %v11047_v45, %v11053_v54  ;;  %v6251_v7 = vcombine.low %v6228_v58, %v6236_v1  ;;  %v6252_v34 = vcombine.high %v6228_v58, %v6236_v1 }
 0x73c   : > { %v11090_v1 = vcombine.high %v5914_v14, %v12672_v48  ;;  %v5855_v51 = vrot.slane %v5847_v56, %v8447_v49 }
 0x73d   : > { %v6366_v60 = vrot.slane %v6352_v25, %v8447_v49  ;;  %v11073_v8 = vrot.slane %v6368_v47, %v8447_v49  ;;  %v11087_v58 = vrot.slane %v6251_v7, %v8177_v6  ;;  %v6266_v55 = vrot.slane %v6252_v34, %v8177_v6 }
 0x73e   : > { %v5548_v15 = vpop.permute.xlu1 %5547  ;;  %v6240_v35 = vpop.permute.xlu0 %6239  ;;  %12673 = vst [vmem:[#allocation71_spill] sm:$0xff] %v11090_v1 }
 0x73f   : > { %v6267_v25 = vcombine.low %v6232_v17, %v6240_v35  ;;  %v6268_v10 = vcombine.high %v6232_v17, %v6240_v35  ;;  %v7380_v47 = vpack.i.bf16 %v6366_v60, %v5914_v14  ;;  %v11093_v18 = vcombine.high %v6366_v60, %v12672_v48 }
 0x740   : > { %v11103_v35 = vcombine.high %v11073_v8, %v12672_v48  ;;  %v5846_v14 = vrot.slane %v5832_v50, %v8447_v49  ;;  %v11111_v60 = vcombine.high %v11081_v62, %v12672_v48 }
 0x741   : > { %12674 = vst [vmem:[#allocation95_spill] sm:$0xff] %v11093_v18  ;;  %v11097_v22 = vrot.slane %v6267_v25, %v8177_v6  ;;  %v6282_v52 = vrot.slane %v6268_v10, %v8177_v6  ;;  %7381 = vrot.lane.b32.xlu1 %v7380_v47, %s7740_s28  ;;  %v6129_v10 = vcombine.low %v11076_v11, %v11084_v4 }
 0x742   : > { %12676 = vst [vmem:[#allocation26_spill] sm:$0xff] %v11103_v35  ;;  %v5556_v33 = vpop.permute.xlu1 %5555  ;;  %v5552_v17 = vpop.permute.xlu0 %5551  ;;  %12677 = vst [vmem:[#allocation31_spill] sm:$0xff] %v11111_v60 }
 0x743   : > { %12675 = vst [vmem:[#allocation28_spill] sm:$0xff] %v11097_v22  ;;  %v6284_v34 = vcombine.high %v11087_v58, %v11097_v22  ;;  %v6299_v25 = vcombine.low %v6266_v55, %v6282_v52  ;;  %v6300_v47 = vcombine.high %v6266_v55, %v6282_v52  ;;  %v5637_v38 = vcombine.low %v5548_v15, %v5556_v33 }
 0x744   : > { %v5638_v36 = vcombine.high %v5548_v15, %v5556_v33  ;;  %v6114_v55 = vcombine.high %v10637_v30, %v10655_v21  ;;  %v11129_v15 = vrot.slane %v5848_v44, %v8447_v49  ;;  %v11132_v52 = vcombine.high %v5846_v14, %v12672_v48 }
 0x745   : > { %v6298_v50 = vrot.slane %v6284_v34, %v8447_v49  ;;  %v6307_v7 = vrot.slane %v6299_v25, %v8447_v49  ;;  %v11122_v1 = vrot.slane %v6300_v47, %v8447_v49  ;;  %v11135_v33 = vcombine.high %v5855_v51, %v12672_v48 }
 0x746   : > { %v6458_v18 = vpop.permute.xlu1 %6457  ;;  %v5560_v9 = vpop.permute.xlu0 %5559  ;;  %12678 = vst [vmem:[#allocation29_spill] sm:$0xff] %v11132_v52  ;;  %v11138_v60 = vrot.slane %v5637_v38, %v8177_v6  ;;  %v5652_v35 = vrot.slane %v5638_v36, %v8177_v6 }
 0x747   : > { %12679 = vst [vmem:[#allocation126_spill] sm:$0xff] %v11135_v33  ;;  %v5653_v34 = vcombine.low %v5552_v17, %v5560_v9  ;;  %v5654_v25 = vcombine.high %v5552_v17, %v5560_v9  ;;  %v7405_v47 = vpack.i.bf16 %v6307_v7, %v5855_v51  ;;  %v7385_v56 = vpack.i.bf16 %v6298_v50, %v5846_v14 }
 0x748   : > { %v11142_v21 = vcombine.high %v6298_v50, %v12672_v48  ;;  %v11145_v44 = vcombine.high %v6307_v7, %v12672_v48  ;;  %v11155_v38 = vcombine.high %v11122_v1, %v12672_v48  ;;  %v11163_v14 = vcombine.high %v11129_v15, %v12672_v48 }
 0x749   : > { %v11148_v30 = vrot.slane %v5653_v34, %v8177_v6  ;;  %v5668_v22 = vrot.slane %v5654_v25, %v8177_v6  ;;  %7406 = vrot.lane.b32.xlu0 %v7405_v47, %s7743_s11  ;;  %7386 = vrot.lane.b32.xlu1 %v7385_v56, %s7740_s28  ;;  %v6367_v34 = vcombine.low %v11047_v45, %v11053_v54 }
 0x74a   : > { %12680 = vst [vmem:[#allocation79_spill] sm:$0xff] %v11142_v21  ;;  %12681 = vst [vmem:[#allocation86_spill] sm:$0xff] %v11145_v44  ;;  %v6462_v36 = vpop.permute.xlu1 %6461  ;;  %v6460_v9 = vpop.permute.xlu0 %6459  ;;  %v6128_v25 = vrot.slane %v6114_v55, %v8447_v49  ;;  %v11179_v33 = vrot.slane %v6129_v10, %v8447_v49  ;;  %v5915_v7 = vcombine.low %v11037_v37, %v11025_v46 }
 0x74b   : > { %12682 = vst [vmem:[#allocation81_spill] sm:$0xff] %v11163_v14  ;;  %v5670_v56 = vcombine.high %v11138_v60, %v11148_v30  ;;  %v5685_v50 = vcombine.low %v5652_v35, %v5668_v22  ;;  %v5686_v21 = vcombine.high %v5652_v35, %v5668_v22  ;;  %v6130_v55 = vcombine.high %v11076_v11, %v11084_v4 }
 0x74c   : > { %v11194_v47 = vcombine.high %v6128_v25, %v12672_v48  ;;  %v11199_v22 = vrot.slane %v5915_v7, %v8447_v49 }
 0x74d   : > { %v5684_v51 = vrot.slane %v5670_v56, %v8447_v49  ;;  %v11176_v17 = vrot.slane %v5685_v50, %v8447_v49  ;;  %v11188_v56 = vrot.slane %v6367_v34, %v8447_v49  ;;  %v11204_v35 = vrot.slane %v5686_v21, %v8447_v49 }
 0x74e   : > { %v6466_v44 = vpop.permute.xlu1 %6465  ;;  %v6464_v52 = vpop.permute.xlu0 %6463 }
 0x74f   : > { %v7410_v45 = vpack.i.bf16 %v11179_v33, %v11176_v17  ;;  %v7395_v54 = vpack.i.bf16 %v6128_v25, %v5684_v51  ;;  %v6481_v50 = vcombine.low %v6458_v18, %v6466_v44  ;;  %v11191_v10 = vcombine.high %v5684_v51, %v12672_v48 }
 0x750   : > { %v6482_v46 = vcombine.high %v6458_v18, %v6466_v44  ;;  %v7415_v18 = vpack.i.bf16 %v11073_v8, %v11081_v62  ;;  %v7400_v7 = vpack.i.bf16 %v11188_v56, %v11199_v22  ;;  %v11214_v25 = vrot.slane %v6130_v55, %v8447_v49 }
 0x751   : > { %7411 = vrot.lane.b32.xlu0 %v7410_v45, %s7743_s11  ;;  %7396 = vrot.lane.b32.xlu1 %v7395_v54, %s7740_s28  ;;  %v11209_v44 = vrot.slane %v6481_v50, %v8177_v6 }
 0x752   : > { %v6470_v37 = vpop.permute.xlu1 %6469  ;;  %v6468_v11 = vpop.permute.xlu0 %6467  ;;  %v6496_v45 = vrot.slane %v6482_v46, %v8177_v6  ;;  %v7425_v46 = vpack.i.bf16 %v11214_v25, %v11204_v35 }
 0x753   : > { %v6497_v51 = vcombine.low %v6462_v36, %v6470_v37  ;;  %v6498_v34 = vcombine.high %v6462_v36, %v6470_v37  ;;  %v6549_v36 = vcombine.low %v6460_v9, %v6468_v11  ;;  %v6550_v62 = vcombine.high %v6460_v9, %v6468_v11 }
 0x755   : > { %v11218_v54 = vrot.slane %v6497_v51, %v8177_v6  ;;  %v6512_v21 = vrot.slane %v6498_v34, %v8177_v6  ;;  %7416 = vrot.lane.b32.xlu0 %v7415_v18, %s7741_s29  ;;  %7401 = vrot.lane.b32.xlu1 %v7400_v7, %s7743_s11  ;;  %v7420_v34 = vpack.i.bf16 %v11122_v1, %v11129_v15 }
 0x756   : > { %v6472_v8 = vpop.permute.xlu0 %6471  ;;  %v11230_v14 = vrot.slane %v6549_v36, %v8177_v6  ;;  %v6564_v11 = vrot.slane %v6550_v62, %v8177_v6  ;;  %v12683_v1 = vcombine.low %v10765_v53, %v10768_v32  ;;  %v12685_v32 = vcombine.low %v10540_v59, %v10543_v24 }
 0x757   : > { %v6513_v50 = vcombine.low %v11209_v44, %v11218_v54  ;;  %v6529_v37 = vcombine.low %v6496_v45, %v6512_v21  ;;  %v6530_v55 = vcombine.high %v6496_v45, %v6512_v21  ;;  %v6565_v4 = vcombine.low %v6464_v52, %v6472_v8 }
 0x758   : > { %v6566_v51 = vcombine.high %v6464_v52, %v6472_v8  ;;  %v6514_v9 = vcombine.high %v11209_v44, %v11218_v54  ;;  %v11245_v15 = vrot.slane %v12683_v1, %v8447_v49  ;;  %v12684_v52 = vcombine.low %v10790_v5, %v10794_v2  ;;  %v12743_v44 = vld [vmem:[#allocation26_spill] sm:$0xff]  ;;  %v12744_v54 = vld [vmem:[#allocation31_spill] sm:$0xff] }
 0x759   : > { %7426 = vrot.lane.b32.xlu0 %v7425_v46, %s7741_s29  ;;  %v11237_v18 = vrot.slane %v6565_v4, %v8177_v6  ;;  %7421 = vrot.lane.b32.xlu1 %v7420_v34, %s7741_s29  ;;  %v6537_v21 = vrot.slane %v6529_v37, %v8447_v49  ;;  %v11259_v53 = vrot.slane %v6530_v55, %v8447_v49 }
 0x75a   : > { %v6580_v7 = vrot.slane %v6566_v51, %v8177_v6  ;;  %v11251_v45 = vrot.slane %v12684_v52, %v8447_v49  ;;  %v11265_v5 = vrot.slane %v12685_v32, %v8447_v49  ;;  %v12686_v2 = vcombine.low %v10529_v0, %v10534_v41 }
 0x75b   : > { %v6581_v4 = vcombine.low %v11230_v14, %v11237_v18  ;;  %v6582_v6 = vcombine.high %v11230_v14, %v11237_v18  ;;  %v11274_v37 = vrot.slane %v6514_v9, %v8447_v49  ;;  %v4951_v59 = vcombine.high %v11245_v15, %v12672_v48 }
 0x75c   : > { %v6597_v36 = vcombine.low %v6564_v11, %v6580_v7  ;;  %v6598_v62 = vcombine.high %v6564_v11, %v6580_v7  ;;  %v11271_v8 = vrot.slane %v12686_v2, %v8447_v49  ;;  %v5181_v24 = vcombine.high %v11251_v45, %v12672_v48 }
 0x75d   : > { %v11277_v46 = vrot.slane %v6582_v6, %v8447_v49  ;;  %v11290_v34 = vcombine.high %v6537_v21, %v12672_v48  ;;  %v11297_v11 = vcombine.high %v11259_v53, %v12672_v48  ;;  %v5395_v52 = vcombine.high %v11265_v5, %v12672_v48 }
 0x75e   : > { %v6605_v55 = vrot.slane %v6597_v36, %v8447_v49  ;;  %v11281_v51 = vrot.slane %v6598_v62, %v8447_v49  ;;  %v5182_v2 = vcombine.high %v10824_v61, %v12672_v48  ;;  %v12687_v61 = vcombine.low %v10880_v31, %v10884_v20 }
 0x75f   : > { %v7430_v41 = vpack.i.bf16 %v11277_v46, %v11274_v37  ;;  %v7440_v62 = vpack.i.bf16 %v5395_v52, %v4951_v59  ;;  %v4953_v59 = vcombine.high %v10832_v23, %v12672_v48  ;;  %v4715_v23 = vcombine.high %v10810_v3, %v12672_v48 }
 0x760   : > { %v7435_v0 = vpack.i.bf16 %v6605_v55, %v6537_v21  ;;  %v11293_v9 = vcombine.high %v6605_v55, %v12672_v48  ;;  %v11301_v7 = vcombine.high %v11281_v51, %v12672_v48  ;;  %v7605_v1 = vpack.i.bf16 %v11281_v51, %v11259_v53 }
 0x761   : > { %7431 = vrot.lane.b32.xlu1 %v7430_v41, %s7740_s28  ;;  %v4713_v21 = vcombine.high %v11271_v8, %v12672_v48  ;;  %v4952_v55 = vcombine.high %v10775_v26, %v12672_v48  ;;  %v5396_v41 = vcombine.high %v10781_v12, %v12672_v48  ;;  %v5397_v12 = vcombine.high %v10858_v27, %v12672_v48  ;;  %v12689_v27 = vld [vmem:[#allocation113_spill] sm:$0xff]  ;;  %s392_s28 = scalar_lea.vmem %s11889_s10, %s6909_s25 }
 0x762   : > { %7436 = vrot.lane.b32.xlu0 %v7435_v0, %s7743_s11  ;;  %v7615_v6 = vpack.i.bf16 %v11293_v9, %v11290_v34  ;;  %v7620_v36 = vpack.i.bf16 %v11301_v7, %v11297_v11  ;;  %v4714_v0 = vcombine.high %v10821_v42, %v12672_v48  ;;  %v12688_v31 = vcombine.low %v10658_v19, %v10670_v29  ;;  %v12690_v29 = vld [vmem:[#allocation90_spill] sm:$0xff] }
 0x763   : > { %v7445_v32 = vpack.i.bf16 %v5181_v24, %v4713_v21  ;;  %v11331_v24 = vrot.slane %v12687_v61, %v8447_v49  ;;  %v7450_v52 = vpack.i.bf16 %v5396_v41, %v4952_v55  ;;  %v5183_v21 = vcombine.high %v10815_v43, %v12672_v48  ;;  %v12691_v41 = vld [vmem:[#allocation16_spill] sm:$0xff] }
 0x764   : > { %v7455_v26 = vpack.i.bf16 %v5182_v2, %v4714_v0  ;;  %v11345_v42 = vrot.slane %v12688_v31, %v8447_v49  ;;  %v7460_v20 = vpack.i.bf16 %v5397_v12, %v4953_v59  ;;  %v5398_v19 = vcombine.high %v12689_v27, %v12672_v48 }
 0x765   : > { %7446 = vrot.lane.b32.xlu1 %v7445_v32, %s7739_s27  ;;  %v5633_v43 = vcombine.high %v11331_v24, %v12672_v48  ;;  %v4954_v32 = vcombine.high %v10829_v63, %v12672_v48  ;;  %v5184_v2 = vcombine.high %v12690_v29, %v12672_v48  ;;  %v5634_v59 = vcombine.high %v12691_v41, %v12672_v48  ;;  %v12692_v63 = vld [vmem:[#allocation66_spill] sm:$0xff] }
 0x766   : > { %7441 = vrot.lane.b32.xlu0 %v7440_v62, %s7739_s27  ;;  %v7465_v62 = vpack.i.bf16 %v5183_v21, %v4715_v23  ;;  %v6077_v3 = vcombine.high %v11345_v42, %v12672_v48  ;;  %v4716_v61 = vcombine.high %v12692_v63, %v12672_v48  ;;  %v5636_v12 = vcombine.high %v10911_v16, %v12672_v48  ;;  %v12694_v23 = vld [vmem:[#allocation17_spill] sm:$0xff] }
 0x767   : > { %v7470_v0 = vpack.i.bf16 %v5398_v19, %v4954_v32  ;;  %v12695_v31 = vcombine.low %v10918_v39, %v12694_v23  ;;  %v12699_v19 = vld [vmem:[#allocation14_spill] sm:$0xff]  ;;  %v12701_v39 = vld [vmem:[#allocation19_spill] sm:$0xff]  ;;  %v6546_v18 = vcombine.high %v11274_v37, %v12672_v48  ;;  %v5704_v37 = vcombine.high %v11204_v35, %v12672_v48 }
 0x768   : > { %v7475_v55 = vpack.i.bf16 %v6077_v3, %v5633_v43  ;;  %v7480_v21 = vpack.i.bf16 %v5184_v2, %v4716_v61  ;;  %v12697_v43 = vld [vmem:[#allocation12_spill] sm:$0xff]  ;;  %v5635_v29 = vcombine.high %v12699_v19, %v12672_v48  ;;  %v12700_v2 = vld [vmem:[#allocation67_spill] sm:$0xff]  ;;  %v6079_v16 = vcombine.high %v12701_v39, %v12672_v48  ;;  %v12705_v61 = vld [vmem:[#allocation10_spill] sm:$0xff] }
 0x769   : > { %7451 = vrot.lane.b32.xlu1 %v7450_v52, %s7742_s30  ;;  %v12711_v39 = vld [vmem:[#allocation127_spill] sm:$0xff]  ;;  %v6786_v35 = vld [vmem:[#allocation4] sm:$0xf] }
 0x76a   : > { %7456 = vrot.lane.b32.xlu0 %v7455_v26, %s7742_s30  ;;  %v12693_v26 = vld [vmem:[#allocation91_spill] sm:$0xff] }
 0x76b   : > { %v6078_v52 = vcombine.high %v12693_v26, %v12672_v48 }
 0x76d   : > { %7466 = vrot.lane.b32.xlu1 %v7465_v62, %s7738_s26  ;;  %v12696_v62 = vld [vmem:[#allocation11_spill] sm:$0xff]  ;;  %v7485_v27 = vpack.i.bf16 %v6078_v52, %v5634_v59  ;;  %v12704_v59 = vld [vmem:[#allocation64_spill] sm:$0xff] }
 0x76e   : > { %7461 = vrot.lane.b32.xlu0 %v7460_v20, %s7738_s26  ;;  %v11373_v20 = vrot.slane %v12695_v31, %v8447_v49  ;;  %v12698_v32 = vcombine.low %v12696_v62, %v12697_v43  ;;  %v12706_v26 = vcombine.low %v12704_v59, %v12705_v61  ;;  %v7490_v62 = vpack.i.bf16 %v6079_v16, %v5635_v29  ;;  %v12712_v61 = vld [vmem:[#allocation34_spill] sm:$0xff] }
 0x76f   : > { %v5464_v16 = vcombine.high %v12711_v39, %v12672_v48 }
 0x770   : > { %v11379_v3 = vrot.slane %v12698_v32, %v8447_v49  ;;  %v11399_v52 = vrot.slane %v12706_v26, %v8447_v49  ;;  %v12708_v32 = vld [vmem:[#allocation117_spill] sm:$0xff]  ;;  %v5250_v26 = vcombine.high %v12712_v61, %v12672_v48 }
 0x771   : > { %7471 = vrot.lane.b32.xlu1 %v7470_v0, %s7744_s12  ;;  %v12702_v0 = vld [vmem:[#allocation36_spill] sm:$0xff] }
 0x772   : > { %7476 = vrot.lane.b32.xlu0 %v7475_v55, %s7739_s27  ;;  %v6080_v55 = vcombine.high %v12700_v2, %v12672_v48  ;;  %v12703_v41 = vcombine.low %v10607_v57, %v12702_v0  ;;  %v5249_v43 = vcombine.high %v11379_v3, %v12672_v48  ;;  %v5019_v57 = vcombine.high %v11373_v20, %v12672_v48  ;;  %v12710_v2 = vld [vmem:[#allocation92_spill] sm:$0xff] }
 0x774   : > { %v11393_v63 = vrot.slane %v12703_v41, %v8447_v49  ;;  %v7495_v23 = vpack.i.bf16 %v6080_v55, %v5636_v12  ;;  %v5020_v55 = vcombine.high %v12710_v2, %v12672_v48 }
 0x775   : > { %7486 = vrot.lane.b32.xlu1 %v7485_v27, %s7742_s30  ;;  %v12709_v27 = vcombine.low %v10993_v28, %v12708_v32 }
 0x776   : > { %7481 = vrot.lane.b32.xlu0 %v7480_v21, %s7744_s12  ;;  %v12707_v21 = vcombine.low %v11044_v13, %v11050_v40  ;;  %v4781_v13 = vcombine.high %v11393_v63, %v12672_v48  ;;  %v5463_v40 = vcombine.high %v11399_v52, %v12672_v48  ;;  %v7510_v41 = vpack.i.bf16 %v5464_v16, %v5020_v55  ;;  %v12720_v16 = vld [vmem:[#allocation70_spill] sm:$0xff] }
 0x777   : > { %v11415_v19 = vrot.slane %v12709_v27, %v8447_v49  ;;  %v12716_v27 = vld [vmem:[#allocation93_spill] sm:$0xff] }
 0x778   : > { %v11405_v31 = vrot.slane %v12707_v21, %v8447_v49  ;;  %v7505_v12 = vpack.i.bf16 %v5249_v43, %v4781_v13  ;;  %v7500_v29 = vpack.i.bf16 %v5463_v40, %v5019_v57  ;;  %v12715_v57 = vld [vmem:[#allocation129_spill] sm:$0xff]  ;;  %v5021_v13 = vcombine.high %v12716_v27, %v12672_v48  ;;  %v12717_v40 = vld [vmem:[#allocation28_spill] sm:$0xff]  ;;  %v12726_v27 = vld [vmem:[#allocation94_spill] sm:$0xff] }
 0x779   : > { %7491 = vrot.lane.b32.xlu1 %v7490_v62, %s7738_s26  ;;  %v5931_v0 = vcombine.high %v11415_v19, %v12672_v48  ;;  %v12714_v62 = vld [vmem:[#allocation15_spill] sm:$0xff]  ;;  %v4783_v32 = vcombine.high %v12715_v57, %v12672_v48 }
 0x77a   : > { %7496 = vrot.lane.b32.xlu0 %v7495_v23, %s7744_s12  ;;  %v6383_v28 = vcombine.high %v11405_v31, %v12672_v48  ;;  %v12713_v23 = vld [vmem:[#allocation125_spill] sm:$0xff]  ;;  %v4782_v43 = vcombine.high %v12714_v62, %v12672_v48  ;;  %v12725_v62 = vcombine.low %v11138_v60, %v11148_v30 }
 0x77b   : > { %v5251_v21 = vcombine.high %v12713_v23, %v12672_v48  ;;  %v12728_v30 = vld [vmem:[#allocation89_spill] sm:$0xff] }
 0x77c   : > { %v7525_v59 = vpack.i.bf16 %v6383_v28, %v5931_v0  ;;  %v7515_v2 = vpack.i.bf16 %v5250_v26, %v4782_v43  ;;  %v12719_v28 = vld [vmem:[#allocation69_spill] sm:$0xff]  ;;  %v5465_v0 = vcombine.high %v12720_v16, %v12672_v48  ;;  %v11469_v43 = vrot.slane %v12725_v62, %v8447_v49 }
 0x77d   : > { %7501 = vrot.lane.b32.xlu1 %v7500_v29, %s7739_s27  ;;  %v7535_v55 = vpack.i.bf16 %v5251_v21, %v4783_v32  ;;  %v5022_v39 = vcombine.high %v12719_v28, %v12672_v48  ;;  %v12729_v60 = vld [vmem:[#allocation21_spill] sm:$0xff] }
 0x77e   : > { %7506 = vrot.lane.b32.xlu0 %v7505_v12, %s7739_s27  ;;  %v12718_v12 = vcombine.low %v11087_v58, %v12717_v40  ;;  %v12724_v58 = vld [vmem:[#allocation18_spill] sm:$0xff]  ;;  %v7520_v21 = vpack.i.bf16 %v5465_v0, %v5021_v13  ;;  %v5252_v40 = vcombine.high %v12726_v27, %v12672_v48  ;;  %v5701_v0 = vcombine.high %v11469_v43, %v12672_v48 }
 0x77f   : > { %v5466_v26 = vcombine.high %v12724_v58, %v12672_v48  ;;  %v12731_v58 = vpack.i.bf16 %v11194_v47, %v11191_v10  ;;  %v12735_v47 = vld [vmem:[#allocation79_spill] sm:$0xff]  ;;  %v12736_v10 = vld [vmem:[#allocation29_spill] sm:$0xff] }
 0x780   : > { %v11449_v29 = vrot.slane %v12718_v12, %v8447_v49  ;;  %v12727_v12 = vld [vmem:[#allocation109_spill] sm:$0xff] }
 0x781   : > { %7526 = vrot.lane.b32.xlu1 %v7525_v59, %s7739_s27  ;;  %v12722_v59 = vld [vmem:[#allocation65_spill] sm:$0xff]  ;;  %v7540_v57 = vpack.i.bf16 %v5466_v26, %v5022_v39  ;;  %v5933_v26 = vcombine.high %v11199_v22, %v12672_v48  ;;  %v12738_v22 = vld [vmem:[#allocation86_spill] sm:$0xff] }
 0x782   : > { %7511 = vrot.lane.b32.xlu0 %v7510_v41, %s7742_s30  ;;  %v12721_v41 = vld [vmem:[#allocation9_spill] sm:$0xff]  ;;  %v6315_v32 = vcombine.high %v11449_v29, %v12672_v48 }
 0x783   : > { %v12723_v61 = vcombine.low %v12721_v41, %v12722_v59 }
 0x785   : > { %v11459_v23 = vrot.slane %v12723_v61, %v8447_v49  ;;  %7536 = vrot.lane.b32.xlu1 %v7535_v55, %s7738_s26  ;;  %v12730_v55 = vcombine.low %v12728_v30, %v12729_v60  ;;  %v6385_v61 = vcombine.high %v11188_v56, %v12672_v48  ;;  %v6147_v30 = vcombine.high %v11179_v33, %v12672_v48  ;;  %v12741_v33 = vld [vmem:[#allocation81_spill] sm:$0xff] }
 0x786   : > { %7516 = vrot.lane.b32.xlu0 %v7515_v2, %s7742_s30  ;;  %v4784_v2 = vcombine.high %v12727_v12, %v12672_v48  ;;  %v12739_v12 = vld [vmem:[#allocation126_spill] sm:$0xff]  ;;  %v11527_v60 = vrot.slane %v6581_v4, %v8447_v49  ;;  %v12742_v14 = vpack.i.bf16 %v11155_v38, %v12741_v33 }
 0x787   : > { %v5863_v13 = vcombine.high %v11459_v23, %v12672_v48  ;;  %v11485_v28 = vrot.slane %v12730_v55, %v8447_v49  ;;  %v7570_v62 = vpack.i.bf16 %v6385_v61, %v5933_v26  ;;  %v6148_v61 = vcombine.high %v11214_v25, %v12672_v48 }
 0x788   : > { %v7560_v16 = vpack.i.bf16 %v5252_v40, %v4784_v2  ;;  %v5703_v40 = vcombine.high %v11176_v17, %v12672_v48  ;;  %v12740_v2 = vpack.i.bf16 %v12738_v22, %v12739_v12  ;;  %v11529_v17 = vpop.permute.xlu0 %7326 }
 0x789   : > { %7541 = vrot.lane.b32.xlu1 %v7540_v57, %s7744_s12  ;;  %v7530_v39 = vpack.i.bf16 %v6315_v32, %v5863_v13  ;;  %v6145_v41 = vcombine.high %v11485_v28, %v12672_v48  ;;  %v12732_v57 = vld [vmem:[#allocation95_spill] sm:$0xff]  ;;  %v12737_v13 = vpack.i.bf16 %v12735_v47, %v12736_v10 }
 0x78a   : > { %7521 = vrot.lane.b32.xlu0 %v7520_v21, %s7738_s26  ;;  %v11502_v21 = vpop.permute.xlu1 %7311  ;;  %v12733_v32 = vld [vmem:[#allocation71_spill] sm:$0xff]  ;;  %v7580_v55 = vpack.i.bf16 %v6147_v30, %v5703_v40 }
 0x78b   : > { %v7545_v59 = vpack.i.bf16 %v6145_v41, %v5701_v0  ;;  %v12734_v27 = vpack.i.bf16 %v12732_v57, %v12733_v32 }
 0x78c   : > { %v11550_v41 = vpop.permute.xlu0 %7331 }
 0x78d   : > { %7561 = vrot.lane.b32.xlu1 %v7560_v16, %s7744_s12  ;;  %v11537_v16 = vrot.slane %v6513_v50, %v8447_v49  ;;  %v12745_v50 = vpack.i.bf16 %v12743_v44, %v12744_v54 }
 0x78e   : > { %7531 = vrot.lane.b32.xlu0 %v7530_v39, %s7739_s27  ;;  %v11509_v56 = vpop.permute.xlu1 %7316  ;;  %v6614_v39 = vcombine.high %v11277_v46, %v12672_v48  ;;  %v6613_v46 = vcombine.high %v11527_v60, %v12672_v48 }
 0x78f   : > { %v6545_v38 = vcombine.high %v11537_v16, %v12672_v48  ;;  %v6778_v48 = vld [vmem:[%s11887_s8] sm:$0xf] }
 0x790   : > { %v7610_v4 = vpack.i.bf16 %v6614_v39, %v6546_v18  ;;  %v7313_v18 = vunpack.i.l.bf16 %v11502_v21 }
 0x791   : > { %7566 = vrot.lane.b32.xlu1 %v12731_v58, %s7742_s30  ;;  %v11570_v58 = vpop.permute.xlu0 %7336 }
 0x792   : > { %7546 = vrot.lane.b32.xlu0 %v7545_v59, %s7739_s27  ;;  %v11539_v0 = vpop.permute.xlu1 %7321  ;;  %v7595_v59 = vpack.i.bf16 %v6613_v46, %v6545_v38  ;;  %v7318_v46 = vunpack.i.l.bf16 %v11509_v56 }
 0x795   : > { %7571 = vrot.lane.b32.xlu1 %v7570_v62, %s7738_s26  ;;  %v7600_v62 = vpack.i.bf16 %v6148_v61, %v5704_v37  ;;  %v11579_v34 = vpop.permute.xlu0 %7341  ;;  %v7324_v37 = vunpack.i.h.bf16 %v11539_v0 }
 0x796   : > { %7551 = vrot.lane.b32.xlu0 %v12734_v27, %s7742_s30  ;;  %v11552_v49 = vpop.permute.xlu1 %7346 }
 0x799   : > { %7576 = vrot.lane.b32.xlu1 %v12740_v2, %s7738_s26 }
 0x79a   : > { %7556 = vrot.lane.b32.xlu0 %v12737_v13, %s7742_s30  ;;  %v11572_v26 = vpop.permute.xlu1 %7351 }
 0x79d   : > { %7591 = vrot.lane.b32.xlu1 %v12742_v14, %s7744_s12  ;;  %v7314_v14 = vunpack.i.h.bf16 %v11502_v21  ;;  %v7328_v21 = vunpack.i.l.bf16 %v11529_v17 }
 0x79e   : > { %7581 = vrot.lane.b32.xlu0 %v7580_v55, %s7738_s26  ;;  %v11581_v9 = vpop.permute.xlu1 %7356 }
 0x7a1   : > { %7611 = vrot.lane.b32.xlu1 %v7610_v4, %s7742_s30  ;;  %v7319_v4 = vunpack.i.h.bf16 %v11509_v56  ;;  %v7323_v56 = vunpack.i.l.bf16 %v11539_v0 }
 0x7a2   : > { %7586 = vrot.lane.b32.xlu0 %v12745_v50, %s7744_s12 }
 0x7a3   : > { %v11590_v25 = vpop.permute.xlu0 %7361  ;;  %v11592_v11 = vpop.permute.xlu1 %7371 }
 0x7a5   : > { %7616 = vrot.lane.b32.xlu1 %v7615_v6, %s7738_s26 }
 0x7a6   : > { %7596 = vrot.lane.b32.xlu0 %v7595_v59, %s7739_s27  ;;  %v7329_v59 = vunpack.i.h.bf16 %v11529_v17 }
 0x7a7   : > { %v11594_v7 = vpop.permute.xlu0 %7366  ;;  %v11596_v6 = vpop.permute.xlu1 %7376 }
 0x7a9   : > { %7621 = vrot.lane.b32.xlu1 %v7620_v36, %s7744_s12 }
 0x7aa   : > { %7601 = vrot.lane.b32.xlu0 %v7600_v62, %s7744_s12 }
 0x7ab   : > { %v11598_v36 = vpop.permute.xlu0 %7391 }
 0x7ad   : > { %6789 = vperm.xlu1 %7309, %v6786_v35  }
 0x7ae   : > { %7606 = vrot.lane.b32.xlu0 %v7605_v1, %s7741_s29 }
 0x7b2   : > { %6781 = vperm.xlu0 %7308, %v6778_v48  }
 0x7b3   : > { %v11600_v57 = vpop.permute.xlu1 %7381 }
 0x7bb   : > { %v11602_v32 = vpop.permute.xlu1 %7386  ;;  %v11604_v53 = vpop.permute.xlu0 %7406 }
 0x7c3   : > { %v11606_v51 = vpop.permute.xlu1 %7396  ;;  %v11608_v1 = vpop.permute.xlu0 %7411 }
 0x7c7   : > { %v11610_v27 = vpop.permute.xlu1 %7401  ;;  %v11612_v40 = vpop.permute.xlu0 %7416 }
 0x7cb   : > { %v11614_v47 = vpop.permute.xlu1 %7421  ;;  %v11616_v10 = vpop.permute.xlu0 %7426 }
 0x7d3   : > { %v11618_v13 = vpop.permute.xlu1 %7431 }
 0x7d4   : > { %v11620_v22 = vpop.permute.xlu0 %7436 }
 0x7d7   : > { %v7447_v12 = vpop.permute.xlu1 %7446 }
 0x7d8   : > { %v7442_v2 = vpop.permute.xlu0 %7441  ;;  %v7449_v30 = vunpack.i.h.bf16 %v7447_v12  ;;  %v7448_v55 = vunpack.i.l.bf16 %v7447_v12 }
 0x7d9   : > { %v7444_v39 = vunpack.i.h.bf16 %v7442_v2  ;;  %v7443_v33 = vunpack.i.l.bf16 %v7442_v2 }
 0x7da   : > { %v5309_v44 = vsel %vm1216_vm8, %v11251_v45, %v7449_v30  ;;  %v4841_v54 = vsel %vm1216_vm8, %v11271_v8, %v7448_v55 }
 0x7db   : > { %v5523_v50 = vsel %vm1216_vm8, %v11265_v5, %v7444_v39  ;;  %v5079_v38 = vsel %vm1216_vm8, %v11245_v15, %v7443_v33  ;;  %v7452_v61 = vpop.permute.xlu1 %7451  ;;  %v4842_v15 = vsel %vm1218_vm9, %v4841_v54, %v7318_v46  ;;  %v5310_v2 = vsel %vm1218_vm9, %v5309_v44, %v7319_v4 }
 0x7dc   : > { %v7457_v62 = vpop.permute.xlu0 %7456  ;;  %v7454_v45 = vunpack.i.h.bf16 %v7452_v61  ;;  %v7453_v35 = vunpack.i.l.bf16 %v7452_v61  ;;  %v5080_v12 = vsel %vm1218_vm9, %v5079_v38, %v7313_v18  ;;  %v5524_v5 = vsel %vm1218_vm9, %v5523_v50, %v7314_v14 }
 0x7dd   : > { %v7459_v48 = vunpack.i.h.bf16 %v7457_v62  ;;  %v7458_v8 = vunpack.i.l.bf16 %v7457_v62  ;;  %v7334_v38 = vunpack.i.h.bf16 %v11550_v41  ;;  %v7333_v62 = vunpack.i.l.bf16 %v11550_v41 }
 0x7de   : > { %v5081_v17 = vsel %vm1220_vm10, %v5080_v12, %v7453_v35  ;;  %v5525_v30 = vsel %vm1220_vm10, %v5524_v5, %v7454_v45  ;;  %v7339_v45 = vunpack.i.h.bf16 %v11570_v58  ;;  %v7338_v35 = vunpack.i.l.bf16 %v11570_v58 }
 0x7df   : > { %v5311_v0 = vsel %vm1220_vm10, %v5310_v2, %v7459_v48  ;;  %v4843_v55 = vsel %vm1220_vm10, %v4842_v15, %v7458_v8  ;;  %v7467_v39 = vpop.permute.xlu1 %7466  ;;  %v5082_v14 = vsel %vm1222_vm11, %v5081_v17, %v7323_v56  ;;  %v5526_v46 = vsel %vm1222_vm11, %v5525_v30, %v7324_v37 }
 0x7e0   : > { %v4844_v33 = vsel %vm1222_vm11, %v4843_v55, %v7328_v21  ;;  %v5312_v61 = vsel %vm1222_vm11, %v5311_v0, %v7329_v59  ;;  %v7462_v18 = vpop.permute.xlu0 %7461  ;;  %v7469_v54 = vunpack.i.h.bf16 %v7467_v39  ;;  %v7468_v4 = vunpack.i.l.bf16 %v7467_v39 }
 0x7e1   : > { %v7464_v44 = vunpack.i.h.bf16 %v7462_v18  ;;  %v7463_v50 = vunpack.i.l.bf16 %v7462_v18  ;;  %v7348_v18 = vunpack.i.l.bf16 %v11552_v49 }
 0x7e2   : > { %v4845_v21 = vsel %vm1224_vm12, %v4844_v33, %v7468_v4  ;;  %v5313_v59 = vsel %vm1224_vm12, %v5312_v61, %v7469_v54  ;;  %v7349_v61 = vunpack.i.h.bf16 %v11552_v49 }
 0x7e3   : > { %v5083_v56 = vsel %vm1224_vm12, %v5082_v14, %v7463_v50  ;;  %v5527_v37 = vsel %vm1224_vm12, %v5526_v46, %v7464_v44  ;;  %v7472_v48 = vpop.permute.xlu1 %7471  ;;  %v4846_v41 = vsel %vm1226_vm13, %v4845_v21, %v7338_v35  ;;  %v5314_v15 = vsel %vm1226_vm13, %v5313_v59, %v7339_v45 }
 0x7e4   : > { %v5084_v8 = vsel %vm1226_vm13, %v5083_v56, %v7333_v62  ;;  %v5528_v12 = vsel %vm1226_vm13, %v5527_v37, %v7334_v38  ;;  %v7477_v5 = vpop.permute.xlu0 %7476  ;;  %v7474_v2 = vunpack.i.h.bf16 %v7472_v48  ;;  %v7473_v58 = vunpack.i.l.bf16 %v7472_v48 }
 0x7e5   : > { %v7479_v17 = vunpack.i.h.bf16 %v7477_v5  ;;  %v7478_v30 = vunpack.i.l.bf16 %v7477_v5  ;;  %v7344_v14 = vunpack.i.h.bf16 %v11579_v34  ;;  %v7343_v46 = vunpack.i.l.bf16 %v11579_v34 }
 0x7e6   : > { %v5085_v0 = vsel %vm1228_vm14, %v5084_v8, %v7473_v58  ;;  %v5529_v55 = vsel %vm1228_vm14, %v5528_v12, %v7474_v2 }
 0x7e7   : > { %v6205_v39 = vsel %vm1216_vm8, %v11345_v42, %v7479_v17  ;;  %v5761_v33 = vsel %vm1216_vm8, %v11331_v24, %v7478_v30  ;;  %v7487_v54 = vpop.permute.xlu1 %7486  ;;  %v6689_v45 = vrot.slane %v5085_v0, 4  ;;  %v6695_v35 = vrot.slane %v5529_v55, 4 }
 0x7e8   : > { %v7482_v4 = vpop.permute.xlu0 %7481  ;;  %v7489_v44 = vunpack.i.h.bf16 %v7487_v54  ;;  %v7488_v50 = vunpack.i.l.bf16 %v7487_v54  ;;  %v5762_v42 = vsel %vm1218_vm9, %v5761_v33, %v7343_v46  ;;  %v6206_v24 = vsel %vm1218_vm9, %v6205_v39, %v7344_v14 }
 0x7e9   : > { %v7484_v38 = vunpack.i.h.bf16 %v7482_v4  ;;  %v7483_v62 = vunpack.i.l.bf16 %v7482_v4  ;;  %v7354_v17 = vunpack.i.h.bf16 %v11572_v26  ;;  %v7359_v46 = vunpack.i.h.bf16 %v11581_v9 }
 0x7ea   : > { %v5763_v21 = vsel %vm1220_vm10, %v5762_v42, %v7488_v50  ;;  %v6207_v49 = vsel %vm1220_vm10, %v6206_v24, %v7489_v44  ;;  %v7358_v50 = vunpack.i.l.bf16 %v11581_v9  ;;  %v7363_v24 = vunpack.i.l.bf16 %v11590_v25 }
 0x7eb   : > { %v4847_v59 = vsel %vm1228_vm14, %v4846_v41, %v7483_v62  ;;  %v5315_v34 = vsel %vm1228_vm14, %v5314_v15, %v7484_v38  ;;  %v7492_v56 = vpop.permute.xlu1 %7491  ;;  %v5764_v37 = vsel %vm1222_vm11, %v5763_v21, %v7348_v18  ;;  %v6208_v48 = vsel %vm1222_vm11, %v6207_v49, %v7349_v61 }
 0x7ec   : > { %v11680_v8 = vpop.permute.xlu0 %7496  ;;  %v11683_v12 = vsel %vm517_vm0, %v4847_v59, %v6689_v45  ;;  %v11686_v5 = vsel %vm517_vm0, %v5315_v34, %v6695_v35  ;;  %v7494_v2 = vunpack.i.h.bf16 %v7492_v56  ;;  %v7493_v58 = vunpack.i.l.bf16 %v7492_v56 }
 0x7ed   : > { %v7353_v41 = vunpack.i.l.bf16 %v11572_v26  ;;  %v6720_v15 = vpack.c.bf16 %v11686_v5, %v11683_v12  ;;  %v7374_v38 = vunpack.i.h.bf16 %v11592_v11  ;;  %v7373_v62 = vunpack.i.l.bf16 %v11592_v11 }
 0x7ee   : > { %v5765_v30 = vsel %vm1224_vm12, %v5764_v37, %v7493_v58  ;;  %v6209_v0 = vsel %vm1224_vm12, %v6208_v48, %v7494_v2  ;;  %v7364_v45 = vunpack.i.h.bf16 %v11590_v25  ;;  %v7368_v59 = vunpack.i.l.bf16 %v11594_v7 }
 0x7ef   : > { %v11695_v55 = vsel %vm1226_vm13, %v5765_v30, %v7353_v41  ;;  %v11698_v39 = vsel %vm1226_vm13, %v6209_v0, %v7354_v17  ;;  %v7502_v33 = vpop.permute.xlu1 %7501  ;;  %v7378_v48 = vunpack.i.l.bf16 %v11596_v6  ;;  %v7394_v2 = vunpack.i.h.bf16 %v11598_v36 }
 0x7f0   : > { %v7507_v61 = vpop.permute.xlu0 %7506  ;;  %v7504_v18 = vunpack.i.h.bf16 %v7502_v33  ;;  %v7503_v14 = vunpack.i.l.bf16 %v7502_v33  ;;  %v7393_v30 = vunpack.i.l.bf16 %v11598_v36  ;;  %v7383_v33 = vunpack.i.l.bf16 %v11600_v57 }
 0x7f1   : > { %v7509_v4 = vunpack.i.h.bf16 %v7507_v61  ;;  %v7508_v44 = vunpack.i.l.bf16 %v7507_v61  ;;  %v7389_v61 = vunpack.i.h.bf16 %v11602_v32 }
 0x7f2   : > { %v5530_v26 = vsel %vm1216_vm8, %v11399_v52, %v7504_v18  ;;  %v5086_v54 = vsel %vm1216_vm8, %v11373_v20, %v7503_v14  ;;  %v7379_v52 = vunpack.i.h.bf16 %v11596_v6  ;;  %v7369_v20 = vunpack.i.h.bf16 %v11594_v7 }
 0x7f3   : > { %v11709_v35 = vpop.permute.xlu1 %7526  ;;  %v5087_v9 = vsel %vm1218_vm9, %v5086_v54, %v7358_v50  ;;  %v5531_v34 = vsel %vm1218_vm9, %v5530_v26, %v7359_v46  ;;  %v5316_v11 = vsel %vm1216_vm8, %v11379_v3, %v7509_v4  ;;  %v4848_v56 = vsel %vm1216_vm8, %v11393_v63, %v7508_v44 }
 0x7f4   : > { %v7512_v42 = vpop.permute.xlu0 %7511  ;;  %v7384_v3 = vunpack.i.h.bf16 %v11600_v57  ;;  %v4849_v6 = vsel %vm1218_vm9, %v4848_v56, %v7363_v24  ;;  %v5317_v18 = vsel %vm1218_vm9, %v5316_v11, %v7364_v45  ;;  %v7388_v14 = vunpack.i.l.bf16 %v11602_v32 }
 0x7f5   : > { %v7514_v21 = vunpack.i.h.bf16 %v7512_v42  ;;  %v7513_v49 = vunpack.i.l.bf16 %v7512_v42  ;;  %v7409_v46 = vunpack.i.h.bf16 %v11604_v53  ;;  %v7408_v24 = vunpack.i.l.bf16 %v11604_v53 }
 0x7f6   : > { %v7399_v45 = vunpack.i.h.bf16 %v11606_v51  ;;  %v7424_v32 = vunpack.i.h.bf16 %v11614_v47  ;;  %v7498_v53 = vunpack.i.l.bf16 %v11680_v8 }
 0x7f7   : > { %v5532_v25 = vsel %vm1220_vm10, %v5531_v34, %v7514_v21  ;;  %v5088_v37 = vsel %vm1220_vm10, %v5087_v9, %v7513_v49  ;;  %v7537_v58 = vpop.permute.xlu1 %7536  ;;  %v7414_v9 = vunpack.i.h.bf16 %v11608_v1 }
 0x7f8   : > { %v7517_v7 = vpop.permute.xlu0 %7516  ;;  %v5089_v17 = vsel %vm1222_vm11, %v5088_v37, %v7368_v59  ;;  %v5533_v41 = vsel %vm1222_vm11, %v5532_v25, %v7369_v20  ;;  %v7539_v54 = vunpack.i.h.bf16 %v7537_v58  ;;  %v7538_v4 = vunpack.i.l.bf16 %v7537_v58 }
 0x7f9   : > { %v7519_v0 = vunpack.i.h.bf16 %v7517_v7  ;;  %v7518_v63 = vunpack.i.l.bf16 %v7517_v7  ;;  %v7398_v59 = vunpack.i.l.bf16 %v11606_v51 }
 0x7fb   : > { %v4850_v26 = vsel %vm1220_vm10, %v4849_v6, %v7518_v63  ;;  %v5318_v36 = vsel %vm1220_vm10, %v5317_v18, %v7519_v0  ;;  %v7542_v42 = vpop.permute.xlu1 %7541  ;;  %v7529_v6 = vunpack.i.h.bf16 %v11709_v35  ;;  %v7528_v18 = vunpack.i.l.bf16 %v11709_v35 }
 0x7fc   : > { %v4851_v44 = vsel %vm1222_vm11, %v4850_v26, %v7373_v62  ;;  %v5319_v50 = vsel %vm1222_vm11, %v5318_v36, %v7374_v38  ;;  %v7522_v21 = vpop.permute.xlu0 %7521  ;;  %v7544_v37 = vunpack.i.h.bf16 %v7542_v42  ;;  %v7543_v58 = vunpack.i.l.bf16 %v7542_v42 }
 0x7fd   : > { %v7524_v49 = vunpack.i.h.bf16 %v7522_v21  ;;  %v7523_v20 = vunpack.i.l.bf16 %v7522_v21  ;;  %v4852_v34 = vsel %vm1224_vm12, %v4851_v44, %v7538_v4  ;;  %v5320_v11 = vsel %vm1224_vm12, %v5319_v50, %v7539_v54 }
 0x7fe   : > { %v4853_v56 = vsel %vm1226_vm13, %v4852_v34, %v7393_v30  ;;  %v5321_v25 = vsel %vm1226_vm13, %v5320_v11, %v7394_v2  ;;  %v7419_v30 = vunpack.i.h.bf16 %v11612_v40  ;;  %v7403_v35 = vunpack.i.l.bf16 %v11610_v27 }
 0x7ff   : > { %v5090_v62 = vsel %vm1224_vm12, %v5089_v17, %v7523_v20  ;;  %v5534_v38 = vsel %vm1224_vm12, %v5533_v41, %v7524_v49  ;;  %v7562_v0 = vpop.permute.xlu1 %7561  ;;  %v7413_v41 = vunpack.i.l.bf16 %v11608_v1  ;;  %v7429_v44 = vunpack.i.h.bf16 %v11616_v10 }
 0x800   : > { %v5091_v7 = vsel %vm1226_vm13, %v5090_v62, %v7378_v48  ;;  %v5535_v51 = vsel %vm1226_vm13, %v5534_v38, %v7379_v52  ;;  %v7532_v63 = vpop.permute.xlu0 %7531  ;;  %v7564_v26 = vunpack.i.h.bf16 %v7562_v0  ;;  %v7563_v17 = vunpack.i.l.bf16 %v7562_v0 }
 0x801   : > { %v5092_v2 = vsel %vm1228_vm14, %v5091_v7, %v7543_v58  ;;  %v5536_v36 = vsel %vm1228_vm14, %v5535_v51, %v7544_v37  ;;  %v7404_v48 = vunpack.i.h.bf16 %v11610_v27  ;;  %v7418_v52 = vunpack.i.l.bf16 %v11612_v40 }
 0x802   : > { %v4854_v54 = vsel %vm1228_vm14, %v4853_v56, %v7563_v17  ;;  %v5322_v4 = vsel %vm1228_vm14, %v5321_v25, %v7564_v26  ;;  %v6690_v21 = vrot.slane %v5092_v2, 4  ;;  %v6696_v49 = vrot.slane %v5536_v36, 4 }
 0x803   : > { %v7567_v50 = vpop.permute.xlu1 %7566  ;;  %v6450_v20 = vsel %vm1216_vm8, %v11405_v31, %v7529_v6  ;;  %v5998_v34 = vsel %vm1216_vm8, %v11415_v19, %v7528_v18  ;;  %v7534_v38 = vunpack.i.h.bf16 %v7532_v63  ;;  %v7533_v56 = vunpack.i.l.bf16 %v7532_v63 }
 0x804   : > { %v7547_v42 = vpop.permute.xlu0 %7546  ;;  %v6712_v25 = vsel %vm517_vm0, %v4854_v54, %v6690_v21  ;;  %v6714_v27 = vsel %vm517_vm0, %v5322_v4, %v6696_v49  ;;  %v7428_v37 = vunpack.i.l.bf16 %v11616_v10  ;;  %v7569_v51 = vunpack.i.h.bf16 %v7567_v50 }
 0x805   : > { %v7549_v11 = vunpack.i.h.bf16 %v7547_v42  ;;  %v7548_v62 = vunpack.i.l.bf16 %v7547_v42  ;;  %v6721_v31 = vpack.c.bf16 %v6714_v27, %v6712_v25  ;;  %v7568_v0 = vunpack.i.l.bf16 %v7567_v50 }
 0x806   : > { %v5999_v26 = vsel %vm1218_vm9, %v5998_v34, %v7383_v33  ;;  %v6443_v2 = vsel %vm1216_vm8, %v11449_v29, %v7534_v38  ;;  %v7438_v10 = vunpack.i.l.bf16 %v11620_v22 }
 0x807   : > { %v6212_v58 = vsel %vm1216_vm8, %v11485_v28, %v7549_v11  ;;  %v5768_v7 = vsel %vm1216_vm8, %v11469_v43, %v7548_v62  ;;  %v7572_v63 = vpop.permute.xlu1 %7571  ;;  %6737 = vmatprep.subr.bf16.mxu1 %v6721_v31  ;;  %v6451_v28 = vsel %vm1218_vm9, %v6450_v20, %v7384_v3  ;;  %v6444_v1 = vsel %vm1218_vm9, %v6443_v2, %v7389_v61 }
 0x808   : > { %v6213_v19 = vsel %vm1218_vm9, %v6212_v58, %v7399_v45  ;;  %v5769_v6 = vsel %vm1218_vm9, %v5768_v7, %v7398_v59  ;;  %v7552_v18 = vpop.permute.xlu0 %7551  ;;  %v5991_v45 = vsel %vm1216_vm8, %v11459_v23, %v7533_v56  ;;  %6738 = vmatpush1.bf16.msra.mxu1 %v6720_v15  ;;  %v7574_v54 = vunpack.i.h.bf16 %v7572_v63 }
 0x809   : > { %v7554_v17 = vunpack.i.h.bf16 %v7552_v18  ;;  %v7553_v43 = vunpack.i.l.bf16 %v7552_v18  ;;  %v5770_v59 = vsel %vm1220_vm10, %v5769_v6, %v7568_v0  ;;  %v6214_v33 = vsel %vm1220_vm10, %v6213_v19, %v7569_v51 }
 0x80a   : > { %v5771_v36 = vsel %vm1222_vm11, %v5770_v59, %v7413_v41  ;;  %v6215_v29 = vsel %vm1222_vm11, %v6214_v33, %v7414_v9  ;;  %v7573_v23 = vunpack.i.l.bf16 %v7572_v63  ;;  %v5992_v21 = vsel %vm1218_vm9, %v5991_v45, %v7388_v14 }
 0x80b   : > { %v6452_v57 = vsel %vm1220_vm10, %v6451_v28, %v7554_v17  ;;  %v6000_v3 = vsel %vm1220_vm10, %v5999_v26, %v7553_v43  ;;  %v7577_v5 = vpop.permute.xlu1 %7576  ;;  %v7423_v61 = vunpack.i.l.bf16 %v11614_v47  ;;  %v5767_v26 = vsel %vm1228_vm14, %v11695_v55, %v7498_v53 }
 0x80c   : > { %v6453_v4 = vsel %vm1222_vm11, %v6452_v57, %v7404_v48  ;;  %v6001_v12 = vsel %vm1222_vm11, %v6000_v3, %v7403_v35  ;;  %v7557_v15 = vpop.permute.xlu0 %7556  ;;  %v7579_v41 = vunpack.i.h.bf16 %v7577_v5  ;;  %v7578_v9 = vunpack.i.l.bf16 %v7577_v5 }
 0x80d   : > { %v7559_v50 = vunpack.i.h.bf16 %v7557_v15  ;;  %v7558_v42 = vunpack.i.l.bf16 %v7557_v15  ;;  %v6002_v49 = vsel %vm1224_vm12, %v6001_v12, %v7573_v23  ;;  %v6454_v48 = vsel %vm1224_vm12, %v6453_v4, %v7574_v54 }
 0x80e   : > { %v6003_v34 = vsel %vm1226_vm13, %v6002_v49, %v7418_v52  ;;  %v6455_v14 = vsel %vm1226_vm13, %v6454_v48, %v7419_v30 }
 0x80f   : > { %v5993_v35 = vsel %vm1220_vm10, %v5992_v21, %v7558_v42  ;;  %v6445_v20 = vsel %vm1220_vm10, %v6444_v1, %v7559_v50  ;;  %v7592_v38 = vpop.permute.xlu1 %7591 }
 0x810   : > { %v5994_v11 = vsel %vm1222_vm11, %v5993_v35, %v7408_v24  ;;  %v6446_v62 = vsel %vm1222_vm11, %v6445_v20, %v7409_v46  ;;  %v7582_v56 = vpop.permute.xlu0 %7581  ;;  %v7594_v25 = vunpack.i.h.bf16 %v7592_v38  ;;  %v7593_v52 = vunpack.i.l.bf16 %v7592_v38 }
 0x811   : > { %v5995_v40 = vsel %vm1224_vm12, %v5994_v11, %v7578_v9  ;;  %v6447_v30 = vsel %vm1224_vm12, %v6446_v62, %v7579_v41  ;;  %v7584_v58 = vunpack.i.h.bf16 %v7582_v56  ;;  %v7583_v7 = vunpack.i.l.bf16 %v7582_v56 }
 0x812   : > { %v5996_v27 = vsel %vm1226_vm13, %v5995_v40, %v7423_v61  ;;  %v6448_v47 = vsel %vm1226_vm13, %v6447_v30, %v7424_v32  ;;  %v7499_v24 = vunpack.i.h.bf16 %v11680_v8 }
 0x813   : > { %v5997_v46 = vsel %vm1228_vm14, %v5996_v27, %v7593_v52  ;;  %v6449_v31 = vsel %vm1228_vm14, %v6448_v47, %v7594_v25  ;;  %v5772_v19 = vsel %vm1224_vm12, %v5771_v36, %v7583_v7  ;;  %v6216_v6 = vsel %vm1224_vm12, %v6215_v29, %v7584_v58  ;;  %v7612_v63 = vpop.permute.xlu1 %7611 }
 0x814   : > { %v6701_v51 = vrot.slane %v5997_v46, 4  ;;  %v6707_v0 = vrot.slane %v6449_v31, 4  ;;  %v7587_v18 = vpop.permute.xlu0 %7586  ;;  %v6211_v28 = vsel %vm1228_vm14, %v11698_v39, %v7499_v24  ;;  %v5773_v8 = vsel %vm1226_vm13, %v5772_v19, %v7428_v37  ;;  %v6719_v46 = vld [vmem:[%s11886_s7] sm:$0x3] }
 0x815   : > { %v6217_v17 = vsel %vm1226_vm13, %v6216_v6, %v7429_v44  ;;  %v7589_v59 = vunpack.i.h.bf16 %v7587_v18  ;;  %v7588_v33 = vunpack.i.l.bf16 %v7587_v18  ;;  %v7434_v39 = vunpack.i.h.bf16 %v11618_v13 }
 0x816   : > { %v6715_v43 = vsel %vm517_vm0, %v5767_v26, %v6701_v51  ;;  %v6717_v2 = vsel %vm517_vm0, %v6211_v28, %v6707_v0  ;;  %v7433_v29 = vunpack.i.l.bf16 %v11618_v13  ;;  %v7439_v37 = vunpack.i.h.bf16 %v11620_v22 }
 0x817   : > { %v6722_v45 = vpack.c.bf16 %v6717_v2, %v6715_v43  ;;  %v7617_v57 = vpop.permute.xlu1 %7616  ;;  %v7614_v44 = vunpack.i.h.bf16 %v7612_v63  ;;  %v7613_v54 = vunpack.i.l.bf16 %v7612_v63  ;;  %v6004_v12 = vsel %vm1228_vm14, %v6003_v34, %v7588_v33 }
 0x818   : > { %v7597_v55 = vpop.permute.xlu0 %7596  ;;  %v6456_v5 = vsel %vm1228_vm14, %v6455_v14, %v7589_v59  ;;  %v6702_v9 = vrot.slane %v6004_v12, 4  ;;  %v7619_v48 = vunpack.i.h.bf16 %v7617_v57  ;;  %v7618_v35 = vunpack.i.l.bf16 %v7617_v57 }
 0x819   : > { %v7599_v3 = vunpack.i.h.bf16 %v7597_v55  ;;  %v7598_v36 = vunpack.i.l.bf16 %v7597_v55  ;;  %v6708_v49 = vrot.slane %v6456_v5, 4 }
 0x81b   : > { %v6680_v23 = vsel %vm1216_vm8, %v11527_v60, %v7599_v3  ;;  %v6673_v4 = vsel %vm1216_vm8, %v11537_v16, %v7598_v36  ;;  %v7622_v21 = vpop.permute.xlu1 %7621 }
 0x81c   : > { %v6681_v15 = vsel %vm1218_vm9, %v6680_v23, %v7434_v39  ;;  %v6674_v13 = vsel %vm1218_vm9, %v6673_v4, %v7433_v29  ;;  %v7602_v50 = vpop.permute.xlu0 %7601  ;;  %v7624_v20 = vunpack.i.h.bf16 %v7622_v21  ;;  %v7623_v56 = vunpack.i.l.bf16 %v7622_v21 }
 0x81d   : > { %v6682_v42 = vsel %vm1220_vm10, %v6681_v15, %v7614_v44  ;;  %v6675_v22 = vsel %vm1220_vm10, %v6674_v13, %v7613_v54  ;;  %v7604_v1 = vunpack.i.h.bf16 %v7602_v50  ;;  %v7603_v41 = vunpack.i.l.bf16 %v7602_v50 }
 0x81e   : > { %v6676_v60 = vsel %vm1222_vm11, %v6675_v22, %v7438_v10  ;;  %v6683_v16 = vsel %vm1222_vm11, %v6682_v42, %v7439_v37 }
 0x81f   : > { %v5774_v34 = vsel %vm1228_vm14, %v5773_v8, %v7603_v41  ;;  %v6218_v14 = vsel %vm1228_vm14, %v6217_v17, %v7604_v1  ;;  %v6677_v25 = vsel %vm1224_vm12, %v6676_v60, %v7618_v35  ;;  %v6684_v52 = vsel %vm1224_vm12, %v6683_v16, %v7619_v48 }
 0x820   : > { %v7607_v32 = vpop.permute.xlu0 %7606  ;;  %v6716_v62 = vsel %vm517_vm0, %v5774_v34, %v6702_v9  ;;  %v6718_v38 = vsel %vm517_vm0, %v6218_v14, %v6708_v49  ;;  %vm6726_vm0 = vcmask 293888  }
 0x821   : > { %v7609_v61 = vunpack.i.h.bf16 %v7607_v32  ;;  %v7608_v11 = vunpack.i.l.bf16 %v7607_v32  ;;  %v6723_v40 = vpack.c.bf16 %v6718_v38, %v6716_v62 }
 0x823   : > { %v6678_v30 = vsel %vm1226_vm13, %v6677_v25, %v7608_v11  ;;  %v6685_v27 = vsel %vm1226_vm13, %v6684_v52, %v7609_v61  ;;  %6739 = vmatprep.subr.bf16.mxu1 %v6723_v40 }
 0x824   : > { %v6686_v47 = vsel %vm1228_vm14, %v6685_v27, %v7624_v20  ;;  %v6679_v58 = vsel %vm1228_vm14, %v6678_v30, %v7623_v56  ;;  %6740 = vmatpush1.bf16.msra.mxu1 %v6722_v45 }
 0x825   : > { %v6725_v7 = vpack.c.bf16 %v6686_v47, %v6686_v47  ;;  %v6724_v24 = vpack.c.bf16 %v6679_v58, %v6679_v58 }
 0x827   : > { %6903 = vmatprep.subr.msk.bf16.mxu1 %vm6730_vm1, %v6725_v7  ;;  %v6732_v53 = vsel %vm6730_vm1, %v6724_v24, 0 }
 0x828   : > { %6742 = vmatpush1.bf16.msra.mxu1 %v6732_v53 }
 0x82b   : > { %6904 = vmatmul.mubr.msk.bf16.vlgmr.msra.gmra.mrb[8].mxu1 %vm6726_vm0, %v6719_v46 }
 0x82c   : > { %v6790_v6 = vpop.permute.xlu1 %6789 }
 0x831   : > { %v6782_v31 = vpop.permute.xlu0 %6781 }
 0x8fe   : > { %v6771_v51 = vpop.f32.mrb[8].mxu1 }
 0x8ff   : > { %v6784_v0 = vmul.f32 %v6782_v31, %v6771_v51  ;;  %v6773_v19 = vpop.f32.mrb[9].mxu1 }
 0x900   : > { %v6785_v63 = vmul.f32 %v6782_v31, %v6773_v19  ;;  %v6775_v18 = vpop.f32.mrb[10].mxu1 }
 0x901   : > { %v6792_v26 = vadd.f32 %v6790_v6, %v6784_v0  ;;  %v6776_v28 = vpop.f32.mrb[11].mxu1 }
 0x902   : > { %v6793_v8 = vadd.f32 %v6790_v6, %v6785_v63 }
 0x903   : > { %v6794_v17 = vmax.f32 %v6792_v26, 0.0 }
 0x904   : > { %v6795_v43 = vmax.f32 %v6793_v8, 0.0 }
 0x906   : > { %v6798_v2 = vcombine.low %v6794_v17, %v6795_v43 }
 0x908   : > { %6800 = vst [vmem:[%s392_s28] sm:$0xff] %v6798_v2 }
 0x909 PF: > { %s21_s13 = sadd.s32 1, %s7729_s13  }
 0x90a   : > { %p18_p2 = scmp.ge.s32.totalorder %s21_s13, 4  }
 0x90c   :  { %20 = sbr.rel (!%p18_p2) target bundleno = 1 (0x1), region = 98 }
 0x913   :  { %6822 = vsyncpa [#allocation5], 1 }
 0x914   :  { %6824 = vsyncpa [#allocation5 + $0x1], 1 }

</bundles_post_ra>
